<compile_context>
chip_gen: v7x
topology: tpu7x:2x2x1
jax: 0.10.0
libtpu: 0.0.40
codegen_flags: <defaults>
</compile_context>

<pallas_src>
import math

import jax
import jax.numpy as jnp
from jax.experimental import pallas as pl
from jax.experimental.pallas import tpu as pltpu  # noqa: F401

# ----- small synthetic config (mirrors args.* hyper-params) -----
B          = 2          # batch_size
T_CNN      = 8          # number of cnn_feats tokens (attention length)
N_FRAMES   = 4          # frames in appear / motion before mean
MPS        = 16         # motion_projected_size
V2         = 2 * MPS    # 2 * motion_projected_size (cnn_feats feature size)
REASON     = 16         # reason_size
WORD       = 32         # word_size
HQ         = 32         # query_hidden_size
HD         = 32         # decode_hidden_size
HV         = 32         # visual_hidden_size (attention output size)
VOCAB      = 48         # vocab size
MAX_WORDS  = 6
START_ID   = 1
LN_EPS     = 1e-5

_PACK = 128             # lane width of all packed slabs

# --- f32 small-vector slab: one (128-lane) row per parameter, zero padded ---
(_R_B_EI, _R_B_ER, _R_W_FI, _R_B_FI, _R_W_FR, _R_B_FR, _R_BQ,
 _R_QLN_G, _R_QLN_B, _R_ALN_G, _R_ALN_B, _R_BL, _R_LLN_G, _R_LLN_B,
 _R_WR_B) = range(15)
_VEC_ROWS = 16          # padded to a sublane multiple

# --- bf16 weight slab: static row offsets (all multiples of 16 for bf16 tiling) ---
_OFF_WQ_G   = 0                           # (V2,       4*HQ)  gfeat  -> query gates
_OFF_WQ_W   = _OFF_WQ_G   + V2            # (WORD,     4*HQ)  word   -> query gates
_OFF_WQ_REC = _OFF_WQ_W   + WORD          # (HD+HQ,    4*HQ)  [lh,qh]-> query gates (fused ih|hh)
_OFF_WL     = _OFF_WQ_REC + HD + HQ       # (HV+HQ+HD, 4*HD)  [ctx,q,lh] -> lang gates (fused)
_OFF_ATTKV  = _OFF_WL     + HV + HQ + HD  # (V2,       2*HV)  folded K|V projection
_OFF_ATTQ   = _OFF_ATTKV  + V2            # (HQ,       HV)
_OFF_ATTO   = _OFF_ATTQ   + HQ            # (HV,       HV)
_OFF_WR     = _OFF_ATTO   + HV            # (HD,       VOCAB)
_OFF_WEI    = _OFF_WR     + HD            # (REASON,   MPS)
_OFF_WER    = _OFF_WEI    + REASON        # (REASON,   MPS)
_WSLAB_ROWS = _OFF_WER    + REASON        # = 384


# ---------------------------------------------------------------------------
# in-kernel helpers (traced inside the Pallas kernel)
# ---------------------------------------------------------------------------
def _layernorm(x, g, b):
    mu = jnp.mean(x, axis=-1, keepdims=True)
    var = jnp.mean((x - mu) ** 2, axis=-1, keepdims=True)
    return (x - mu) * jax.lax.rsqrt(var + LN_EPS) * g + b


def _lstm_from_gates(gates, c, H):
    # gates are pre-permuted offline to [i, f, o | g]:
    #   one sigmoid over 3H lanes + one tanh over H lanes (2 EUP calls per cell/step).
    s = jax.nn.sigmoid(gates[:, :3 * H])
    g = jnp.tanh(gates[:, 3 * H:4 * H])
    i = s[:, 0 * H:1 * H]
    f = s[:, 1 * H:2 * H]
    o = s[:, 2 * H:3 * H]
    c_new = f * c + i * g
    h_new = o * jnp.tanh(c_new)
    return h_new, c_new


# ---------------------------------------------------------------------------
# Single fused kernel: feature fusion + hoisted projections + unrolled recurrence
# ---------------------------------------------------------------------------
def decoder_kernel(words_ref, cnn_ref, act_ref, wslab_ref, vec_ref, out_ref):
    f32 = jnp.float32
    bf16 = jnp.bfloat16

    def w_rows(off, rows):
        # slice the bf16 weight slab at the call site (keeps weights out of vregs)
        return wslab_ref[pl.ds(off, rows), :]

    # ---- unpack the small-vector slab (static value slices, f32) ----
    vec = vec_ref[...]                                            # (_VEC_ROWS, 128)
    b_ei  = vec[_R_B_EI:_R_B_EI + 1, :MPS]
    b_er  = vec[_R_B_ER:_R_B_ER + 1, :MPS]
    w_fi  = vec[_R_W_FI:_R_W_FI + 1, :V2]
    b_fi  = vec[_R_B_FI:_R_B_FI + 1, :1]
    w_fr  = vec[_R_W_FR:_R_W_FR + 1, :V2]
    b_fr  = vec[_R_B_FR:_R_B_FR + 1, :1]
    bq    = vec[_R_BQ:_R_BQ + 1, :4 * HQ]                         # permuted [i,f,o,g]
    qln_g = vec[_R_QLN_G:_R_QLN_G + 1, :HQ]
    qln_b = vec[_R_QLN_B:_R_QLN_B + 1, :HQ]
    aln_g = vec[_R_ALN_G:_R_ALN_G + 1, :HV]
    aln_b = vec[_R_ALN_B:_R_ALN_B + 1, :HV]
    bl    = vec[_R_BL:_R_BL + 1, :4 * HD]                         # permuted [i,f,o,g]
    lln_g = vec[_R_LLN_G:_R_LLN_G + 1, :HD]
    lln_b = vec[_R_LLN_B:_R_LLN_B + 1, :HD]
    wr_b  = vec[_R_WR_B:_R_WR_B + 1, :]                           # full 128 (lanes >= VOCAB are 0)

    # ---- feature fusion -> global_feat (one lane-dense activation slab) ----
    am = act_ref[pl.ds(0, B), :]                                  # (B,128): appear | motion (flattened frames)
    zz = act_ref[pl.ds(B, B), :]                                  # (B,128): z_inds | z_rel

    def frame_mean(block, base):                                  # mean over N_FRAMES via lane slices
        acc = block[:, base:base + MPS]
        for fidx in range(1, N_FRAMES):
            acc = acc + block[:, base + fidx * MPS:base + (fidx + 1) * MPS]
        return acc * (1.0 / N_FRAMES)

    app = frame_mean(am, 0)                                       # (B, MPS)
    mot = frame_mean(am, N_FRAMES * MPS)                          # (B, MPS)

    zi_in = zz[:, :REASON].astype(bf16)
    zr_in = zz[:, REASON:2 * REASON].astype(bf16)
    zi = jnp.dot(zi_in, w_rows(_OFF_WEI, REASON),
                 preferred_element_type=f32)[:, :MPS] + b_ei
    zi = jnp.where(zi > 0, zi, 0.2 * zi)                          # LeakyReLU(0.2)
    zr = jnp.dot(zr_in, w_rows(_OFF_WER, REASON),
                 preferred_element_type=f32)[:, :MPS] + b_er
    zr = jnp.where(zr > 0, zr, 0.2 * zr)

    a_feats = jnp.concatenate([app, zi], axis=1)                  # (B, V2)
    m_feats = jnp.concatenate([mot, zr], axis=1)
    beta_a = jax.nn.sigmoid(jnp.sum(a_feats * w_fi, axis=-1, keepdims=True) + b_fi)
    beta_m = jax.nn.sigmoid(jnp.sum(m_feats * w_fr, axis=-1, keepdims=True) + b_fr)
    gfeat = jnp.concatenate([app + beta_a * zi, mot + beta_m * zr], axis=1)   # (B, V2)

    # ---- loop-invariant hoists ----
    # (a) attention K / V with a single folded matmul
    cnn2 = cnn_ref[...]                                           # (B*T_CNN, V2) bf16
    kv = jnp.dot(cnn2, w_rows(_OFF_ATTKV, V2), preferred_element_type=f32)    # (B*T, 128)
    K  = kv[:, :HV].reshape(B, T_CNN, HV)
    Vv = kv[:, HV:2 * HV].reshape(B, T_CNN, HV)

    # (b) teacher-forced / global-feature part of the query-LSTM input projection,
    #     batched over all MAX_WORDS steps (bias folded in as well)
    gproj = jnp.dot(gfeat.astype(bf16), w_rows(_OFF_WQ_G, V2),
                    preferred_element_type=f32)                   # (B, 4*HQ)
    wproj = jnp.dot(words_ref[...], w_rows(_OFF_WQ_W, WORD),
                    preferred_element_type=f32)                   # (MW*B, 4*HQ)
    hoist = wproj + jnp.tile(gproj, (MAX_WORDS, 1)) + bq          # (MW*B, 4*HQ)

    inv_scale = jnp.float32(1.0 / math.sqrt(HV))

    # _init_lstm_state
    qh = jnp.zeros((B, HQ), f32)
    qc = jnp.zeros((B, HQ), f32)
    lh = jnp.zeros((B, HD), f32)
    lc = jnp.zeros((B, HD), f32)

    dec_outs = []
    alphas = []
    for step in range(MAX_WORDS):          # fully unrolled (MAX_WORDS is small & static)
        # ---- query LSTM: single fused matmul on the recurrent state only ----
        sq = jnp.concatenate([lh, qh], axis=1).astype(bf16)       # (B, HD+HQ)
        gates_q = (hoist[step * B:(step + 1) * B, :]
                   + jnp.dot(sq, w_rows(_OFF_WQ_REC, HD + HQ),
                             preferred_element_type=f32))
        qh, qc = _lstm_from_gates(gates_q, qc, HQ)
        query_cur = _layernorm(qh, qln_g, qln_b)                  # dropout == identity

        # ---- AttentionShare(cnn_feats, query_cur); K/V hoisted above ----
        Qv = jnp.dot(query_cur.astype(bf16), w_rows(_OFF_ATTQ, HQ),
                     preferred_element_type=f32)[:, :HV]          # (B, HV)
        att_logits = jnp.sum(K * Qv[:, None, :], axis=-1) * inv_scale        # (B, T_CNN)
        m = jnp.max(att_logits, axis=1, keepdims=True)
        e = jnp.exp(att_logits - m)
        # NOTE: approx reciprocal -> weights sum to ~1 (use approx=False for bit-closeness)
        inv_den = pl.reciprocal(jnp.sum(e, axis=1, keepdims=True), approx=True)
        weight = e * inv_den                                      # softmax over frames
        mid = jnp.sum(Vv * weight[:, :, None], axis=1)            # (B, HV)
        att = jnp.tanh(jnp.dot(mid.astype(bf16), w_rows(_OFF_ATTO, HV),
                               preferred_element_type=f32)[:, :HV])
        context = _layernorm(att, aln_g, aln_b)                   # (B, HV)

        # ---- lang LSTM: single fused (ih|hh) matmul ----
        xl = jnp.concatenate([context, query_cur, lh], axis=1).astype(bf16)   # (B, HV+HQ+HD)
        gates_l = jnp.dot(xl, w_rows(_OFF_WL, HV + HQ + HD),
                          preferred_element_type=f32) + bl
        lh, lc = _lstm_from_gates(gates_l, lc, HD)

        dec_outs.append(jnp.tanh(_layernorm(lh, lln_g, lln_b)))   # (B, HD)
        alphas.append(weight)                                     # (B, T_CNN)

    # ---- one lane-dense word_restore matmul + ONE lane-dense output store ----
    dec_all = jnp.concatenate(dec_outs, axis=0).astype(bf16)      # (MW*B, HD), step-major
    logits = jnp.dot(dec_all, w_rows(_OFF_WR, HD),
                     preferred_element_type=f32) + wr_b           # (MW*B, 128); lanes >= VOCAB are 0
    alpha_all = jnp.concatenate(alphas, axis=0)                   # (MW*B, T_CNN)
    alpha_pad = jnp.concatenate(
        [jnp.zeros((MAX_WORDS * B, VOCAB), f32),
         alpha_all,
         jnp.zeros((MAX_WORDS * B, _PACK - VOCAB - T_CNN), f32)], axis=1)
    out_ref[...] = logits + alpha_pad                             # single (MW*B, 128) store


# ---------------------------------------------------------------------------
# One-time parameter preparation (outside the per-call jitted path)
# ---------------------------------------------------------------------------
def prepare_params(params):
    """Permute LSTM gates to [i,f,o,g], pre-transpose, fuse W_ih|W_hh, pack slabs."""
    f32 = jnp.float32

    def perm_gate_rows(w, H):        # w: (4H, K), PyTorch order i,f,g,o -> i,f,o,g
        return jnp.concatenate([w[:2 * H], w[3 * H:4 * H], w[2 * H:3 * H]], axis=0)

    def perm_gate_vec(b, H):         # b: (1, 4H)
        return jnp.concatenate([b[:, :2 * H], b[:, 3 * H:4 * H], b[:, 2 * H:3 * H]], axis=1)

    wq_ih_pt = perm_gate_rows(params["wq_ih"], HQ).T.astype(f32)   # (HD+V2+WORD, 4*HQ)
    wq_hh_pt = perm_gate_rows(params["wq_hh"], HQ).T.astype(f32)   # (HQ, 4*HQ)
    wl_ih_pt = perm_gate_rows(params["wl_ih"], HD).T.astype(f32)   # (HV+HQ, 4*HD)
    wl_hh_pt = perm_gate_rows(params["wl_hh"], HD).T.astype(f32)   # (HD, 4*HD)

    pieces = [
        (_OFF_WQ_G,   wq_ih_pt[HD:HD + V2]),                       # gfeat  part of W_ih
        (_OFF_WQ_W,   wq_ih_pt[HD + V2:]),                         # word   part of W_ih
        (_OFF_WQ_REC, jnp.concatenate([wq_ih_pt[:HD], wq_hh_pt], axis=0)),    # fused ih|hh
        (_OFF_WL,     jnp.concatenate([wl_ih_pt, wl_hh_pt], axis=0)),         # fused ih|hh
        (_OFF_ATTKV,  jnp.concatenate([params["attK"].T, params["attV"].T], axis=1)),
        (_OFF_ATTQ,   params["attQ"].T),
        (_OFF_ATTO,   params["attO"].T),
        (_OFF_WR,     params["wr_w"].T),
        (_OFF_WEI,    params["w_ei"].T),
        (_OFF_WER,    params["w_er"].T),
    ]
    wslab = jnp.zeros((_WSLAB_ROWS, _PACK), f32)
    for off, mat in pieces:
        r, c = mat.shape
        wslab = wslab.at[off:off + r, :c].set(mat.astype(f32))
    wslab = wslab.astype(jnp.bfloat16)

    def row(v):
        v = jnp.reshape(v, (-1,)).astype(f32)
        return jnp.pad(v, (0, _PACK - v.shape[0]))

    vec = jnp.stack([
        row(params["b_ei"]), row(params["b_er"]),
        row(params["w_fi"]), row(params["b_fi"]),
        row(params["w_fr"]), row(params["b_fr"]),
        row(perm_gate_vec(params["bq"], HQ)),
        row(params["qln_g"]), row(params["qln_b"]),
        row(params["aln_g"]), row(params["aln_b"]),
        row(perm_gate_vec(params["bl"], HD)),
        row(params["lln_g"]), row(params["lln_b"]),
        row(params["wr_b"]),
        jnp.zeros((_PACK,), f32),                                  # pad to _VEC_ROWS
    ], axis=0)
    assert vec.shape == (_VEC_ROWS, _PACK)

    return {"wslab": wslab, "vec": vec, "embed": params["embed"].astype(f32)}


# ---------------------------------------------------------------------------
# Per-call wrapper (jitted)
# ---------------------------------------------------------------------------
def decoder_forward(cnn_feats, z_inds, z_rel, appear, motion, captions, prepped):
    # word embedding lookups (glue; teacher forcing: step i consumes captions[:, i-1],
    # step 0 consumes <start>)
    start = jnp.full((B, 1), START_ID, dtype=jnp.int32)
    ids = jnp.concatenate([start, captions[:, :MAX_WORDS - 1]], axis=1)       # (B, MW)
    words = jnp.take(prepped["embed"], ids, axis=0)                           # (B, MW, WORD)
    words = jnp.transpose(words, (1, 0, 2)).reshape(MAX_WORDS * B, WORD)
    words = words.astype(jnp.bfloat16)                                        # step-major

    cnn2 = cnn_feats.reshape(B * T_CNN, V2).astype(jnp.bfloat16)

    # lane-dense activation slab: rows 0..B-1 = [appear | motion], rows B..2B-1 = [zi | zr]
    row_am = jnp.concatenate([appear.reshape(B, N_FRAMES * MPS),
                              motion.reshape(B, N_FRAMES * MPS)], axis=1)
    row_am = jnp.pad(row_am, ((0, 0), (0, _PACK - 2 * N_FRAMES * MPS)))
    row_zz = jnp.concatenate([z_inds, z_rel], axis=1)
    row_zz = jnp.pad(row_zz, ((0, 0), (0, _PACK - 2 * REASON)))
    act = jnp.concatenate([row_am, row_zz], axis=0).astype(jnp.float32)       # (2B, 128)

    out = pl.pallas_call(
        decoder_kernel,
        out_shape=jax.ShapeDtypeStruct((MAX_WORDS * B, _PACK), jnp.float32),
    )(words, cnn2, act, prepped["wslab"], prepped["vec"])

    # slice the packed output slab back apart; PyTorch layout:
    #   outputs (B, max_words, vocab), alpha_all (B, max_words, T, 1)
    logits = out[:, :VOCAB].reshape(MAX_WORDS, B, VOCAB)
    alpha = out[:, VOCAB:VOCAB + T_CNN].reshape(MAX_WORDS, B, T_CNN)
    outputs = jnp.transpose(logits, (1, 0, 2))
    alpha_all = jnp.transpose(alpha, (1, 0, 2))[..., None]
    return outputs, alpha_all


# ---------------------------------------------------------------------------
# Deterministic parameter init + example run
# ---------------------------------------------------------------------------
def init_params(key):
    ks = jax.random.split(key, 16)
    s = 0.05
    n = lambda k, shape: (jax.random.normal(k, shape, jnp.float32) * s)
    p = {
        # embed_ind / embed_rel
        "w_ei": n(ks[0], (MPS, REASON)), "b_ei": jnp.zeros((1, MPS), jnp.float32),
        "w_er": n(ks[1], (MPS, REASON)), "b_er": jnp.zeros((1, MPS), jnp.float32),
        # fusion gates
        "w_fi": n(ks[2], (1, V2)), "b_fi": jnp.zeros((1, 1), jnp.float32),
        "w_fr": n(ks[3], (1, V2)), "b_fr": jnp.zeros((1, 1), jnp.float32),
        # word embedding
        "embed": n(ks[4], (VOCAB, WORD)),
        # query LSTMCell (input = HD + V2 + WORD); bias is pre-summed b_ih + b_hh
        "wq_ih": n(ks[5], (4 * HQ, HD + V2 + WORD)),
        "wq_hh": n(ks[6], (4 * HQ, HQ)),
        "bq": jnp.zeros((1, 4 * HQ), jnp.float32),
        "qln_g": jnp.ones((1, HQ), jnp.float32), "qln_b": jnp.zeros((1, HQ), jnp.float32),
        # AttentionShare
        "attK": n(ks[7], (HV, V2)), "attQ": n(ks[8], (HV, HQ)),
        "attV": n(ks[9], (HV, V2)), "attO": n(ks[10], (HV, HV)),
        "aln_g": jnp.ones((1, HV), jnp.float32), "aln_b": jnp.zeros((1, HV), jnp.float32),
        # lang LSTMCell (input = HV + HQ); bias is pre-summed b_ih + b_hh
        "wl_ih": n(ks[11], (4 * HD, HV + HQ)),
        "wl_hh": n(ks[12], (4 * HD, HD)),
        "bl": jnp.zeros((1, 4 * HD), jnp.float32),
        "lln_g": jnp.ones((1, HD), jnp.float32), "lln_b": jnp.zeros((1, HD), jnp.float32),
        # word_restore
        "wr_w": n(ks[13], (VOCAB, HD)), "wr_b": jnp.zeros((1, VOCAB), jnp.float32),
    }
    return p


if __name__ == "__main__":
    key = jax.random.PRNGKey(0)
    kp, k1, k2, k3, k4, k5, k6 = jax.random.split(key, 7)

    params = init_params(kp)
    prepped = prepare_params(params)   # one-time packing, hoisted out of the per-call path

    cnn_feats = jax.random.normal(k1, (B, T_CNN, V2), jnp.float32)
    z_inds = jax.random.normal(k2, (B, REASON), jnp.float32)
    z_rel = jax.random.normal(k3, (B, REASON), jnp.float32)
    appear = jax.random.normal(k4, (B, N_FRAMES, MPS), jnp.float32)
    motion = jax.random.normal(k5, (B, N_FRAMES, MPS), jnp.float32)
    captions = jax.random.randint(k6, (B, MAX_WORDS), 0, VOCAB, jnp.int32)

    fwd = jax.jit(decoder_forward)
    outputs, alpha_all = fwd(cnn_feats, z_inds, z_rel, appear, motion, captions, prepped)
    jax.block_until_ready((outputs, alpha_all))

    assert outputs.shape == (B, MAX_WORDS, VOCAB)
    assert alpha_all.shape == (B, MAX_WORDS, T_CNN, 1)
    assert bool(jnp.all(jnp.isfinite(outputs)))
    assert bool(jnp.all(jnp.isfinite(alpha_all)))
    print("KERNEL_OK")
</pallas_src>

<mosaic_0001>
module attributes {stable_mosaic.version = 11 : i64} {
  func.func @decoder_kernel(%arg0: memref<12x32xbf16, #tpu.memory_space<vmem>>, %arg1: memref<16x32xbf16, #tpu.memory_space<vmem>>, %arg2: memref<4x128xf32, #tpu.memory_space<vmem>>, %arg3: memref<384x128xbf16, #tpu.memory_space<vmem>>, %arg4: memref<16x128xf32, #tpu.memory_space<vmem>>, %arg5: memref<12x128xf32, #tpu.memory_space<vmem>>) attributes {dimension_semantics = [], scalar_prefetch = 0 : i64, scratch_operands = 0 : i64, tpu.core_type = #tpu.core_type<tc>} {
    %c0 = arith.constant 0 : index
    %c0_0 = arith.constant 0 : index
    %0 = vector.load %arg4[%c0, %c0_0] : memref<16x128xf32, #tpu.memory_space<vmem>>, vector<16x128xf32>
    %1 = vector.extract_strided_slice %0 {offsets = [0, 0], sizes = [1, 16], strides = [1, 1]} : vector<16x128xf32> to vector<1x16xf32>
    %2 = vector.extract_strided_slice %0 {offsets = [1, 0], sizes = [1, 16], strides = [1, 1]} : vector<16x128xf32> to vector<1x16xf32>
    %3 = vector.extract_strided_slice %0 {offsets = [2, 0], sizes = [1, 32], strides = [1, 1]} : vector<16x128xf32> to vector<1x32xf32>
    %4 = vector.extract_strided_slice %0 {offsets = [3, 0], sizes = [1, 1], strides = [1, 1]} : vector<16x128xf32> to vector<1x1xf32>
    %5 = vector.extract_strided_slice %0 {offsets = [4, 0], sizes = [1, 32], strides = [1, 1]} : vector<16x128xf32> to vector<1x32xf32>
    %6 = vector.extract_strided_slice %0 {offsets = [5, 0], sizes = [1, 1], strides = [1, 1]} : vector<16x128xf32> to vector<1x1xf32>
    %7 = vector.extract_strided_slice %0 {offsets = [6, 0], sizes = [1, 128], strides = [1, 1]} : vector<16x128xf32> to vector<1x128xf32>
    %8 = vector.extract_strided_slice %0 {offsets = [7, 0], sizes = [1, 32], strides = [1, 1]} : vector<16x128xf32> to vector<1x32xf32>
    %9 = vector.extract_strided_slice %0 {offsets = [8, 0], sizes = [1, 32], strides = [1, 1]} : vector<16x128xf32> to vector<1x32xf32>
    %10 = vector.extract_strided_slice %0 {offsets = [9, 0], sizes = [1, 32], strides = [1, 1]} : vector<16x128xf32> to vector<1x32xf32>
    %11 = vector.extract_strided_slice %0 {offsets = [10, 0], sizes = [1, 32], strides = [1, 1]} : vector<16x128xf32> to vector<1x32xf32>
    %12 = vector.extract_strided_slice %0 {offsets = [11, 0], sizes = [1, 128], strides = [1, 1]} : vector<16x128xf32> to vector<1x128xf32>
    %13 = vector.extract_strided_slice %0 {offsets = [12, 0], sizes = [1, 32], strides = [1, 1]} : vector<16x128xf32> to vector<1x32xf32>
    %14 = vector.extract_strided_slice %0 {offsets = [13, 0], sizes = [1, 32], strides = [1, 1]} : vector<16x128xf32> to vector<1x32xf32>
    %15 = vector.extract_strided_slice %0 {offsets = [14, 0], sizes = [1, 128], strides = [1, 1]} : vector<16x128xf32> to vector<1x128xf32>
    %c0_1 = arith.constant 0 : index
    %c0_2 = arith.constant 0 : index
    %16 = vector.load %arg2[%c0_1, %c0_2] : memref<4x128xf32, #tpu.memory_space<vmem>>, vector<2x128xf32>
    %c2 = arith.constant 2 : index
    %c0_3 = arith.constant 0 : index
    %17 = vector.load %arg2[%c2, %c0_3] : memref<4x128xf32, #tpu.memory_space<vmem>>, vector<2x128xf32>
    %18 = vector.extract_strided_slice %16 {offsets = [0, 0], sizes = [2, 16], strides = [1, 1]} : vector<2x128xf32> to vector<2x16xf32>
    %19 = vector.extract_strided_slice %16 {offsets = [0, 16], sizes = [2, 16], strides = [1, 1]} : vector<2x128xf32> to vector<2x16xf32>
    %20 = arith.addf %18, %19 : vector<2x16xf32>
    %21 = vector.extract_strided_slice %16 {offsets = [0, 32], sizes = [2, 16], strides = [1, 1]} : vector<2x128xf32> to vector<2x16xf32>
    %22 = arith.addf %20, %21 : vector<2x16xf32>
    %23 = vector.extract_strided_slice %16 {offsets = [0, 48], sizes = [2, 16], strides = [1, 1]} : vector<2x128xf32> to vector<2x16xf32>
    %24 = arith.addf %22, %23 : vector<2x16xf32>
    %cst = arith.constant 2.500000e-01 : f32
    %25 = vector.broadcast %cst : f32 to vector<2x16xf32>
    %26 = arith.mulf %24, %25 : vector<2x16xf32>
    %27 = vector.extract_strided_slice %16 {offsets = [0, 64], sizes = [2, 16], strides = [1, 1]} : vector<2x128xf32> to vector<2x16xf32>
    %28 = vector.extract_strided_slice %16 {offsets = [0, 80], sizes = [2, 16], strides = [1, 1]} : vector<2x128xf32> to vector<2x16xf32>
    %29 = arith.addf %27, %28 : vector<2x16xf32>
    %30 = vector.extract_strided_slice %16 {offsets = [0, 96], sizes = [2, 16], strides = [1, 1]} : vector<2x128xf32> to vector<2x16xf32>
    %31 = arith.addf %29, %30 : vector<2x16xf32>
    %32 = vector.extract_strided_slice %16 {offsets = [0, 112], sizes = [2, 16], strides = [1, 1]} : vector<2x128xf32> to vector<2x16xf32>
    %33 = arith.addf %31, %32 : vector<2x16xf32>
    %cst_4 = arith.constant 2.500000e-01 : f32
    %34 = vector.broadcast %cst_4 : f32 to vector<2x16xf32>
    %35 = arith.mulf %33, %34 : vector<2x16xf32>
    %36 = vector.extract_strided_slice %17 {offsets = [0, 0], sizes = [2, 16], strides = [1, 1]} : vector<2x128xf32> to vector<2x16xf32>
    %37 = arith.truncf %36 : vector<2x16xf32> to vector<2x16xbf16>
    %38 = vector.extract_strided_slice %17 {offsets = [0, 16], sizes = [2, 16], strides = [1, 1]} : vector<2x128xf32> to vector<2x16xf32>
    %39 = arith.truncf %38 : vector<2x16xf32> to vector<2x16xbf16>
    %c352 = arith.constant 352 : index
    %c0_5 = arith.constant 0 : index
    %40 = vector.load %arg3[%c352, %c0_5] : memref<384x128xbf16, #tpu.memory_space<vmem>>, vector<16x128xbf16>
    %cst_6 = arith.constant dense<0.000000e+00> : vector<2x128xf32>
    %41 = tpu.matmul %37, %40, %cst_6 {dimension_numbers = #tpu.dot_dimension_numbers<[1], [0], [0], [1], [0, 0, 1, 1], [], []>} : vector<2x16xbf16>, vector<16x128xbf16>, vector<2x128xf32> -> vector<2x128xf32>
    %42 = vector.extract_strided_slice %41 {offsets = [0, 0], sizes = [2, 16], strides = [1, 1]} : vector<2x128xf32> to vector<2x16xf32>
    %43 = vector.broadcast %1 : vector<1x16xf32> to vector<2x16xf32>
    %44 = arith.addf %42, %43 : vector<2x16xf32>
    %cst_7 = arith.constant 0.000000e+00 : f32
    %45 = vector.broadcast %cst_7 : f32 to vector<2x16xf32>
    %46 = arith.cmpf ogt, %44, %45 : vector<2x16xf32>
    %cst_8 = arith.constant 2.000000e-01 : f32
    %47 = vector.broadcast %cst_8 : f32 to vector<2x16xf32>
    %48 = arith.mulf %47, %44 : vector<2x16xf32>
    %49 = arith.select %46, %44, %48 : vector<2x16xi1>, vector<2x16xf32>
    %c368 = arith.constant 368 : index
    %c0_9 = arith.constant 0 : index
    %50 = vector.load %arg3[%c368, %c0_9] : memref<384x128xbf16, #tpu.memory_space<vmem>>, vector<16x128xbf16>
    %cst_10 = arith.constant dense<0.000000e+00> : vector<2x128xf32>
    %51 = tpu.matmul %39, %50, %cst_10 {dimension_numbers = #tpu.dot_dimension_numbers<[1], [0], [0], [1], [0, 0, 1, 1], [], []>} : vector<2x16xbf16>, vector<16x128xbf16>, vector<2x128xf32> -> vector<2x128xf32>
    %52 = vector.extract_strided_slice %51 {offsets = [0, 0], sizes = [2, 16], strides = [1, 1]} : vector<2x128xf32> to vector<2x16xf32>
    %53 = vector.broadcast %2 : vector<1x16xf32> to vector<2x16xf32>
    %54 = arith.addf %52, %53 : vector<2x16xf32>
    %cst_11 = arith.constant 0.000000e+00 : f32
    %55 = vector.broadcast %cst_11 : f32 to vector<2x16xf32>
    %56 = arith.cmpf ogt, %54, %55 : vector<2x16xf32>
    %cst_12 = arith.constant 2.000000e-01 : f32
    %57 = vector.broadcast %cst_12 : f32 to vector<2x16xf32>
    %58 = arith.mulf %57, %54 : vector<2x16xf32>
    %59 = arith.select %56, %54, %58 : vector<2x16xi1>, vector<2x16xf32>
    %60 = tpu.concatenate %26, %49 in 1 : vector<2x16xf32>, vector<2x16xf32> -> vector<2x32xf32>
    %61 = tpu.concatenate %35, %59 in 1 : vector<2x16xf32>, vector<2x16xf32> -> vector<2x32xf32>
    %62 = vector.broadcast %3 : vector<1x32xf32> to vector<2x32xf32>
    %63 = arith.mulf %60, %62 : vector<2x32xf32>
    %cst_13 = arith.constant dense<0.000000e+00> : vector<2xf32>
    %64 = vector.multi_reduction <add>, %63, %cst_13 [1] : vector<2x32xf32> to vector<2xf32>
    %65 = vector.shape_cast %64 : vector<2xf32> to vector<2x1xf32>
    %66 = vector.broadcast %4 : vector<1x1xf32> to vector<2x1xf32>
    %67 = arith.addf %65, %66 : vector<2x1xf32>
    %68 = arith.negf %67 : vector<2x1xf32>
    %69 = math.exp %68 : vector<2x1xf32>
    %cst_14 = arith.constant 1.000000e+00 : f32
    %70 = vector.broadcast %cst_14 : f32 to vector<2x1xf32>
    %71 = arith.addf %70, %69 : vector<2x1xf32>
    %72 = arith.divf %70, %71 : vector<2x1xf32>
    %73 = vector.broadcast %5 : vector<1x32xf32> to vector<2x32xf32>
    %74 = arith.mulf %61, %73 : vector<2x32xf32>
    %cst_15 = arith.constant dense<0.000000e+00> : vector<2xf32>
    %75 = vector.multi_reduction <add>, %74, %cst_15 [1] : vector<2x32xf32> to vector<2xf32>
    %76 = vector.shape_cast %75 : vector<2xf32> to vector<2x1xf32>
    %77 = vector.broadcast %6 : vector<1x1xf32> to vector<2x1xf32>
    %78 = arith.addf %76, %77 : vector<2x1xf32>
    %79 = arith.negf %78 : vector<2x1xf32>
    %80 = math.exp %79 : vector<2x1xf32>
    %cst_16 = arith.constant 1.000000e+00 : f32
    %81 = vector.broadcast %cst_16 : f32 to vector<2x1xf32>
    %82 = arith.addf %81, %80 : vector<2x1xf32>
    %83 = arith.divf %81, %82 : vector<2x1xf32>
    %84 = vector.broadcast %72 : vector<2x1xf32> to vector<2x16xf32>
    %85 = arith.mulf %84, %49 : vector<2x16xf32>
    %86 = arith.addf %26, %85 : vector<2x16xf32>
    %87 = vector.broadcast %83 : vector<2x1xf32> to vector<2x16xf32>
    %88 = arith.mulf %87, %59 : vector<2x16xf32>
    %89 = arith.addf %35, %88 : vector<2x16xf32>
    %90 = tpu.concatenate %86, %89 in 1 : vector<2x16xf32>, vector<2x16xf32> -> vector<2x32xf32>
    %c0_17 = arith.constant 0 : index
    %c0_18 = arith.constant 0 : index
    %91 = vector.load %arg1[%c0_17, %c0_18] : memref<16x32xbf16, #tpu.memory_space<vmem>>, vector<16x32xbf16>
    %c224 = arith.constant 224 : index
    %c0_19 = arith.constant 0 : index
    %92 = vector.load %arg3[%c224, %c0_19] : memref<384x128xbf16, #tpu.memory_space<vmem>>, vector<32x128xbf16>
    %cst_20 = arith.constant dense<0.000000e+00> : vector<16x128xf32>
    %93 = tpu.matmul %91, %92, %cst_20 {dimension_numbers = #tpu.dot_dimension_numbers<[1], [0], [0], [1], [0, 0, 1, 1], [], []>} : vector<16x32xbf16>, vector<32x128xbf16>, vector<16x128xf32> -> vector<16x128xf32>
    %94 = vector.extract_strided_slice %93 {offsets = [0, 0], sizes = [16, 32], strides = [1, 1]} : vector<16x128xf32> to vector<16x32xf32>
    %95 = vector.shape_cast %94 : vector<16x32xf32> to vector<2x8x32xf32>
    %96 = vector.extract_strided_slice %93 {offsets = [0, 32], sizes = [16, 32], strides = [1, 1]} : vector<16x128xf32> to vector<16x32xf32>
    %97 = vector.shape_cast %96 : vector<16x32xf32> to vector<2x8x32xf32>
    %98 = arith.truncf %90 : vector<2x32xf32> to vector<2x32xbf16>
    %c0_21 = arith.constant 0 : index
    %c0_22 = arith.constant 0 : index
    %99 = vector.load %arg3[%c0_21, %c0_22] : memref<384x128xbf16, #tpu.memory_space<vmem>>, vector<32x128xbf16>
    %cst_23 = arith.constant dense<0.000000e+00> : vector<2x128xf32>
    %100 = tpu.matmul %98, %99, %cst_23 {dimension_numbers = #tpu.dot_dimension_numbers<[1], [0], [0], [1], [0, 0, 1, 1], [], []>} : vector<2x32xbf16>, vector<32x128xbf16>, vector<2x128xf32> -> vector<2x128xf32>
    %c0_24 = arith.constant 0 : index
    %c0_25 = arith.constant 0 : index
    %101 = vector.load %arg0[%c0_24, %c0_25] : memref<12x32xbf16, #tpu.memory_space<vmem>>, vector<12x32xbf16>
    %c32 = arith.constant 32 : index
    %c0_26 = arith.constant 0 : index
    %102 = vector.load %arg3[%c32, %c0_26] : memref<384x128xbf16, #tpu.memory_space<vmem>>, vector<32x128xbf16>
    %cst_27 = arith.constant dense<0.000000e+00> : vector<12x128xf32>
    %103 = tpu.matmul %101, %102, %cst_27 {dimension_numbers = #tpu.dot_dimension_numbers<[1], [0], [0], [1], [0, 0, 1, 1], [], []>} : vector<12x32xbf16>, vector<32x128xbf16>, vector<12x128xf32> -> vector<12x128xf32>
    %104 = tpu.concatenate %100, %100, %100, %100, %100, %100 in 0 : vector<2x128xf32>, vector<2x128xf32>, vector<2x128xf32>, vector<2x128xf32>, vector<2x128xf32>, vector<2x128xf32> -> vector<12x128xf32>
    %105 = arith.addf %103, %104 : vector<12x128xf32>
    %106 = vector.broadcast %7 : vector<1x128xf32> to vector<12x128xf32>
    %107 = arith.addf %105, %106 : vector<12x128xf32>
    %cst_28 = arith.constant 0.000000e+00 : f32
    %108 = vector.broadcast %cst_28 : f32 to vector<2x32xf32>
    %cst_29 = arith.constant 0.000000e+00 : f32
    %109 = vector.broadcast %cst_29 : f32 to vector<2x32xf32>
    %cst_30 = arith.constant 0.000000e+00 : f32
    %110 = vector.broadcast %cst_30 : f32 to vector<2x32xf32>
    %cst_31 = arith.constant 0.000000e+00 : f32
    %111 = vector.broadcast %cst_31 : f32 to vector<2x32xf32>
    %112 = tpu.concatenate %110, %108 in 1 : vector<2x32xf32>, vector<2x32xf32> -> vector<2x64xf32>
    %113 = arith.truncf %112 : vector<2x64xf32> to vector<2x64xbf16>
    %114 = vector.extract_strided_slice %107 {offsets = [0, 0], sizes = [2, 128], strides = [1, 1]} : vector<12x128xf32> to vector<2x128xf32>
    %c64 = arith.constant 64 : index
    %c0_32 = arith.constant 0 : index
    %115 = vector.load %arg3[%c64, %c0_32] : memref<384x128xbf16, #tpu.memory_space<vmem>>, vector<64x128xbf16>
    %cst_33 = arith.constant dense<0.000000e+00> : vector<2x128xf32>
    %116 = tpu.matmul %113, %115, %cst_33 {dimension_numbers = #tpu.dot_dimension_numbers<[1], [0], [0], [1], [0, 0, 1, 1], [], []>} : vector<2x64xbf16>, vector<64x128xbf16>, vector<2x128xf32> -> vector<2x128xf32>
    %117 = arith.addf %114, %116 : vector<2x128xf32>
    %118 = vector.extract_strided_slice %117 {offsets = [0, 0], sizes = [2, 96], strides = [1, 1]} : vector<2x128xf32> to vector<2x96xf32>
    %119 = arith.negf %118 : vector<2x96xf32>
    %120 = math.exp %119 : vector<2x96xf32>
    %cst_34 = arith.constant 1.000000e+00 : f32
    %121 = vector.broadcast %cst_34 : f32 to vector<2x96xf32>
    %122 = arith.addf %121, %120 : vector<2x96xf32>
    %123 = arith.divf %121, %122 : vector<2x96xf32>
    %124 = vector.extract_strided_slice %117 {offsets = [0, 96], sizes = [2, 32], strides = [1, 1]} : vector<2x128xf32> to vector<2x32xf32>
    %125 = math.tanh %124 : vector<2x32xf32>
    %126 = vector.extract_strided_slice %123 {offsets = [0, 0], sizes = [2, 32], strides = [1, 1]} : vector<2x96xf32> to vector<2x32xf32>
    %127 = vector.extract_strided_slice %123 {offsets = [0, 32], sizes = [2, 32], strides = [1, 1]} : vector<2x96xf32> to vector<2x32xf32>
    %128 = vector.extract_strided_slice %123 {offsets = [0, 64], sizes = [2, 32], strides = [1, 1]} : vector<2x96xf32> to vector<2x32xf32>
    %129 = arith.mulf %127, %109 : vector<2x32xf32>
    %130 = arith.mulf %126, %125 : vector<2x32xf32>
    %131 = arith.addf %129, %130 : vector<2x32xf32>
    %132 = math.tanh %131 : vector<2x32xf32>
    %133 = arith.mulf %128, %132 : vector<2x32xf32>
    %cst_35 = arith.constant dense<0.000000e+00> : vector<2xf32>
    %134 = vector.multi_reduction <add>, %133, %cst_35 [1] : vector<2x32xf32> to vector<2xf32>
    %135 = vector.shape_cast %134 : vector<2xf32> to vector<2x1xf32>
    %cst_36 = arith.constant 3.200000e+01 : f32
    %136 = vector.broadcast %cst_36 : f32 to vector<2x1xf32>
    %137 = arith.divf %135, %136 : vector<2x1xf32>
    %138 = vector.broadcast %137 : vector<2x1xf32> to vector<2x32xf32>
    %139 = arith.subf %133, %138 : vector<2x32xf32>
    %140 = arith.mulf %139, %139 : vector<2x32xf32>
    %cst_37 = arith.constant dense<0.000000e+00> : vector<2xf32>
    %141 = vector.multi_reduction <add>, %140, %cst_37 [1] : vector<2x32xf32> to vector<2xf32>
    %142 = vector.shape_cast %141 : vector<2xf32> to vector<2x1xf32>
    %cst_38 = arith.constant 3.200000e+01 : f32
    %143 = vector.broadcast %cst_38 : f32 to vector<2x1xf32>
    %144 = arith.divf %142, %143 : vector<2x1xf32>
    %145 = vector.broadcast %137 : vector<2x1xf32> to vector<2x32xf32>
    %146 = arith.subf %133, %145 : vector<2x32xf32>
    %cst_39 = arith.constant 9.99999974E-6 : f32
    %147 = vector.broadcast %cst_39 : f32 to vector<2x1xf32>
    %148 = arith.addf %144, %147 : vector<2x1xf32>
    %149 = math.rsqrt %148 : vector<2x1xf32>
    %150 = vector.broadcast %149 : vector<2x1xf32> to vector<2x32xf32>
    %151 = arith.mulf %146, %150 : vector<2x32xf32>
    %152 = vector.broadcast %8 : vector<1x32xf32> to vector<2x32xf32>
    %153 = arith.mulf %151, %152 : vector<2x32xf32>
    %154 = vector.broadcast %9 : vector<1x32xf32> to vector<2x32xf32>
    %155 = arith.addf %153, %154 : vector<2x32xf32>
    %156 = arith.truncf %155 : vector<2x32xf32> to vector<2x32xbf16>
    %c256 = arith.constant 256 : index
    %c0_40 = arith.constant 0 : index
    %157 = vector.load %arg3[%c256, %c0_40] : memref<384x128xbf16, #tpu.memory_space<vmem>>, vector<32x128xbf16>
    %cst_41 = arith.constant dense<0.000000e+00> : vector<2x128xf32>
    %158 = tpu.matmul %156, %157, %cst_41 {dimension_numbers = #tpu.dot_dimension_numbers<[1], [0], [0], [1], [0, 0, 1, 1], [], []>} : vector<2x32xbf16>, vector<32x128xbf16>, vector<2x128xf32> -> vector<2x128xf32>
    %159 = vector.extract_strided_slice %158 {offsets = [0, 0], sizes = [2, 32], strides = [1, 1]} : vector<2x128xf32> to vector<2x32xf32>
    %160 = vector.shape_cast %159 : vector<2x32xf32> to vector<2x1x32xf32>
    %161 = vector.broadcast %160 : vector<2x1x32xf32> to vector<2x8x32xf32>
    %162 = arith.mulf %95, %161 : vector<2x8x32xf32>
    %cst_42 = arith.constant dense<0.000000e+00> : vector<2x8xf32>
    %163 = vector.multi_reduction <add>, %162, %cst_42 [2] : vector<2x8x32xf32> to vector<2x8xf32>
    %cst_43 = arith.constant 0.176776692 : f32
    %164 = vector.broadcast %cst_43 : f32 to vector<2x8xf32>
    %165 = arith.mulf %163, %164 : vector<2x8xf32>
    %cst_44 = arith.constant dense<0xFF800000> : vector<2xf32>
    %166 = vector.multi_reduction <maximumf>, %165, %cst_44 [1] : vector<2x8xf32> to vector<2xf32>
    %167 = vector.shape_cast %166 : vector<2xf32> to vector<2x1xf32>
    %168 = vector.broadcast %167 : vector<2x1xf32> to vector<2x8xf32>
    %169 = arith.subf %165, %168 : vector<2x8xf32>
    %170 = math.exp %169 : vector<2x8xf32>
    %cst_45 = arith.constant dense<0.000000e+00> : vector<2xf32>
    %171 = vector.multi_reduction <add>, %170, %cst_45 [1] : vector<2x8xf32> to vector<2xf32>
    %172 = vector.shape_cast %171 : vector<2xf32> to vector<2x1xf32>
    %173 = tpu.reciprocal %172 {approx = true} : vector<2x1xf32> -> vector<2x1xf32>
    %174 = vector.broadcast %173 : vector<2x1xf32> to vector<2x8xf32>
    %175 = arith.mulf %170, %174 : vector<2x8xf32>
    %176 = vector.shape_cast %175 : vector<2x8xf32> to vector<2x8x1xf32>
    %177 = vector.broadcast %176 : vector<2x8x1xf32> to vector<2x8x32xf32>
    %178 = arith.mulf %97, %177 : vector<2x8x32xf32>
    %cst_46 = arith.constant dense<0.000000e+00> : vector<2x32xf32>
    %179 = vector.multi_reduction <add>, %178, %cst_46 [1] : vector<2x8x32xf32> to vector<2x32xf32>
    %180 = arith.truncf %179 : vector<2x32xf32> to vector<2x32xbf16>
    %c288 = arith.constant 288 : index
    %c0_47 = arith.constant 0 : index
    %181 = vector.load %arg3[%c288, %c0_47] : memref<384x128xbf16, #tpu.memory_space<vmem>>, vector<32x128xbf16>
    %cst_48 = arith.constant dense<0.000000e+00> : vector<2x128xf32>
    %182 = tpu.matmul %180, %181, %cst_48 {dimension_numbers = #tpu.dot_dimension_numbers<[1], [0], [0], [1], [0, 0, 1, 1], [], []>} : vector<2x32xbf16>, vector<32x128xbf16>, vector<2x128xf32> -> vector<2x128xf32>
    %183 = vector.extract_strided_slice %182 {offsets = [0, 0], sizes = [2, 32], strides = [1, 1]} : vector<2x128xf32> to vector<2x32xf32>
    %184 = math.tanh %183 : vector<2x32xf32>
    %cst_49 = arith.constant dense<0.000000e+00> : vector<2xf32>
    %185 = vector.multi_reduction <add>, %184, %cst_49 [1] : vector<2x32xf32> to vector<2xf32>
    %186 = vector.shape_cast %185 : vector<2xf32> to vector<2x1xf32>
    %cst_50 = arith.constant 3.200000e+01 : f32
    %187 = vector.broadcast %cst_50 : f32 to vector<2x1xf32>
    %188 = arith.divf %186, %187 : vector<2x1xf32>
    %189 = vector.broadcast %188 : vector<2x1xf32> to vector<2x32xf32>
    %190 = arith.subf %184, %189 : vector<2x32xf32>
    %191 = arith.mulf %190, %190 : vector<2x32xf32>
    %cst_51 = arith.constant dense<0.000000e+00> : vector<2xf32>
    %192 = vector.multi_reduction <add>, %191, %cst_51 [1] : vector<2x32xf32> to vector<2xf32>
    %193 = vector.shape_cast %192 : vector<2xf32> to vector<2x1xf32>
    %cst_52 = arith.constant 3.200000e+01 : f32
    %194 = vector.broadcast %cst_52 : f32 to vector<2x1xf32>
    %195 = arith.divf %193, %194 : vector<2x1xf32>
    %196 = vector.broadcast %188 : vector<2x1xf32> to vector<2x32xf32>
    %197 = arith.subf %184, %196 : vector<2x32xf32>
    %cst_53 = arith.constant 9.99999974E-6 : f32
    %198 = vector.broadcast %cst_53 : f32 to vector<2x1xf32>
    %199 = arith.addf %195, %198 : vector<2x1xf32>
    %200 = math.rsqrt %199 : vector<2x1xf32>
    %201 = vector.broadcast %200 : vector<2x1xf32> to vector<2x32xf32>
    %202 = arith.mulf %197, %201 : vector<2x32xf32>
    %203 = vector.broadcast %10 : vector<1x32xf32> to vector<2x32xf32>
    %204 = arith.mulf %202, %203 : vector<2x32xf32>
    %205 = vector.broadcast %11 : vector<1x32xf32> to vector<2x32xf32>
    %206 = arith.addf %204, %205 : vector<2x32xf32>
    %207 = tpu.concatenate %206, %155, %110 in 1 : vector<2x32xf32>, vector<2x32xf32>, vector<2x32xf32> -> vector<2x96xf32>
    %208 = arith.truncf %207 : vector<2x96xf32> to vector<2x96xbf16>
    %c128 = arith.constant 128 : index
    %c0_54 = arith.constant 0 : index
    %209 = vector.load %arg3[%c128, %c0_54] : memref<384x128xbf16, #tpu.memory_space<vmem>>, vector<96x128xbf16>
    %cst_55 = arith.constant dense<0.000000e+00> : vector<2x128xf32>
    %210 = tpu.matmul %208, %209, %cst_55 {dimension_numbers = #tpu.dot_dimension_numbers<[1], [0], [0], [1], [0, 0, 1, 1], [], []>} : vector<2x96xbf16>, vector<96x128xbf16>, vector<2x128xf32> -> vector<2x128xf32>
    %211 = vector.broadcast %12 : vector<1x128xf32> to vector<2x128xf32>
    %212 = arith.addf %210, %211 : vector<2x128xf32>
    %213 = vector.extract_strided_slice %212 {offsets = [0, 0], sizes = [2, 96], strides = [1, 1]} : vector<2x128xf32> to vector<2x96xf32>
    %214 = arith.negf %213 : vector<2x96xf32>
    %215 = math.exp %214 : vector<2x96xf32>
    %cst_56 = arith.constant 1.000000e+00 : f32
    %216 = vector.broadcast %cst_56 : f32 to vector<2x96xf32>
    %217 = arith.addf %216, %215 : vector<2x96xf32>
    %218 = arith.divf %216, %217 : vector<2x96xf32>
    %219 = vector.extract_strided_slice %212 {offsets = [0, 96], sizes = [2, 32], strides = [1, 1]} : vector<2x128xf32> to vector<2x32xf32>
    %220 = math.tanh %219 : vector<2x32xf32>
    %221 = vector.extract_strided_slice %218 {offsets = [0, 0], sizes = [2, 32], strides = [1, 1]} : vector<2x96xf32> to vector<2x32xf32>
    %222 = vector.extract_strided_slice %218 {offsets = [0, 32], sizes = [2, 32], strides = [1, 1]} : vector<2x96xf32> to vector<2x32xf32>
    %223 = vector.extract_strided_slice %218 {offsets = [0, 64], sizes = [2, 32], strides = [1, 1]} : vector<2x96xf32> to vector<2x32xf32>
    %224 = arith.mulf %222, %111 : vector<2x32xf32>
    %225 = arith.mulf %221, %220 : vector<2x32xf32>
    %226 = arith.addf %224, %225 : vector<2x32xf32>
    %227 = math.tanh %226 : vector<2x32xf32>
    %228 = arith.mulf %223, %227 : vector<2x32xf32>
    %cst_57 = arith.constant dense<0.000000e+00> : vector<2xf32>
    %229 = vector.multi_reduction <add>, %228, %cst_57 [1] : vector<2x32xf32> to vector<2xf32>
    %230 = vector.shape_cast %229 : vector<2xf32> to vector<2x1xf32>
    %cst_58 = arith.constant 3.200000e+01 : f32
    %231 = vector.broadcast %cst_58 : f32 to vector<2x1xf32>
    %232 = arith.divf %230, %231 : vector<2x1xf32>
    %233 = vector.broadcast %232 : vector<2x1xf32> to vector<2x32xf32>
    %234 = arith.subf %228, %233 : vector<2x32xf32>
    %235 = arith.mulf %234, %234 : vector<2x32xf32>
    %cst_59 = arith.constant dense<0.000000e+00> : vector<2xf32>
    %236 = vector.multi_reduction <add>, %235, %cst_59 [1] : vector<2x32xf32> to vector<2xf32>
    %237 = vector.shape_cast %236 : vector<2xf32> to vector<2x1xf32>
    %cst_60 = arith.constant 3.200000e+01 : f32
    %238 = vector.broadcast %cst_60 : f32 to vector<2x1xf32>
    %239 = arith.divf %237, %238 : vector<2x1xf32>
    %240 = vector.broadcast %232 : vector<2x1xf32> to vector<2x32xf32>
    %241 = arith.subf %228, %240 : vector<2x32xf32>
    %cst_61 = arith.constant 9.99999974E-6 : f32
    %242 = vector.broadcast %cst_61 : f32 to vector<2x1xf32>
    %243 = arith.addf %239, %242 : vector<2x1xf32>
    %244 = math.rsqrt %243 : vector<2x1xf32>
    %245 = vector.broadcast %244 : vector<2x1xf32> to vector<2x32xf32>
    %246 = arith.mulf %241, %245 : vector<2x32xf32>
    %247 = vector.broadcast %13 : vector<1x32xf32> to vector<2x32xf32>
    %248 = arith.mulf %246, %247 : vector<2x32xf32>
    %249 = vector.broadcast %14 : vector<1x32xf32> to vector<2x32xf32>
    %250 = arith.addf %248, %249 : vector<2x32xf32>
    %251 = math.tanh %250 : vector<2x32xf32>
    %252 = tpu.concatenate %228, %133 in 1 : vector<2x32xf32>, vector<2x32xf32> -> vector<2x64xf32>
    %253 = arith.truncf %252 : vector<2x64xf32> to vector<2x64xbf16>
    %254 = vector.extract_strided_slice %107 {offsets = [2, 0], sizes = [2, 128], strides = [1, 1]} : vector<12x128xf32> to vector<2x128xf32>
    %c64_62 = arith.constant 64 : index
    %c0_63 = arith.constant 0 : index
    %255 = vector.load %arg3[%c64_62, %c0_63] : memref<384x128xbf16, #tpu.memory_space<vmem>>, vector<64x128xbf16>
    %cst_64 = arith.constant dense<0.000000e+00> : vector<2x128xf32>
    %256 = tpu.matmul %253, %255, %cst_64 {dimension_numbers = #tpu.dot_dimension_numbers<[1], [0], [0], [1], [0, 0, 1, 1], [], []>} : vector<2x64xbf16>, vector<64x128xbf16>, vector<2x128xf32> -> vector<2x128xf32>
    %257 = arith.addf %254, %256 : vector<2x128xf32>
    %258 = vector.extract_strided_slice %257 {offsets = [0, 0], sizes = [2, 96], strides = [1, 1]} : vector<2x128xf32> to vector<2x96xf32>
    %259 = arith.negf %258 : vector<2x96xf32>
    %260 = math.exp %259 : vector<2x96xf32>
    %cst_65 = arith.constant 1.000000e+00 : f32
    %261 = vector.broadcast %cst_65 : f32 to vector<2x96xf32>
    %262 = arith.addf %261, %260 : vector<2x96xf32>
    %263 = arith.divf %261, %262 : vector<2x96xf32>
    %264 = vector.extract_strided_slice %257 {offsets = [0, 96], sizes = [2, 32], strides = [1, 1]} : vector<2x128xf32> to vector<2x32xf32>
    %265 = math.tanh %264 : vector<2x32xf32>
    %266 = vector.extract_strided_slice %263 {offsets = [0, 0], sizes = [2, 32], strides = [1, 1]} : vector<2x96xf32> to vector<2x32xf32>
    %267 = vector.extract_strided_slice %263 {offsets = [0, 32], sizes = [2, 32], strides = [1, 1]} : vector<2x96xf32> to vector<2x32xf32>
    %268 = vector.extract_strided_slice %263 {offsets = [0, 64], sizes = [2, 32], strides = [1, 1]} : vector<2x96xf32> to vector<2x32xf32>
    %269 = arith.mulf %267, %131 : vector<2x32xf32>
    %270 = arith.mulf %266, %265 : vector<2x32xf32>
    %271 = arith.addf %269, %270 : vector<2x32xf32>
    %272 = math.tanh %271 : vector<2x32xf32>
    %273 = arith.mulf %268, %272 : vector<2x32xf32>
    %cst_66 = arith.constant dense<0.000000e+00> : vector<2xf32>
    %274 = vector.multi_reduction <add>, %273, %cst_66 [1] : vector<2x32xf32> to vector<2xf32>
    %275 = vector.shape_cast %274 : vector<2xf32> to vector<2x1xf32>
    %cst_67 = arith.constant 3.200000e+01 : f32
    %276 = vector.broadcast %cst_67 : f32 to vector<2x1xf32>
    %277 = arith.divf %275, %276 : vector<2x1xf32>
    %278 = vector.broadcast %277 : vector<2x1xf32> to vector<2x32xf32>
    %279 = arith.subf %273, %278 : vector<2x32xf32>
    %280 = arith.mulf %279, %279 : vector<2x32xf32>
    %cst_68 = arith.constant dense<0.000000e+00> : vector<2xf32>
    %281 = vector.multi_reduction <add>, %280, %cst_68 [1] : vector<2x32xf32> to vector<2xf32>
    %282 = vector.shape_cast %281 : vector<2xf32> to vector<2x1xf32>
    %cst_69 = arith.constant 3.200000e+01 : f32
    %283 = vector.broadcast %cst_69 : f32 to vector<2x1xf32>
    %284 = arith.divf %282, %283 : vector<2x1xf32>
    %285 = vector.broadcast %277 : vector<2x1xf32> to vector<2x32xf32>
    %286 = arith.subf %273, %285 : vector<2x32xf32>
    %cst_70 = arith.constant 9.99999974E-6 : f32
    %287 = vector.broadcast %cst_70 : f32 to vector<2x1xf32>
    %288 = arith.addf %284, %287 : vector<2x1xf32>
    %289 = math.rsqrt %288 : vector<2x1xf32>
    %290 = vector.broadcast %289 : vector<2x1xf32> to vector<2x32xf32>
    %291 = arith.mulf %286, %290 : vector<2x32xf32>
    %292 = vector.broadcast %8 : vector<1x32xf32> to vector<2x32xf32>
    %293 = arith.mulf %291, %292 : vector<2x32xf32>
    %294 = vector.broadcast %9 : vector<1x32xf32> to vector<2x32xf32>
    %295 = arith.addf %293, %294 : vector<2x32xf32>
    %296 = arith.truncf %295 : vector<2x32xf32> to vector<2x32xbf16>
    %c256_71 = arith.constant 256 : index
    %c0_72 = arith.constant 0 : index
    %297 = vector.load %arg3[%c256_71, %c0_72] : memref<384x128xbf16, #tpu.memory_space<vmem>>, vector<32x128xbf16>
    %cst_73 = arith.constant dense<0.000000e+00> : vector<2x128xf32>
    %298 = tpu.matmul %296, %297, %cst_73 {dimension_numbers = #tpu.dot_dimension_numbers<[1], [0], [0], [1], [0, 0, 1, 1], [], []>} : vector<2x32xbf16>, vector<32x128xbf16>, vector<2x128xf32> -> vector<2x128xf32>
    %299 = vector.extract_strided_slice %298 {offsets = [0, 0], sizes = [2, 32], strides = [1, 1]} : vector<2x128xf32> to vector<2x32xf32>
    %300 = vector.shape_cast %299 : vector<2x32xf32> to vector<2x1x32xf32>
    %301 = vector.broadcast %300 : vector<2x1x32xf32> to vector<2x8x32xf32>
    %302 = arith.mulf %95, %301 : vector<2x8x32xf32>
    %cst_74 = arith.constant dense<0.000000e+00> : vector<2x8xf32>
    %303 = vector.multi_reduction <add>, %302, %cst_74 [2] : vector<2x8x32xf32> to vector<2x8xf32>
    %cst_75 = arith.constant 0.176776692 : f32
    %304 = vector.broadcast %cst_75 : f32 to vector<2x8xf32>
    %305 = arith.mulf %303, %304 : vector<2x8xf32>
    %cst_76 = arith.constant dense<0xFF800000> : vector<2xf32>
    %306 = vector.multi_reduction <maximumf>, %305, %cst_76 [1] : vector<2x8xf32> to vector<2xf32>
    %307 = vector.shape_cast %306 : vector<2xf32> to vector<2x1xf32>
    %308 = vector.broadcast %307 : vector<2x1xf32> to vector<2x8xf32>
    %309 = arith.subf %305, %308 : vector<2x8xf32>
    %310 = math.exp %309 : vector<2x8xf32>
    %cst_77 = arith.constant dense<0.000000e+00> : vector<2xf32>
    %311 = vector.multi_reduction <add>, %310, %cst_77 [1] : vector<2x8xf32> to vector<2xf32>
    %312 = vector.shape_cast %311 : vector<2xf32> to vector<2x1xf32>
    %313 = tpu.reciprocal %312 {approx = true} : vector<2x1xf32> -> vector<2x1xf32>
    %314 = vector.broadcast %313 : vector<2x1xf32> to vector<2x8xf32>
    %315 = arith.mulf %310, %314 : vector<2x8xf32>
    %316 = vector.shape_cast %315 : vector<2x8xf32> to vector<2x8x1xf32>
    %317 = vector.broadcast %316 : vector<2x8x1xf32> to vector<2x8x32xf32>
    %318 = arith.mulf %97, %317 : vector<2x8x32xf32>
    %cst_78 = arith.constant dense<0.000000e+00> : vector<2x32xf32>
    %319 = vector.multi_reduction <add>, %318, %cst_78 [1] : vector<2x8x32xf32> to vector<2x32xf32>
    %320 = arith.truncf %319 : vector<2x32xf32> to vector<2x32xbf16>
    %c288_79 = arith.constant 288 : index
    %c0_80 = arith.constant 0 : index
    %321 = vector.load %arg3[%c288_79, %c0_80] : memref<384x128xbf16, #tpu.memory_space<vmem>>, vector<32x128xbf16>
    %cst_81 = arith.constant dense<0.000000e+00> : vector<2x128xf32>
    %322 = tpu.matmul %320, %321, %cst_81 {dimension_numbers = #tpu.dot_dimension_numbers<[1], [0], [0], [1], [0, 0, 1, 1], [], []>} : vector<2x32xbf16>, vector<32x128xbf16>, vector<2x128xf32> -> vector<2x128xf32>
    %323 = vector.extract_strided_slice %322 {offsets = [0, 0], sizes = [2, 32], strides = [1, 1]} : vector<2x128xf32> to vector<2x32xf32>
    %324 = math.tanh %323 : vector<2x32xf32>
    %cst_82 = arith.constant dense<0.000000e+00> : vector<2xf32>
    %325 = vector.multi_reduction <add>, %324, %cst_82 [1] : vector<2x32xf32> to vector<2xf32>
    %326 = vector.shape_cast %325 : vector<2xf32> to vector<2x1xf32>
    %cst_83 = arith.constant 3.200000e+01 : f32
    %327 = vector.broadcast %cst_83 : f32 to vector<2x1xf32>
    %328 = arith.divf %326, %327 : vector<2x1xf32>
    %329 = vector.broadcast %328 : vector<2x1xf32> to vector<2x32xf32>
    %330 = arith.subf %324, %329 : vector<2x32xf32>
    %331 = arith.mulf %330, %330 : vector<2x32xf32>
    %cst_84 = arith.constant dense<0.000000e+00> : vector<2xf32>
    %332 = vector.multi_reduction <add>, %331, %cst_84 [1] : vector<2x32xf32> to vector<2xf32>
    %333 = vector.shape_cast %332 : vector<2xf32> to vector<2x1xf32>
    %cst_85 = arith.constant 3.200000e+01 : f32
    %334 = vector.broadcast %cst_85 : f32 to vector<2x1xf32>
    %335 = arith.divf %333, %334 : vector<2x1xf32>
    %336 = vector.broadcast %328 : vector<2x1xf32> to vector<2x32xf32>
    %337 = arith.subf %324, %336 : vector<2x32xf32>
    %cst_86 = arith.constant 9.99999974E-6 : f32
    %338 = vector.broadcast %cst_86 : f32 to vector<2x1xf32>
    %339 = arith.addf %335, %338 : vector<2x1xf32>
    %340 = math.rsqrt %339 : vector<2x1xf32>
    %341 = vector.broadcast %340 : vector<2x1xf32> to vector<2x32xf32>
    %342 = arith.mulf %337, %341 : vector<2x32xf32>
    %343 = vector.broadcast %10 : vector<1x32xf32> to vector<2x32xf32>
    %344 = arith.mulf %342, %343 : vector<2x32xf32>
    %345 = vector.broadcast %11 : vector<1x32xf32> to vector<2x32xf32>
    %346 = arith.addf %344, %345 : vector<2x32xf32>
    %347 = tpu.concatenate %346, %295, %228 in 1 : vector<2x32xf32>, vector<2x32xf32>, vector<2x32xf32> -> vector<2x96xf32>
    %348 = arith.truncf %347 : vector<2x96xf32> to vector<2x96xbf16>
    %c128_87 = arith.constant 128 : index
    %c0_88 = arith.constant 0 : index
    %349 = vector.load %arg3[%c128_87, %c0_88] : memref<384x128xbf16, #tpu.memory_space<vmem>>, vector<96x128xbf16>
    %cst_89 = arith.constant dense<0.000000e+00> : vector<2x128xf32>
    %350 = tpu.matmul %348, %349, %cst_89 {dimension_numbers = #tpu.dot_dimension_numbers<[1], [0], [0], [1], [0, 0, 1, 1], [], []>} : vector<2x96xbf16>, vector<96x128xbf16>, vector<2x128xf32> -> vector<2x128xf32>
    %351 = vector.broadcast %12 : vector<1x128xf32> to vector<2x128xf32>
    %352 = arith.addf %350, %351 : vector<2x128xf32>
    %353 = vector.extract_strided_slice %352 {offsets = [0, 0], sizes = [2, 96], strides = [1, 1]} : vector<2x128xf32> to vector<2x96xf32>
    %354 = arith.negf %353 : vector<2x96xf32>
    %355 = math.exp %354 : vector<2x96xf32>
    %cst_90 = arith.constant 1.000000e+00 : f32
    %356 = vector.broadcast %cst_90 : f32 to vector<2x96xf32>
    %357 = arith.addf %356, %355 : vector<2x96xf32>
    %358 = arith.divf %356, %357 : vector<2x96xf32>
    %359 = vector.extract_strided_slice %352 {offsets = [0, 96], sizes = [2, 32], strides = [1, 1]} : vector<2x128xf32> to vector<2x32xf32>
    %360 = math.tanh %359 : vector<2x32xf32>
    %361 = vector.extract_strided_slice %358 {offsets = [0, 0], sizes = [2, 32], strides = [1, 1]} : vector<2x96xf32> to vector<2x32xf32>
    %362 = vector.extract_strided_slice %358 {offsets = [0, 32], sizes = [2, 32], strides = [1, 1]} : vector<2x96xf32> to vector<2x32xf32>
    %363 = vector.extract_strided_slice %358 {offsets = [0, 64], sizes = [2, 32], strides = [1, 1]} : vector<2x96xf32> to vector<2x32xf32>
    %364 = arith.mulf %362, %226 : vector<2x32xf32>
    %365 = arith.mulf %361, %360 : vector<2x32xf32>
    %366 = arith.addf %364, %365 : vector<2x32xf32>
    %367 = math.tanh %366 : vector<2x32xf32>
    %368 = arith.mulf %363, %367 : vector<2x32xf32>
    %cst_91 = arith.constant dense<0.000000e+00> : vector<2xf32>
    %369 = vector.multi_reduction <add>, %368, %cst_91 [1] : vector<2x32xf32> to vector<2xf32>
    %370 = vector.shape_cast %369 : vector<2xf32> to vector<2x1xf32>
    %cst_92 = arith.constant 3.200000e+01 : f32
    %371 = vector.broadcast %cst_92 : f32 to vector<2x1xf32>
    %372 = arith.divf %370, %371 : vector<2x1xf32>
    %373 = vector.broadcast %372 : vector<2x1xf32> to vector<2x32xf32>
    %374 = arith.subf %368, %373 : vector<2x32xf32>
    %375 = arith.mulf %374, %374 : vector<2x32xf32>
    %cst_93 = arith.constant dense<0.000000e+00> : vector<2xf32>
    %376 = vector.multi_reduction <add>, %375, %cst_93 [1] : vector<2x32xf32> to vector<2xf32>
    %377 = vector.shape_cast %376 : vector<2xf32> to vector<2x1xf32>
    %cst_94 = arith.constant 3.200000e+01 : f32
    %378 = vector.broadcast %cst_94 : f32 to vector<2x1xf32>
    %379 = arith.divf %377, %378 : vector<2x1xf32>
    %380 = vector.broadcast %372 : vector<2x1xf32> to vector<2x32xf32>
    %381 = arith.subf %368, %380 : vector<2x32xf32>
    %cst_95 = arith.constant 9.99999974E-6 : f32
    %382 = vector.broadcast %cst_95 : f32 to vector<2x1xf32>
    %383 = arith.addf %379, %382 : vector<2x1xf32>
    %384 = math.rsqrt %383 : vector<2x1xf32>
    %385 = vector.broadcast %384 : vector<2x1xf32> to vector<2x32xf32>
    %386 = arith.mulf %381, %385 : vector<2x32xf32>
    %387 = vector.broadcast %13 : vector<1x32xf32> to vector<2x32xf32>
    %388 = arith.mulf %386, %387 : vector<2x32xf32>
    %389 = vector.broadcast %14 : vector<1x32xf32> to vector<2x32xf32>
    %390 = arith.addf %388, %389 : vector<2x32xf32>
    %391 = math.tanh %390 : vector<2x32xf32>
    %392 = tpu.concatenate %368, %273 in 1 : vector<2x32xf32>, vector<2x32xf32> -> vector<2x64xf32>
    %393 = arith.truncf %392 : vector<2x64xf32> to vector<2x64xbf16>
    %394 = vector.extract_strided_slice %107 {offsets = [4, 0], sizes = [2, 128], strides = [1, 1]} : vector<12x128xf32> to vector<2x128xf32>
    %c64_96 = arith.constant 64 : index
    %c0_97 = arith.constant 0 : index
    %395 = vector.load %arg3[%c64_96, %c0_97] : memref<384x128xbf16, #tpu.memory_space<vmem>>, vector<64x128xbf16>
    %cst_98 = arith.constant dense<0.000000e+00> : vector<2x128xf32>
    %396 = tpu.matmul %393, %395, %cst_98 {dimension_numbers = #tpu.dot_dimension_numbers<[1], [0], [0], [1], [0, 0, 1, 1], [], []>} : vector<2x64xbf16>, vector<64x128xbf16>, vector<2x128xf32> -> vector<2x128xf32>
    %397 = arith.addf %394, %396 : vector<2x128xf32>
    %398 = vector.extract_strided_slice %397 {offsets = [0, 0], sizes = [2, 96], strides = [1, 1]} : vector<2x128xf32> to vector<2x96xf32>
    %399 = arith.negf %398 : vector<2x96xf32>
    %400 = math.exp %399 : vector<2x96xf32>
    %cst_99 = arith.constant 1.000000e+00 : f32
    %401 = vector.broadcast %cst_99 : f32 to vector<2x96xf32>
    %402 = arith.addf %401, %400 : vector<2x96xf32>
    %403 = arith.divf %401, %402 : vector<2x96xf32>
    %404 = vector.extract_strided_slice %397 {offsets = [0, 96], sizes = [2, 32], strides = [1, 1]} : vector<2x128xf32> to vector<2x32xf32>
    %405 = math.tanh %404 : vector<2x32xf32>
    %406 = vector.extract_strided_slice %403 {offsets = [0, 0], sizes = [2, 32], strides = [1, 1]} : vector<2x96xf32> to vector<2x32xf32>
    %407 = vector.extract_strided_slice %403 {offsets = [0, 32], sizes = [2, 32], strides = [1, 1]} : vector<2x96xf32> to vector<2x32xf32>
    %408 = vector.extract_strided_slice %403 {offsets = [0, 64], sizes = [2, 32], strides = [1, 1]} : vector<2x96xf32> to vector<2x32xf32>
    %409 = arith.mulf %407, %271 : vector<2x32xf32>
    %410 = arith.mulf %406, %405 : vector<2x32xf32>
    %411 = arith.addf %409, %410 : vector<2x32xf32>
    %412 = math.tanh %411 : vector<2x32xf32>
    %413 = arith.mulf %408, %412 : vector<2x32xf32>
    %cst_100 = arith.constant dense<0.000000e+00> : vector<2xf32>
    %414 = vector.multi_reduction <add>, %413, %cst_100 [1] : vector<2x32xf32> to vector<2xf32>
    %415 = vector.shape_cast %414 : vector<2xf32> to vector<2x1xf32>
    %cst_101 = arith.constant 3.200000e+01 : f32
    %416 = vector.broadcast %cst_101 : f32 to vector<2x1xf32>
    %417 = arith.divf %415, %416 : vector<2x1xf32>
    %418 = vector.broadcast %417 : vector<2x1xf32> to vector<2x32xf32>
    %419 = arith.subf %413, %418 : vector<2x32xf32>
    %420 = arith.mulf %419, %419 : vector<2x32xf32>
    %cst_102 = arith.constant dense<0.000000e+00> : vector<2xf32>
    %421 = vector.multi_reduction <add>, %420, %cst_102 [1] : vector<2x32xf32> to vector<2xf32>
    %422 = vector.shape_cast %421 : vector<2xf32> to vector<2x1xf32>
    %cst_103 = arith.constant 3.200000e+01 : f32
    %423 = vector.broadcast %cst_103 : f32 to vector<2x1xf32>
    %424 = arith.divf %422, %423 : vector<2x1xf32>
    %425 = vector.broadcast %417 : vector<2x1xf32> to vector<2x32xf32>
    %426 = arith.subf %413, %425 : vector<2x32xf32>
    %cst_104 = arith.constant 9.99999974E-6 : f32
    %427 = vector.broadcast %cst_104 : f32 to vector<2x1xf32>
    %428 = arith.addf %424, %427 : vector<2x1xf32>
    %429 = math.rsqrt %428 : vector<2x1xf32>
    %430 = vector.broadcast %429 : vector<2x1xf32> to vector<2x32xf32>
    %431 = arith.mulf %426, %430 : vector<2x32xf32>
    %432 = vector.broadcast %8 : vector<1x32xf32> to vector<2x32xf32>
    %433 = arith.mulf %431, %432 : vector<2x32xf32>
    %434 = vector.broadcast %9 : vector<1x32xf32> to vector<2x32xf32>
    %435 = arith.addf %433, %434 : vector<2x32xf32>
    %436 = arith.truncf %435 : vector<2x32xf32> to vector<2x32xbf16>
    %c256_105 = arith.constant 256 : index
    %c0_106 = arith.constant 0 : index
    %437 = vector.load %arg3[%c256_105, %c0_106] : memref<384x128xbf16, #tpu.memory_space<vmem>>, vector<32x128xbf16>
    %cst_107 = arith.constant dense<0.000000e+00> : vector<2x128xf32>
    %438 = tpu.matmul %436, %437, %cst_107 {dimension_numbers = #tpu.dot_dimension_numbers<[1], [0], [0], [1], [0, 0, 1, 1], [], []>} : vector<2x32xbf16>, vector<32x128xbf16>, vector<2x128xf32> -> vector<2x128xf32>
    %439 = vector.extract_strided_slice %438 {offsets = [0, 0], sizes = [2, 32], strides = [1, 1]} : vector<2x128xf32> to vector<2x32xf32>
    %440 = vector.shape_cast %439 : vector<2x32xf32> to vector<2x1x32xf32>
    %441 = vector.broadcast %440 : vector<2x1x32xf32> to vector<2x8x32xf32>
    %442 = arith.mulf %95, %441 : vector<2x8x32xf32>
    %cst_108 = arith.constant dense<0.000000e+00> : vector<2x8xf32>
    %443 = vector.multi_reduction <add>, %442, %cst_108 [2] : vector<2x8x32xf32> to vector<2x8xf32>
    %cst_109 = arith.constant 0.176776692 : f32
    %444 = vector.broadcast %cst_109 : f32 to vector<2x8xf32>
    %445 = arith.mulf %443, %444 : vector<2x8xf32>
    %cst_110 = arith.constant dense<0xFF800000> : vector<2xf32>
    %446 = vector.multi_reduction <maximumf>, %445, %cst_110 [1] : vector<2x8xf32> to vector<2xf32>
    %447 = vector.shape_cast %446 : vector<2xf32> to vector<2x1xf32>
    %448 = vector.broadcast %447 : vector<2x1xf32> to vector<2x8xf32>
    %449 = arith.subf %445, %448 : vector<2x8xf32>
    %450 = math.exp %449 : vector<2x8xf32>
    %cst_111 = arith.constant dense<0.000000e+00> : vector<2xf32>
    %451 = vector.multi_reduction <add>, %450, %cst_111 [1] : vector<2x8xf32> to vector<2xf32>
    %452 = vector.shape_cast %451 : vector<2xf32> to vector<2x1xf32>
    %453 = tpu.reciprocal %452 {approx = true} : vector<2x1xf32> -> vector<2x1xf32>
    %454 = vector.broadcast %453 : vector<2x1xf32> to vector<2x8xf32>
    %455 = arith.mulf %450, %454 : vector<2x8xf32>
    %456 = vector.shape_cast %455 : vector<2x8xf32> to vector<2x8x1xf32>
    %457 = vector.broadcast %456 : vector<2x8x1xf32> to vector<2x8x32xf32>
    %458 = arith.mulf %97, %457 : vector<2x8x32xf32>
    %cst_112 = arith.constant dense<0.000000e+00> : vector<2x32xf32>
    %459 = vector.multi_reduction <add>, %458, %cst_112 [1] : vector<2x8x32xf32> to vector<2x32xf32>
    %460 = arith.truncf %459 : vector<2x32xf32> to vector<2x32xbf16>
    %c288_113 = arith.constant 288 : index
    %c0_114 = arith.constant 0 : index
    %461 = vector.load %arg3[%c288_113, %c0_114] : memref<384x128xbf16, #tpu.memory_space<vmem>>, vector<32x128xbf16>
    %cst_115 = arith.constant dense<0.000000e+00> : vector<2x128xf32>
    %462 = tpu.matmul %460, %461, %cst_115 {dimension_numbers = #tpu.dot_dimension_numbers<[1], [0], [0], [1], [0, 0, 1, 1], [], []>} : vector<2x32xbf16>, vector<32x128xbf16>, vector<2x128xf32> -> vector<2x128xf32>
    %463 = vector.extract_strided_slice %462 {offsets = [0, 0], sizes = [2, 32], strides = [1, 1]} : vector<2x128xf32> to vector<2x32xf32>
    %464 = math.tanh %463 : vector<2x32xf32>
    %cst_116 = arith.constant dense<0.000000e+00> : vector<2xf32>
    %465 = vector.multi_reduction <add>, %464, %cst_116 [1] : vector<2x32xf32> to vector<2xf32>
    %466 = vector.shape_cast %465 : vector<2xf32> to vector<2x1xf32>
    %cst_117 = arith.constant 3.200000e+01 : f32
    %467 = vector.broadcast %cst_117 : f32 to vector<2x1xf32>
    %468 = arith.divf %466, %467 : vector<2x1xf32>
    %469 = vector.broadcast %468 : vector<2x1xf32> to vector<2x32xf32>
    %470 = arith.subf %464, %469 : vector<2x32xf32>
    %471 = arith.mulf %470, %470 : vector<2x32xf32>
    %cst_118 = arith.constant dense<0.000000e+00> : vector<2xf32>
    %472 = vector.multi_reduction <add>, %471, %cst_118 [1] : vector<2x32xf32> to vector<2xf32>
    %473 = vector.shape_cast %472 : vector<2xf32> to vector<2x1xf32>
    %cst_119 = arith.constant 3.200000e+01 : f32
    %474 = vector.broadcast %cst_119 : f32 to vector<2x1xf32>
    %475 = arith.divf %473, %474 : vector<2x1xf32>
    %476 = vector.broadcast %468 : vector<2x1xf32> to vector<2x32xf32>
    %477 = arith.subf %464, %476 : vector<2x32xf32>
    %cst_120 = arith.constant 9.99999974E-6 : f32
    %478 = vector.broadcast %cst_120 : f32 to vector<2x1xf32>
    %479 = arith.addf %475, %478 : vector<2x1xf32>
    %480 = math.rsqrt %479 : vector<2x1xf32>
    %481 = vector.broadcast %480 : vector<2x1xf32> to vector<2x32xf32>
    %482 = arith.mulf %477, %481 : vector<2x32xf32>
    %483 = vector.broadcast %10 : vector<1x32xf32> to vector<2x32xf32>
    %484 = arith.mulf %482, %483 : vector<2x32xf32>
    %485 = vector.broadcast %11 : vector<1x32xf32> to vector<2x32xf32>
    %486 = arith.addf %484, %485 : vector<2x32xf32>
    %487 = tpu.concatenate %486, %435, %368 in 1 : vector<2x32xf32>, vector<2x32xf32>, vector<2x32xf32> -> vector<2x96xf32>
    %488 = arith.truncf %487 : vector<2x96xf32> to vector<2x96xbf16>
    %c128_121 = arith.constant 128 : index
    %c0_122 = arith.constant 0 : index
    %489 = vector.load %arg3[%c128_121, %c0_122] : memref<384x128xbf16, #tpu.memory_space<vmem>>, vector<96x128xbf16>
    %cst_123 = arith.constant dense<0.000000e+00> : vector<2x128xf32>
    %490 = tpu.matmul %488, %489, %cst_123 {dimension_numbers = #tpu.dot_dimension_numbers<[1], [0], [0], [1], [0, 0, 1, 1], [], []>} : vector<2x96xbf16>, vector<96x128xbf16>, vector<2x128xf32> -> vector<2x128xf32>
    %491 = vector.broadcast %12 : vector<1x128xf32> to vector<2x128xf32>
    %492 = arith.addf %490, %491 : vector<2x128xf32>
    %493 = vector.extract_strided_slice %492 {offsets = [0, 0], sizes = [2, 96], strides = [1, 1]} : vector<2x128xf32> to vector<2x96xf32>
    %494 = arith.negf %493 : vector<2x96xf32>
    %495 = math.exp %494 : vector<2x96xf32>
    %cst_124 = arith.constant 1.000000e+00 : f32
    %496 = vector.broadcast %cst_124 : f32 to vector<2x96xf32>
    %497 = arith.addf %496, %495 : vector<2x96xf32>
    %498 = arith.divf %496, %497 : vector<2x96xf32>
    %499 = vector.extract_strided_slice %492 {offsets = [0, 96], sizes = [2, 32], strides = [1, 1]} : vector<2x128xf32> to vector<2x32xf32>
    %500 = math.tanh %499 : vector<2x32xf32>
    %501 = vector.extract_strided_slice %498 {offsets = [0, 0], sizes = [2, 32], strides = [1, 1]} : vector<2x96xf32> to vector<2x32xf32>
    %502 = vector.extract_strided_slice %498 {offsets = [0, 32], sizes = [2, 32], strides = [1, 1]} : vector<2x96xf32> to vector<2x32xf32>
    %503 = vector.extract_strided_slice %498 {offsets = [0, 64], sizes = [2, 32], strides = [1, 1]} : vector<2x96xf32> to vector<2x32xf32>
    %504 = arith.mulf %502, %366 : vector<2x32xf32>
    %505 = arith.mulf %501, %500 : vector<2x32xf32>
    %506 = arith.addf %504, %505 : vector<2x32xf32>
    %507 = math.tanh %506 : vector<2x32xf32>
    %508 = arith.mulf %503, %507 : vector<2x32xf32>
    %cst_125 = arith.constant dense<0.000000e+00> : vector<2xf32>
    %509 = vector.multi_reduction <add>, %508, %cst_125 [1] : vector<2x32xf32> to vector<2xf32>
    %510 = vector.shape_cast %509 : vector<2xf32> to vector<2x1xf32>
    %cst_126 = arith.constant 3.200000e+01 : f32
    %511 = vector.broadcast %cst_126 : f32 to vector<2x1xf32>
    %512 = arith.divf %510, %511 : vector<2x1xf32>
    %513 = vector.broadcast %512 : vector<2x1xf32> to vector<2x32xf32>
    %514 = arith.subf %508, %513 : vector<2x32xf32>
    %515 = arith.mulf %514, %514 : vector<2x32xf32>
    %cst_127 = arith.constant dense<0.000000e+00> : vector<2xf32>
    %516 = vector.multi_reduction <add>, %515, %cst_127 [1] : vector<2x32xf32> to vector<2xf32>
    %517 = vector.shape_cast %516 : vector<2xf32> to vector<2x1xf32>
    %cst_128 = arith.constant 3.200000e+01 : f32
    %518 = vector.broadcast %cst_128 : f32 to vector<2x1xf32>
    %519 = arith.divf %517, %518 : vector<2x1xf32>
    %520 = vector.broadcast %512 : vector<2x1xf32> to vector<2x32xf32>
    %521 = arith.subf %508, %520 : vector<2x32xf32>
    %cst_129 = arith.constant 9.99999974E-6 : f32
    %522 = vector.broadcast %cst_129 : f32 to vector<2x1xf32>
    %523 = arith.addf %519, %522 : vector<2x1xf32>
    %524 = math.rsqrt %523 : vector<2x1xf32>
    %525 = vector.broadcast %524 : vector<2x1xf32> to vector<2x32xf32>
    %526 = arith.mulf %521, %525 : vector<2x32xf32>
    %527 = vector.broadcast %13 : vector<1x32xf32> to vector<2x32xf32>
    %528 = arith.mulf %526, %527 : vector<2x32xf32>
    %529 = vector.broadcast %14 : vector<1x32xf32> to vector<2x32xf32>
    %530 = arith.addf %528, %529 : vector<2x32xf32>
    %531 = math.tanh %530 : vector<2x32xf32>
    %532 = tpu.concatenate %508, %413 in 1 : vector<2x32xf32>, vector<2x32xf32> -> vector<2x64xf32>
    %533 = arith.truncf %532 : vector<2x64xf32> to vector<2x64xbf16>
    %534 = vector.extract_strided_slice %107 {offsets = [6, 0], sizes = [2, 128], strides = [1, 1]} : vector<12x128xf32> to vector<2x128xf32>
    %c64_130 = arith.constant 64 : index
    %c0_131 = arith.constant 0 : index
    %535 = vector.load %arg3[%c64_130, %c0_131] : memref<384x128xbf16, #tpu.memory_space<vmem>>, vector<64x128xbf16>
    %cst_132 = arith.constant dense<0.000000e+00> : vector<2x128xf32>
    %536 = tpu.matmul %533, %535, %cst_132 {dimension_numbers = #tpu.dot_dimension_numbers<[1], [0], [0], [1], [0, 0, 1, 1], [], []>} : vector<2x64xbf16>, vector<64x128xbf16>, vector<2x128xf32> -> vector<2x128xf32>
    %537 = arith.addf %534, %536 : vector<2x128xf32>
    %538 = vector.extract_strided_slice %537 {offsets = [0, 0], sizes = [2, 96], strides = [1, 1]} : vector<2x128xf32> to vector<2x96xf32>
    %539 = arith.negf %538 : vector<2x96xf32>
    %540 = math.exp %539 : vector<2x96xf32>
    %cst_133 = arith.constant 1.000000e+00 : f32
    %541 = vector.broadcast %cst_133 : f32 to vector<2x96xf32>
    %542 = arith.addf %541, %540 : vector<2x96xf32>
    %543 = arith.divf %541, %542 : vector<2x96xf32>
    %544 = vector.extract_strided_slice %537 {offsets = [0, 96], sizes = [2, 32], strides = [1, 1]} : vector<2x128xf32> to vector<2x32xf32>
    %545 = math.tanh %544 : vector<2x32xf32>
    %546 = vector.extract_strided_slice %543 {offsets = [0, 0], sizes = [2, 32], strides = [1, 1]} : vector<2x96xf32> to vector<2x32xf32>
    %547 = vector.extract_strided_slice %543 {offsets = [0, 32], sizes = [2, 32], strides = [1, 1]} : vector<2x96xf32> to vector<2x32xf32>
    %548 = vector.extract_strided_slice %543 {offsets = [0, 64], sizes = [2, 32], strides = [1, 1]} : vector<2x96xf32> to vector<2x32xf32>
    %549 = arith.mulf %547, %411 : vector<2x32xf32>
    %550 = arith.mulf %546, %545 : vector<2x32xf32>
    %551 = arith.addf %549, %550 : vector<2x32xf32>
    %552 = math.tanh %551 : vector<2x32xf32>
    %553 = arith.mulf %548, %552 : vector<2x32xf32>
    %cst_134 = arith.constant dense<0.000000e+00> : vector<2xf32>
    %554 = vector.multi_reduction <add>, %553, %cst_134 [1] : vector<2x32xf32> to vector<2xf32>
    %555 = vector.shape_cast %554 : vector<2xf32> to vector<2x1xf32>
    %cst_135 = arith.constant 3.200000e+01 : f32
    %556 = vector.broadcast %cst_135 : f32 to vector<2x1xf32>
    %557 = arith.divf %555, %556 : vector<2x1xf32>
    %558 = vector.broadcast %557 : vector<2x1xf32> to vector<2x32xf32>
    %559 = arith.subf %553, %558 : vector<2x32xf32>
    %560 = arith.mulf %559, %559 : vector<2x32xf32>
    %cst_136 = arith.constant dense<0.000000e+00> : vector<2xf32>
    %561 = vector.multi_reduction <add>, %560, %cst_136 [1] : vector<2x32xf32> to vector<2xf32>
    %562 = vector.shape_cast %561 : vector<2xf32> to vector<2x1xf32>
    %cst_137 = arith.constant 3.200000e+01 : f32
    %563 = vector.broadcast %cst_137 : f32 to vector<2x1xf32>
    %564 = arith.divf %562, %563 : vector<2x1xf32>
    %565 = vector.broadcast %557 : vector<2x1xf32> to vector<2x32xf32>
    %566 = arith.subf %553, %565 : vector<2x32xf32>
    %cst_138 = arith.constant 9.99999974E-6 : f32
    %567 = vector.broadcast %cst_138 : f32 to vector<2x1xf32>
    %568 = arith.addf %564, %567 : vector<2x1xf32>
    %569 = math.rsqrt %568 : vector<2x1xf32>
    %570 = vector.broadcast %569 : vector<2x1xf32> to vector<2x32xf32>
    %571 = arith.mulf %566, %570 : vector<2x32xf32>
    %572 = vector.broadcast %8 : vector<1x32xf32> to vector<2x32xf32>
    %573 = arith.mulf %571, %572 : vector<2x32xf32>
    %574 = vector.broadcast %9 : vector<1x32xf32> to vector<2x32xf32>
    %575 = arith.addf %573, %574 : vector<2x32xf32>
    %576 = arith.truncf %575 : vector<2x32xf32> to vector<2x32xbf16>
    %c256_139 = arith.constant 256 : index
    %c0_140 = arith.constant 0 : index
    %577 = vector.load %arg3[%c256_139, %c0_140] : memref<384x128xbf16, #tpu.memory_space<vmem>>, vector<32x128xbf16>
    %cst_141 = arith.constant dense<0.000000e+00> : vector<2x128xf32>
    %578 = tpu.matmul %576, %577, %cst_141 {dimension_numbers = #tpu.dot_dimension_numbers<[1], [0], [0], [1], [0, 0, 1, 1], [], []>} : vector<2x32xbf16>, vector<32x128xbf16>, vector<2x128xf32> -> vector<2x128xf32>
    %579 = vector.extract_strided_slice %578 {offsets = [0, 0], sizes = [2, 32], strides = [1, 1]} : vector<2x128xf32> to vector<2x32xf32>
    %580 = vector.shape_cast %579 : vector<2x32xf32> to vector<2x1x32xf32>
    %581 = vector.broadcast %580 : vector<2x1x32xf32> to vector<2x8x32xf32>
    %582 = arith.mulf %95, %581 : vector<2x8x32xf32>
    %cst_142 = arith.constant dense<0.000000e+00> : vector<2x8xf32>
    %583 = vector.multi_reduction <add>, %582, %cst_142 [2] : vector<2x8x32xf32> to vector<2x8xf32>
    %cst_143 = arith.constant 0.176776692 : f32
    %584 = vector.broadcast %cst_143 : f32 to vector<2x8xf32>
    %585 = arith.mulf %583, %584 : vector<2x8xf32>
    %cst_144 = arith.constant dense<0xFF800000> : vector<2xf32>
    %586 = vector.multi_reduction <maximumf>, %585, %cst_144 [1] : vector<2x8xf32> to vector<2xf32>
    %587 = vector.shape_cast %586 : vector<2xf32> to vector<2x1xf32>
    %588 = vector.broadcast %587 : vector<2x1xf32> to vector<2x8xf32>
    %589 = arith.subf %585, %588 : vector<2x8xf32>
    %590 = math.exp %589 : vector<2x8xf32>
    %cst_145 = arith.constant dense<0.000000e+00> : vector<2xf32>
    %591 = vector.multi_reduction <add>, %590, %cst_145 [1] : vector<2x8xf32> to vector<2xf32>
    %592 = vector.shape_cast %591 : vector<2xf32> to vector<2x1xf32>
    %593 = tpu.reciprocal %592 {approx = true} : vector<2x1xf32> -> vector<2x1xf32>
    %594 = vector.broadcast %593 : vector<2x1xf32> to vector<2x8xf32>
    %595 = arith.mulf %590, %594 : vector<2x8xf32>
    %596 = vector.shape_cast %595 : vector<2x8xf32> to vector<2x8x1xf32>
    %597 = vector.broadcast %596 : vector<2x8x1xf32> to vector<2x8x32xf32>
    %598 = arith.mulf %97, %597 : vector<2x8x32xf32>
    %cst_146 = arith.constant dense<0.000000e+00> : vector<2x32xf32>
    %599 = vector.multi_reduction <add>, %598, %cst_146 [1] : vector<2x8x32xf32> to vector<2x32xf32>
    %600 = arith.truncf %599 : vector<2x32xf32> to vector<2x32xbf16>
    %c288_147 = arith.constant 288 : index
    %c0_148 = arith.constant 0 : index
    %601 = vector.load %arg3[%c288_147, %c0_148] : memref<384x128xbf16, #tpu.memory_space<vmem>>, vector<32x128xbf16>
    %cst_149 = arith.constant dense<0.000000e+00> : vector<2x128xf32>
    %602 = tpu.matmul %600, %601, %cst_149 {dimension_numbers = #tpu.dot_dimension_numbers<[1], [0], [0], [1], [0, 0, 1, 1], [], []>} : vector<2x32xbf16>, vector<32x128xbf16>, vector<2x128xf32> -> vector<2x128xf32>
    %603 = vector.extract_strided_slice %602 {offsets = [0, 0], sizes = [2, 32], strides = [1, 1]} : vector<2x128xf32> to vector<2x32xf32>
    %604 = math.tanh %603 : vector<2x32xf32>
    %cst_150 = arith.constant dense<0.000000e+00> : vector<2xf32>
    %605 = vector.multi_reduction <add>, %604, %cst_150 [1] : vector<2x32xf32> to vector<2xf32>
    %606 = vector.shape_cast %605 : vector<2xf32> to vector<2x1xf32>
    %cst_151 = arith.constant 3.200000e+01 : f32
    %607 = vector.broadcast %cst_151 : f32 to vector<2x1xf32>
    %608 = arith.divf %606, %607 : vector<2x1xf32>
    %609 = vector.broadcast %608 : vector<2x1xf32> to vector<2x32xf32>
    %610 = arith.subf %604, %609 : vector<2x32xf32>
    %611 = arith.mulf %610, %610 : vector<2x32xf32>
    %cst_152 = arith.constant dense<0.000000e+00> : vector<2xf32>
    %612 = vector.multi_reduction <add>, %611, %cst_152 [1] : vector<2x32xf32> to vector<2xf32>
    %613 = vector.shape_cast %612 : vector<2xf32> to vector<2x1xf32>
    %cst_153 = arith.constant 3.200000e+01 : f32
    %614 = vector.broadcast %cst_153 : f32 to vector<2x1xf32>
    %615 = arith.divf %613, %614 : vector<2x1xf32>
    %616 = vector.broadcast %608 : vector<2x1xf32> to vector<2x32xf32>
    %617 = arith.subf %604, %616 : vector<2x32xf32>
    %cst_154 = arith.constant 9.99999974E-6 : f32
    %618 = vector.broadcast %cst_154 : f32 to vector<2x1xf32>
    %619 = arith.addf %615, %618 : vector<2x1xf32>
    %620 = math.rsqrt %619 : vector<2x1xf32>
    %621 = vector.broadcast %620 : vector<2x1xf32> to vector<2x32xf32>
    %622 = arith.mulf %617, %621 : vector<2x32xf32>
    %623 = vector.broadcast %10 : vector<1x32xf32> to vector<2x32xf32>
    %624 = arith.mulf %622, %623 : vector<2x32xf32>
    %625 = vector.broadcast %11 : vector<1x32xf32> to vector<2x32xf32>
    %626 = arith.addf %624, %625 : vector<2x32xf32>
    %627 = tpu.concatenate %626, %575, %508 in 1 : vector<2x32xf32>, vector<2x32xf32>, vector<2x32xf32> -> vector<2x96xf32>
    %628 = arith.truncf %627 : vector<2x96xf32> to vector<2x96xbf16>
    %c128_155 = arith.constant 128 : index
    %c0_156 = arith.constant 0 : index
    %629 = vector.load %arg3[%c128_155, %c0_156] : memref<384x128xbf16, #tpu.memory_space<vmem>>, vector<96x128xbf16>
    %cst_157 = arith.constant dense<0.000000e+00> : vector<2x128xf32>
    %630 = tpu.matmul %628, %629, %cst_157 {dimension_numbers = #tpu.dot_dimension_numbers<[1], [0], [0], [1], [0, 0, 1, 1], [], []>} : vector<2x96xbf16>, vector<96x128xbf16>, vector<2x128xf32> -> vector<2x128xf32>
    %631 = vector.broadcast %12 : vector<1x128xf32> to vector<2x128xf32>
    %632 = arith.addf %630, %631 : vector<2x128xf32>
    %633 = vector.extract_strided_slice %632 {offsets = [0, 0], sizes = [2, 96], strides = [1, 1]} : vector<2x128xf32> to vector<2x96xf32>
    %634 = arith.negf %633 : vector<2x96xf32>
    %635 = math.exp %634 : vector<2x96xf32>
    %cst_158 = arith.constant 1.000000e+00 : f32
    %636 = vector.broadcast %cst_158 : f32 to vector<2x96xf32>
    %637 = arith.addf %636, %635 : vector<2x96xf32>
    %638 = arith.divf %636, %637 : vector<2x96xf32>
    %639 = vector.extract_strided_slice %632 {offsets = [0, 96], sizes = [2, 32], strides = [1, 1]} : vector<2x128xf32> to vector<2x32xf32>
    %640 = math.tanh %639 : vector<2x32xf32>
    %641 = vector.extract_strided_slice %638 {offsets = [0, 0], sizes = [2, 32], strides = [1, 1]} : vector<2x96xf32> to vector<2x32xf32>
    %642 = vector.extract_strided_slice %638 {offsets = [0, 32], sizes = [2, 32], strides = [1, 1]} : vector<2x96xf32> to vector<2x32xf32>
    %643 = vector.extract_strided_slice %638 {offsets = [0, 64], sizes = [2, 32], strides = [1, 1]} : vector<2x96xf32> to vector<2x32xf32>
    %644 = arith.mulf %642, %506 : vector<2x32xf32>
    %645 = arith.mulf %641, %640 : vector<2x32xf32>
    %646 = arith.addf %644, %645 : vector<2x32xf32>
    %647 = math.tanh %646 : vector<2x32xf32>
    %648 = arith.mulf %643, %647 : vector<2x32xf32>
    %cst_159 = arith.constant dense<0.000000e+00> : vector<2xf32>
    %649 = vector.multi_reduction <add>, %648, %cst_159 [1] : vector<2x32xf32> to vector<2xf32>
    %650 = vector.shape_cast %649 : vector<2xf32> to vector<2x1xf32>
    %cst_160 = arith.constant 3.200000e+01 : f32
    %651 = vector.broadcast %cst_160 : f32 to vector<2x1xf32>
    %652 = arith.divf %650, %651 : vector<2x1xf32>
    %653 = vector.broadcast %652 : vector<2x1xf32> to vector<2x32xf32>
    %654 = arith.subf %648, %653 : vector<2x32xf32>
    %655 = arith.mulf %654, %654 : vector<2x32xf32>
    %cst_161 = arith.constant dense<0.000000e+00> : vector<2xf32>
    %656 = vector.multi_reduction <add>, %655, %cst_161 [1] : vector<2x32xf32> to vector<2xf32>
    %657 = vector.shape_cast %656 : vector<2xf32> to vector<2x1xf32>
    %cst_162 = arith.constant 3.200000e+01 : f32
    %658 = vector.broadcast %cst_162 : f32 to vector<2x1xf32>
    %659 = arith.divf %657, %658 : vector<2x1xf32>
    %660 = vector.broadcast %652 : vector<2x1xf32> to vector<2x32xf32>
    %661 = arith.subf %648, %660 : vector<2x32xf32>
    %cst_163 = arith.constant 9.99999974E-6 : f32
    %662 = vector.broadcast %cst_163 : f32 to vector<2x1xf32>
    %663 = arith.addf %659, %662 : vector<2x1xf32>
    %664 = math.rsqrt %663 : vector<2x1xf32>
    %665 = vector.broadcast %664 : vector<2x1xf32> to vector<2x32xf32>
    %666 = arith.mulf %661, %665 : vector<2x32xf32>
    %667 = vector.broadcast %13 : vector<1x32xf32> to vector<2x32xf32>
    %668 = arith.mulf %666, %667 : vector<2x32xf32>
    %669 = vector.broadcast %14 : vector<1x32xf32> to vector<2x32xf32>
    %670 = arith.addf %668, %669 : vector<2x32xf32>
    %671 = math.tanh %670 : vector<2x32xf32>
    %672 = tpu.concatenate %648, %553 in 1 : vector<2x32xf32>, vector<2x32xf32> -> vector<2x64xf32>
    %673 = arith.truncf %672 : vector<2x64xf32> to vector<2x64xbf16>
    %674 = vector.extract_strided_slice %107 {offsets = [8, 0], sizes = [2, 128], strides = [1, 1]} : vector<12x128xf32> to vector<2x128xf32>
    %c64_164 = arith.constant 64 : index
    %c0_165 = arith.constant 0 : index
    %675 = vector.load %arg3[%c64_164, %c0_165] : memref<384x128xbf16, #tpu.memory_space<vmem>>, vector<64x128xbf16>
    %cst_166 = arith.constant dense<0.000000e+00> : vector<2x128xf32>
    %676 = tpu.matmul %673, %675, %cst_166 {dimension_numbers = #tpu.dot_dimension_numbers<[1], [0], [0], [1], [0, 0, 1, 1], [], []>} : vector<2x64xbf16>, vector<64x128xbf16>, vector<2x128xf32> -> vector<2x128xf32>
    %677 = arith.addf %674, %676 : vector<2x128xf32>
    %678 = vector.extract_strided_slice %677 {offsets = [0, 0], sizes = [2, 96], strides = [1, 1]} : vector<2x128xf32> to vector<2x96xf32>
    %679 = arith.negf %678 : vector<2x96xf32>
    %680 = math.exp %679 : vector<2x96xf32>
    %cst_167 = arith.constant 1.000000e+00 : f32
    %681 = vector.broadcast %cst_167 : f32 to vector<2x96xf32>
    %682 = arith.addf %681, %680 : vector<2x96xf32>
    %683 = arith.divf %681, %682 : vector<2x96xf32>
    %684 = vector.extract_strided_slice %677 {offsets = [0, 96], sizes = [2, 32], strides = [1, 1]} : vector<2x128xf32> to vector<2x32xf32>
    %685 = math.tanh %684 : vector<2x32xf32>
    %686 = vector.extract_strided_slice %683 {offsets = [0, 0], sizes = [2, 32], strides = [1, 1]} : vector<2x96xf32> to vector<2x32xf32>
    %687 = vector.extract_strided_slice %683 {offsets = [0, 32], sizes = [2, 32], strides = [1, 1]} : vector<2x96xf32> to vector<2x32xf32>
    %688 = vector.extract_strided_slice %683 {offsets = [0, 64], sizes = [2, 32], strides = [1, 1]} : vector<2x96xf32> to vector<2x32xf32>
    %689 = arith.mulf %687, %551 : vector<2x32xf32>
    %690 = arith.mulf %686, %685 : vector<2x32xf32>
    %691 = arith.addf %689, %690 : vector<2x32xf32>
    %692 = math.tanh %691 : vector<2x32xf32>
    %693 = arith.mulf %688, %692 : vector<2x32xf32>
    %cst_168 = arith.constant dense<0.000000e+00> : vector<2xf32>
    %694 = vector.multi_reduction <add>, %693, %cst_168 [1] : vector<2x32xf32> to vector<2xf32>
    %695 = vector.shape_cast %694 : vector<2xf32> to vector<2x1xf32>
    %cst_169 = arith.constant 3.200000e+01 : f32
    %696 = vector.broadcast %cst_169 : f32 to vector<2x1xf32>
    %697 = arith.divf %695, %696 : vector<2x1xf32>
    %698 = vector.broadcast %697 : vector<2x1xf32> to vector<2x32xf32>
    %699 = arith.subf %693, %698 : vector<2x32xf32>
    %700 = arith.mulf %699, %699 : vector<2x32xf32>
    %cst_170 = arith.constant dense<0.000000e+00> : vector<2xf32>
    %701 = vector.multi_reduction <add>, %700, %cst_170 [1] : vector<2x32xf32> to vector<2xf32>
    %702 = vector.shape_cast %701 : vector<2xf32> to vector<2x1xf32>
    %cst_171 = arith.constant 3.200000e+01 : f32
    %703 = vector.broadcast %cst_171 : f32 to vector<2x1xf32>
    %704 = arith.divf %702, %703 : vector<2x1xf32>
    %705 = vector.broadcast %697 : vector<2x1xf32> to vector<2x32xf32>
    %706 = arith.subf %693, %705 : vector<2x32xf32>
    %cst_172 = arith.constant 9.99999974E-6 : f32
    %707 = vector.broadcast %cst_172 : f32 to vector<2x1xf32>
    %708 = arith.addf %704, %707 : vector<2x1xf32>
    %709 = math.rsqrt %708 : vector<2x1xf32>
    %710 = vector.broadcast %709 : vector<2x1xf32> to vector<2x32xf32>
    %711 = arith.mulf %706, %710 : vector<2x32xf32>
    %712 = vector.broadcast %8 : vector<1x32xf32> to vector<2x32xf32>
    %713 = arith.mulf %711, %712 : vector<2x32xf32>
    %714 = vector.broadcast %9 : vector<1x32xf32> to vector<2x32xf32>
    %715 = arith.addf %713, %714 : vector<2x32xf32>
    %716 = arith.truncf %715 : vector<2x32xf32> to vector<2x32xbf16>
    %c256_173 = arith.constant 256 : index
    %c0_174 = arith.constant 0 : index
    %717 = vector.load %arg3[%c256_173, %c0_174] : memref<384x128xbf16, #tpu.memory_space<vmem>>, vector<32x128xbf16>
    %cst_175 = arith.constant dense<0.000000e+00> : vector<2x128xf32>
    %718 = tpu.matmul %716, %717, %cst_175 {dimension_numbers = #tpu.dot_dimension_numbers<[1], [0], [0], [1], [0, 0, 1, 1], [], []>} : vector<2x32xbf16>, vector<32x128xbf16>, vector<2x128xf32> -> vector<2x128xf32>
    %719 = vector.extract_strided_slice %718 {offsets = [0, 0], sizes = [2, 32], strides = [1, 1]} : vector<2x128xf32> to vector<2x32xf32>
    %720 = vector.shape_cast %719 : vector<2x32xf32> to vector<2x1x32xf32>
    %721 = vector.broadcast %720 : vector<2x1x32xf32> to vector<2x8x32xf32>
    %722 = arith.mulf %95, %721 : vector<2x8x32xf32>
    %cst_176 = arith.constant dense<0.000000e+00> : vector<2x8xf32>
    %723 = vector.multi_reduction <add>, %722, %cst_176 [2] : vector<2x8x32xf32> to vector<2x8xf32>
    %cst_177 = arith.constant 0.176776692 : f32
    %724 = vector.broadcast %cst_177 : f32 to vector<2x8xf32>
    %725 = arith.mulf %723, %724 : vector<2x8xf32>
    %cst_178 = arith.constant dense<0xFF800000> : vector<2xf32>
    %726 = vector.multi_reduction <maximumf>, %725, %cst_178 [1] : vector<2x8xf32> to vector<2xf32>
    %727 = vector.shape_cast %726 : vector<2xf32> to vector<2x1xf32>
    %728 = vector.broadcast %727 : vector<2x1xf32> to vector<2x8xf32>
    %729 = arith.subf %725, %728 : vector<2x8xf32>
    %730 = math.exp %729 : vector<2x8xf32>
    %cst_179 = arith.constant dense<0.000000e+00> : vector<2xf32>
    %731 = vector.multi_reduction <add>, %730, %cst_179 [1] : vector<2x8xf32> to vector<2xf32>
    %732 = vector.shape_cast %731 : vector<2xf32> to vector<2x1xf32>
    %733 = tpu.reciprocal %732 {approx = true} : vector<2x1xf32> -> vector<2x1xf32>
    %734 = vector.broadcast %733 : vector<2x1xf32> to vector<2x8xf32>
    %735 = arith.mulf %730, %734 : vector<2x8xf32>
    %736 = vector.shape_cast %735 : vector<2x8xf32> to vector<2x8x1xf32>
    %737 = vector.broadcast %736 : vector<2x8x1xf32> to vector<2x8x32xf32>
    %738 = arith.mulf %97, %737 : vector<2x8x32xf32>
    %cst_180 = arith.constant dense<0.000000e+00> : vector<2x32xf32>
    %739 = vector.multi_reduction <add>, %738, %cst_180 [1] : vector<2x8x32xf32> to vector<2x32xf32>
    %740 = arith.truncf %739 : vector<2x32xf32> to vector<2x32xbf16>
    %c288_181 = arith.constant 288 : index
    %c0_182 = arith.constant 0 : index
    %741 = vector.load %arg3[%c288_181, %c0_182] : memref<384x128xbf16, #tpu.memory_space<vmem>>, vector<32x128xbf16>
    %cst_183 = arith.constant dense<0.000000e+00> : vector<2x128xf32>
    %742 = tpu.matmul %740, %741, %cst_183 {dimension_numbers = #tpu.dot_dimension_numbers<[1], [0], [0], [1], [0, 0, 1, 1], [], []>} : vector<2x32xbf16>, vector<32x128xbf16>, vector<2x128xf32> -> vector<2x128xf32>
    %743 = vector.extract_strided_slice %742 {offsets = [0, 0], sizes = [2, 32], strides = [1, 1]} : vector<2x128xf32> to vector<2x32xf32>
    %744 = math.tanh %743 : vector<2x32xf32>
    %cst_184 = arith.constant dense<0.000000e+00> : vector<2xf32>
    %745 = vector.multi_reduction <add>, %744, %cst_184 [1] : vector<2x32xf32> to vector<2xf32>
    %746 = vector.shape_cast %745 : vector<2xf32> to vector<2x1xf32>
    %cst_185 = arith.constant 3.200000e+01 : f32
    %747 = vector.broadcast %cst_185 : f32 to vector<2x1xf32>
    %748 = arith.divf %746, %747 : vector<2x1xf32>
    %749 = vector.broadcast %748 : vector<2x1xf32> to vector<2x32xf32>
    %750 = arith.subf %744, %749 : vector<2x32xf32>
    %751 = arith.mulf %750, %750 : vector<2x32xf32>
    %cst_186 = arith.constant dense<0.000000e+00> : vector<2xf32>
    %752 = vector.multi_reduction <add>, %751, %cst_186 [1] : vector<2x32xf32> to vector<2xf32>
    %753 = vector.shape_cast %752 : vector<2xf32> to vector<2x1xf32>
    %cst_187 = arith.constant 3.200000e+01 : f32
    %754 = vector.broadcast %cst_187 : f32 to vector<2x1xf32>
    %755 = arith.divf %753, %754 : vector<2x1xf32>
    %756 = vector.broadcast %748 : vector<2x1xf32> to vector<2x32xf32>
    %757 = arith.subf %744, %756 : vector<2x32xf32>
    %cst_188 = arith.constant 9.99999974E-6 : f32
    %758 = vector.broadcast %cst_188 : f32 to vector<2x1xf32>
    %759 = arith.addf %755, %758 : vector<2x1xf32>
    %760 = math.rsqrt %759 : vector<2x1xf32>
    %761 = vector.broadcast %760 : vector<2x1xf32> to vector<2x32xf32>
    %762 = arith.mulf %757, %761 : vector<2x32xf32>
    %763 = vector.broadcast %10 : vector<1x32xf32> to vector<2x32xf32>
    %764 = arith.mulf %762, %763 : vector<2x32xf32>
    %765 = vector.broadcast %11 : vector<1x32xf32> to vector<2x32xf32>
    %766 = arith.addf %764, %765 : vector<2x32xf32>
    %767 = tpu.concatenate %766, %715, %648 in 1 : vector<2x32xf32>, vector<2x32xf32>, vector<2x32xf32> -> vector<2x96xf32>
    %768 = arith.truncf %767 : vector<2x96xf32> to vector<2x96xbf16>
    %c128_189 = arith.constant 128 : index
    %c0_190 = arith.constant 0 : index
    %769 = vector.load %arg3[%c128_189, %c0_190] : memref<384x128xbf16, #tpu.memory_space<vmem>>, vector<96x128xbf16>
    %cst_191 = arith.constant dense<0.000000e+00> : vector<2x128xf32>
    %770 = tpu.matmul %768, %769, %cst_191 {dimension_numbers = #tpu.dot_dimension_numbers<[1], [0], [0], [1], [0, 0, 1, 1], [], []>} : vector<2x96xbf16>, vector<96x128xbf16>, vector<2x128xf32> -> vector<2x128xf32>
    %771 = vector.broadcast %12 : vector<1x128xf32> to vector<2x128xf32>
    %772 = arith.addf %770, %771 : vector<2x128xf32>
    %773 = vector.extract_strided_slice %772 {offsets = [0, 0], sizes = [2, 96], strides = [1, 1]} : vector<2x128xf32> to vector<2x96xf32>
    %774 = arith.negf %773 : vector<2x96xf32>
    %775 = math.exp %774 : vector<2x96xf32>
    %cst_192 = arith.constant 1.000000e+00 : f32
    %776 = vector.broadcast %cst_192 : f32 to vector<2x96xf32>
    %777 = arith.addf %776, %775 : vector<2x96xf32>
    %778 = arith.divf %776, %777 : vector<2x96xf32>
    %779 = vector.extract_strided_slice %772 {offsets = [0, 96], sizes = [2, 32], strides = [1, 1]} : vector<2x128xf32> to vector<2x32xf32>
    %780 = math.tanh %779 : vector<2x32xf32>
    %781 = vector.extract_strided_slice %778 {offsets = [0, 0], sizes = [2, 32], strides = [1, 1]} : vector<2x96xf32> to vector<2x32xf32>
    %782 = vector.extract_strided_slice %778 {offsets = [0, 32], sizes = [2, 32], strides = [1, 1]} : vector<2x96xf32> to vector<2x32xf32>
    %783 = vector.extract_strided_slice %778 {offsets = [0, 64], sizes = [2, 32], strides = [1, 1]} : vector<2x96xf32> to vector<2x32xf32>
    %784 = arith.mulf %782, %646 : vector<2x32xf32>
    %785 = arith.mulf %781, %780 : vector<2x32xf32>
    %786 = arith.addf %784, %785 : vector<2x32xf32>
    %787 = math.tanh %786 : vector<2x32xf32>
    %788 = arith.mulf %783, %787 : vector<2x32xf32>
    %cst_193 = arith.constant dense<0.000000e+00> : vector<2xf32>
    %789 = vector.multi_reduction <add>, %788, %cst_193 [1] : vector<2x32xf32> to vector<2xf32>
    %790 = vector.shape_cast %789 : vector<2xf32> to vector<2x1xf32>
    %cst_194 = arith.constant 3.200000e+01 : f32
    %791 = vector.broadcast %cst_194 : f32 to vector<2x1xf32>
    %792 = arith.divf %790, %791 : vector<2x1xf32>
    %793 = vector.broadcast %792 : vector<2x1xf32> to vector<2x32xf32>
    %794 = arith.subf %788, %793 : vector<2x32xf32>
    %795 = arith.mulf %794, %794 : vector<2x32xf32>
    %cst_195 = arith.constant dense<0.000000e+00> : vector<2xf32>
    %796 = vector.multi_reduction <add>, %795, %cst_195 [1] : vector<2x32xf32> to vector<2xf32>
    %797 = vector.shape_cast %796 : vector<2xf32> to vector<2x1xf32>
    %cst_196 = arith.constant 3.200000e+01 : f32
    %798 = vector.broadcast %cst_196 : f32 to vector<2x1xf32>
    %799 = arith.divf %797, %798 : vector<2x1xf32>
    %800 = vector.broadcast %792 : vector<2x1xf32> to vector<2x32xf32>
    %801 = arith.subf %788, %800 : vector<2x32xf32>
    %cst_197 = arith.constant 9.99999974E-6 : f32
    %802 = vector.broadcast %cst_197 : f32 to vector<2x1xf32>
    %803 = arith.addf %799, %802 : vector<2x1xf32>
    %804 = math.rsqrt %803 : vector<2x1xf32>
    %805 = vector.broadcast %804 : vector<2x1xf32> to vector<2x32xf32>
    %806 = arith.mulf %801, %805 : vector<2x32xf32>
    %807 = vector.broadcast %13 : vector<1x32xf32> to vector<2x32xf32>
    %808 = arith.mulf %806, %807 : vector<2x32xf32>
    %809 = vector.broadcast %14 : vector<1x32xf32> to vector<2x32xf32>
    %810 = arith.addf %808, %809 : vector<2x32xf32>
    %811 = math.tanh %810 : vector<2x32xf32>
    %812 = tpu.concatenate %788, %693 in 1 : vector<2x32xf32>, vector<2x32xf32> -> vector<2x64xf32>
    %813 = arith.truncf %812 : vector<2x64xf32> to vector<2x64xbf16>
    %814 = vector.extract_strided_slice %107 {offsets = [10, 0], sizes = [2, 128], strides = [1, 1]} : vector<12x128xf32> to vector<2x128xf32>
    %c64_198 = arith.constant 64 : index
    %c0_199 = arith.constant 0 : index
    %815 = vector.load %arg3[%c64_198, %c0_199] : memref<384x128xbf16, #tpu.memory_space<vmem>>, vector<64x128xbf16>
    %cst_200 = arith.constant dense<0.000000e+00> : vector<2x128xf32>
    %816 = tpu.matmul %813, %815, %cst_200 {dimension_numbers = #tpu.dot_dimension_numbers<[1], [0], [0], [1], [0, 0, 1, 1], [], []>} : vector<2x64xbf16>, vector<64x128xbf16>, vector<2x128xf32> -> vector<2x128xf32>
    %817 = arith.addf %814, %816 : vector<2x128xf32>
    %818 = vector.extract_strided_slice %817 {offsets = [0, 0], sizes = [2, 96], strides = [1, 1]} : vector<2x128xf32> to vector<2x96xf32>
    %819 = arith.negf %818 : vector<2x96xf32>
    %820 = math.exp %819 : vector<2x96xf32>
    %cst_201 = arith.constant 1.000000e+00 : f32
    %821 = vector.broadcast %cst_201 : f32 to vector<2x96xf32>
    %822 = arith.addf %821, %820 : vector<2x96xf32>
    %823 = arith.divf %821, %822 : vector<2x96xf32>
    %824 = vector.extract_strided_slice %817 {offsets = [0, 96], sizes = [2, 32], strides = [1, 1]} : vector<2x128xf32> to vector<2x32xf32>
    %825 = math.tanh %824 : vector<2x32xf32>
    %826 = vector.extract_strided_slice %823 {offsets = [0, 0], sizes = [2, 32], strides = [1, 1]} : vector<2x96xf32> to vector<2x32xf32>
    %827 = vector.extract_strided_slice %823 {offsets = [0, 32], sizes = [2, 32], strides = [1, 1]} : vector<2x96xf32> to vector<2x32xf32>
    %828 = vector.extract_strided_slice %823 {offsets = [0, 64], sizes = [2, 32], strides = [1, 1]} : vector<2x96xf32> to vector<2x32xf32>
    %829 = arith.mulf %827, %691 : vector<2x32xf32>
    %830 = arith.mulf %826, %825 : vector<2x32xf32>
    %831 = arith.addf %829, %830 : vector<2x32xf32>
    %832 = math.tanh %831 : vector<2x32xf32>
    %833 = arith.mulf %828, %832 : vector<2x32xf32>
    %cst_202 = arith.constant dense<0.000000e+00> : vector<2xf32>
    %834 = vector.multi_reduction <add>, %833, %cst_202 [1] : vector<2x32xf32> to vector<2xf32>
    %835 = vector.shape_cast %834 : vector<2xf32> to vector<2x1xf32>
    %cst_203 = arith.constant 3.200000e+01 : f32
    %836 = vector.broadcast %cst_203 : f32 to vector<2x1xf32>
    %837 = arith.divf %835, %836 : vector<2x1xf32>
    %838 = vector.broadcast %837 : vector<2x1xf32> to vector<2x32xf32>
    %839 = arith.subf %833, %838 : vector<2x32xf32>
    %840 = arith.mulf %839, %839 : vector<2x32xf32>
    %cst_204 = arith.constant dense<0.000000e+00> : vector<2xf32>
    %841 = vector.multi_reduction <add>, %840, %cst_204 [1] : vector<2x32xf32> to vector<2xf32>
    %842 = vector.shape_cast %841 : vector<2xf32> to vector<2x1xf32>
    %cst_205 = arith.constant 3.200000e+01 : f32
    %843 = vector.broadcast %cst_205 : f32 to vector<2x1xf32>
    %844 = arith.divf %842, %843 : vector<2x1xf32>
    %845 = vector.broadcast %837 : vector<2x1xf32> to vector<2x32xf32>
    %846 = arith.subf %833, %845 : vector<2x32xf32>
    %cst_206 = arith.constant 9.99999974E-6 : f32
    %847 = vector.broadcast %cst_206 : f32 to vector<2x1xf32>
    %848 = arith.addf %844, %847 : vector<2x1xf32>
    %849 = math.rsqrt %848 : vector<2x1xf32>
    %850 = vector.broadcast %849 : vector<2x1xf32> to vector<2x32xf32>
    %851 = arith.mulf %846, %850 : vector<2x32xf32>
    %852 = vector.broadcast %8 : vector<1x32xf32> to vector<2x32xf32>
    %853 = arith.mulf %851, %852 : vector<2x32xf32>
    %854 = vector.broadcast %9 : vector<1x32xf32> to vector<2x32xf32>
    %855 = arith.addf %853, %854 : vector<2x32xf32>
    %856 = arith.truncf %855 : vector<2x32xf32> to vector<2x32xbf16>
    %c256_207 = arith.constant 256 : index
    %c0_208 = arith.constant 0 : index
    %857 = vector.load %arg3[%c256_207, %c0_208] : memref<384x128xbf16, #tpu.memory_space<vmem>>, vector<32x128xbf16>
    %cst_209 = arith.constant dense<0.000000e+00> : vector<2x128xf32>
    %858 = tpu.matmul %856, %857, %cst_209 {dimension_numbers = #tpu.dot_dimension_numbers<[1], [0], [0], [1], [0, 0, 1, 1], [], []>} : vector<2x32xbf16>, vector<32x128xbf16>, vector<2x128xf32> -> vector<2x128xf32>
    %859 = vector.extract_strided_slice %858 {offsets = [0, 0], sizes = [2, 32], strides = [1, 1]} : vector<2x128xf32> to vector<2x32xf32>
    %860 = vector.shape_cast %859 : vector<2x32xf32> to vector<2x1x32xf32>
    %861 = vector.broadcast %860 : vector<2x1x32xf32> to vector<2x8x32xf32>
    %862 = arith.mulf %95, %861 : vector<2x8x32xf32>
    %cst_210 = arith.constant dense<0.000000e+00> : vector<2x8xf32>
    %863 = vector.multi_reduction <add>, %862, %cst_210 [2] : vector<2x8x32xf32> to vector<2x8xf32>
    %cst_211 = arith.constant 0.176776692 : f32
    %864 = vector.broadcast %cst_211 : f32 to vector<2x8xf32>
    %865 = arith.mulf %863, %864 : vector<2x8xf32>
    %cst_212 = arith.constant dense<0xFF800000> : vector<2xf32>
    %866 = vector.multi_reduction <maximumf>, %865, %cst_212 [1] : vector<2x8xf32> to vector<2xf32>
    %867 = vector.shape_cast %866 : vector<2xf32> to vector<2x1xf32>
    %868 = vector.broadcast %867 : vector<2x1xf32> to vector<2x8xf32>
    %869 = arith.subf %865, %868 : vector<2x8xf32>
    %870 = math.exp %869 : vector<2x8xf32>
    %cst_213 = arith.constant dense<0.000000e+00> : vector<2xf32>
    %871 = vector.multi_reduction <add>, %870, %cst_213 [1] : vector<2x8xf32> to vector<2xf32>
    %872 = vector.shape_cast %871 : vector<2xf32> to vector<2x1xf32>
    %873 = tpu.reciprocal %872 {approx = true} : vector<2x1xf32> -> vector<2x1xf32>
    %874 = vector.broadcast %873 : vector<2x1xf32> to vector<2x8xf32>
    %875 = arith.mulf %870, %874 : vector<2x8xf32>
    %876 = vector.shape_cast %875 : vector<2x8xf32> to vector<2x8x1xf32>
    %877 = vector.broadcast %876 : vector<2x8x1xf32> to vector<2x8x32xf32>
    %878 = arith.mulf %97, %877 : vector<2x8x32xf32>
    %cst_214 = arith.constant dense<0.000000e+00> : vector<2x32xf32>
    %879 = vector.multi_reduction <add>, %878, %cst_214 [1] : vector<2x8x32xf32> to vector<2x32xf32>
    %880 = arith.truncf %879 : vector<2x32xf32> to vector<2x32xbf16>
    %c288_215 = arith.constant 288 : index
    %c0_216 = arith.constant 0 : index
    %881 = vector.load %arg3[%c288_215, %c0_216] : memref<384x128xbf16, #tpu.memory_space<vmem>>, vector<32x128xbf16>
    %cst_217 = arith.constant dense<0.000000e+00> : vector<2x128xf32>
    %882 = tpu.matmul %880, %881, %cst_217 {dimension_numbers = #tpu.dot_dimension_numbers<[1], [0], [0], [1], [0, 0, 1, 1], [], []>} : vector<2x32xbf16>, vector<32x128xbf16>, vector<2x128xf32> -> vector<2x128xf32>
    %883 = vector.extract_strided_slice %882 {offsets = [0, 0], sizes = [2, 32], strides = [1, 1]} : vector<2x128xf32> to vector<2x32xf32>
    %884 = math.tanh %883 : vector<2x32xf32>
    %cst_218 = arith.constant dense<0.000000e+00> : vector<2xf32>
    %885 = vector.multi_reduction <add>, %884, %cst_218 [1] : vector<2x32xf32> to vector<2xf32>
    %886 = vector.shape_cast %885 : vector<2xf32> to vector<2x1xf32>
    %cst_219 = arith.constant 3.200000e+01 : f32
    %887 = vector.broadcast %cst_219 : f32 to vector<2x1xf32>
    %888 = arith.divf %886, %887 : vector<2x1xf32>
    %889 = vector.broadcast %888 : vector<2x1xf32> to vector<2x32xf32>
    %890 = arith.subf %884, %889 : vector<2x32xf32>
    %891 = arith.mulf %890, %890 : vector<2x32xf32>
    %cst_220 = arith.constant dense<0.000000e+00> : vector<2xf32>
    %892 = vector.multi_reduction <add>, %891, %cst_220 [1] : vector<2x32xf32> to vector<2xf32>
    %893 = vector.shape_cast %892 : vector<2xf32> to vector<2x1xf32>
    %cst_221 = arith.constant 3.200000e+01 : f32
    %894 = vector.broadcast %cst_221 : f32 to vector<2x1xf32>
    %895 = arith.divf %893, %894 : vector<2x1xf32>
    %896 = vector.broadcast %888 : vector<2x1xf32> to vector<2x32xf32>
    %897 = arith.subf %884, %896 : vector<2x32xf32>
    %cst_222 = arith.constant 9.99999974E-6 : f32
    %898 = vector.broadcast %cst_222 : f32 to vector<2x1xf32>
    %899 = arith.addf %895, %898 : vector<2x1xf32>
    %900 = math.rsqrt %899 : vector<2x1xf32>
    %901 = vector.broadcast %900 : vector<2x1xf32> to vector<2x32xf32>
    %902 = arith.mulf %897, %901 : vector<2x32xf32>
    %903 = vector.broadcast %10 : vector<1x32xf32> to vector<2x32xf32>
    %904 = arith.mulf %902, %903 : vector<2x32xf32>
    %905 = vector.broadcast %11 : vector<1x32xf32> to vector<2x32xf32>
    %906 = arith.addf %904, %905 : vector<2x32xf32>
    %907 = tpu.concatenate %906, %855, %788 in 1 : vector<2x32xf32>, vector<2x32xf32>, vector<2x32xf32> -> vector<2x96xf32>
    %908 = arith.truncf %907 : vector<2x96xf32> to vector<2x96xbf16>
    %c128_223 = arith.constant 128 : index
    %c0_224 = arith.constant 0 : index
    %909 = vector.load %arg3[%c128_223, %c0_224] : memref<384x128xbf16, #tpu.memory_space<vmem>>, vector<96x128xbf16>
    %cst_225 = arith.constant dense<0.000000e+00> : vector<2x128xf32>
    %910 = tpu.matmul %908, %909, %cst_225 {dimension_numbers = #tpu.dot_dimension_numbers<[1], [0], [0], [1], [0, 0, 1, 1], [], []>} : vector<2x96xbf16>, vector<96x128xbf16>, vector<2x128xf32> -> vector<2x128xf32>
    %911 = vector.broadcast %12 : vector<1x128xf32> to vector<2x128xf32>
    %912 = arith.addf %910, %911 : vector<2x128xf32>
    %913 = vector.extract_strided_slice %912 {offsets = [0, 0], sizes = [2, 96], strides = [1, 1]} : vector<2x128xf32> to vector<2x96xf32>
    %914 = arith.negf %913 : vector<2x96xf32>
    %915 = math.exp %914 : vector<2x96xf32>
    %cst_226 = arith.constant 1.000000e+00 : f32
    %916 = vector.broadcast %cst_226 : f32 to vector<2x96xf32>
    %917 = arith.addf %916, %915 : vector<2x96xf32>
    %918 = arith.divf %916, %917 : vector<2x96xf32>
    %919 = vector.extract_strided_slice %912 {offsets = [0, 96], sizes = [2, 32], strides = [1, 1]} : vector<2x128xf32> to vector<2x32xf32>
    %920 = math.tanh %919 : vector<2x32xf32>
    %921 = vector.extract_strided_slice %918 {offsets = [0, 0], sizes = [2, 32], strides = [1, 1]} : vector<2x96xf32> to vector<2x32xf32>
    %922 = vector.extract_strided_slice %918 {offsets = [0, 32], sizes = [2, 32], strides = [1, 1]} : vector<2x96xf32> to vector<2x32xf32>
    %923 = vector.extract_strided_slice %918 {offsets = [0, 64], sizes = [2, 32], strides = [1, 1]} : vector<2x96xf32> to vector<2x32xf32>
    %924 = arith.mulf %922, %786 : vector<2x32xf32>
    %925 = arith.mulf %921, %920 : vector<2x32xf32>
    %926 = arith.addf %924, %925 : vector<2x32xf32>
    %927 = math.tanh %926 : vector<2x32xf32>
    %928 = arith.mulf %923, %927 : vector<2x32xf32>
    %cst_227 = arith.constant dense<0.000000e+00> : vector<2xf32>
    %929 = vector.multi_reduction <add>, %928, %cst_227 [1] : vector<2x32xf32> to vector<2xf32>
    %930 = vector.shape_cast %929 : vector<2xf32> to vector<2x1xf32>
    %cst_228 = arith.constant 3.200000e+01 : f32
    %931 = vector.broadcast %cst_228 : f32 to vector<2x1xf32>
    %932 = arith.divf %930, %931 : vector<2x1xf32>
    %933 = vector.broadcast %932 : vector<2x1xf32> to vector<2x32xf32>
    %934 = arith.subf %928, %933 : vector<2x32xf32>
    %935 = arith.mulf %934, %934 : vector<2x32xf32>
    %cst_229 = arith.constant dense<0.000000e+00> : vector<2xf32>
    %936 = vector.multi_reduction <add>, %935, %cst_229 [1] : vector<2x32xf32> to vector<2xf32>
    %937 = vector.shape_cast %936 : vector<2xf32> to vector<2x1xf32>
    %cst_230 = arith.constant 3.200000e+01 : f32
    %938 = vector.broadcast %cst_230 : f32 to vector<2x1xf32>
    %939 = arith.divf %937, %938 : vector<2x1xf32>
    %940 = vector.broadcast %932 : vector<2x1xf32> to vector<2x32xf32>
    %941 = arith.subf %928, %940 : vector<2x32xf32>
    %cst_231 = arith.constant 9.99999974E-6 : f32
    %942 = vector.broadcast %cst_231 : f32 to vector<2x1xf32>
    %943 = arith.addf %939, %942 : vector<2x1xf32>
    %944 = math.rsqrt %943 : vector<2x1xf32>
    %945 = vector.broadcast %944 : vector<2x1xf32> to vector<2x32xf32>
    %946 = arith.mulf %941, %945 : vector<2x32xf32>
    %947 = vector.broadcast %13 : vector<1x32xf32> to vector<2x32xf32>
    %948 = arith.mulf %946, %947 : vector<2x32xf32>
    %949 = vector.broadcast %14 : vector<1x32xf32> to vector<2x32xf32>
    %950 = arith.addf %948, %949 : vector<2x32xf32>
    %951 = math.tanh %950 : vector<2x32xf32>
    %952 = tpu.concatenate %251, %391, %531, %671, %811, %951 in 0 : vector<2x32xf32>, vector<2x32xf32>, vector<2x32xf32>, vector<2x32xf32>, vector<2x32xf32>, vector<2x32xf32> -> vector<12x32xf32>
    %953 = arith.truncf %952 : vector<12x32xf32> to vector<12x32xbf16>
    %c320 = arith.constant 320 : index
    %c0_232 = arith.constant 0 : index
    %954 = vector.load %arg3[%c320, %c0_232] : memref<384x128xbf16, #tpu.memory_space<vmem>>, vector<32x128xbf16>
    %cst_233 = arith.constant dense<0.000000e+00> : vector<12x128xf32>
    %955 = tpu.matmul %953, %954, %cst_233 {dimension_numbers = #tpu.dot_dimension_numbers<[1], [0], [0], [1], [0, 0, 1, 1], [], []>} : vector<12x32xbf16>, vector<32x128xbf16>, vector<12x128xf32> -> vector<12x128xf32>
    %956 = vector.broadcast %15 : vector<1x128xf32> to vector<12x128xf32>
    %957 = arith.addf %955, %956 : vector<12x128xf32>
    %958 = tpu.concatenate %175, %315, %455, %595, %735, %875 in 0 : vector<2x8xf32>, vector<2x8xf32>, vector<2x8xf32>, vector<2x8xf32>, vector<2x8xf32>, vector<2x8xf32> -> vector<12x8xf32>
    %cst_234 = arith.constant 0.000000e+00 : f32
    %959 = vector.broadcast %cst_234 : f32 to vector<12x48xf32>
    %cst_235 = arith.constant 0.000000e+00 : f32
    %960 = vector.broadcast %cst_235 : f32 to vector<12x72xf32>
    %961 = tpu.concatenate %959, %958, %960 in 1 : vector<12x48xf32>, vector<12x8xf32>, vector<12x72xf32> -> vector<12x128xf32>
    %962 = arith.addf %957, %961 : vector<12x128xf32>
    %c0_236 = arith.constant 0 : index
    %c0_237 = arith.constant 0 : index
    %963 = vector.load %arg5[%c0_236, %c0_237] : memref<12x128xf32, #tpu.memory_space<vmem>>, vector<12x128xf32>
    tpu.vector_store %arg5[%c0_236, %c0_237], %962 {strides = array<i32>} : memref<12x128xf32, #tpu.memory_space<vmem>>, vector<12x128xf32>,
    return
  }
}

</mosaic_0001>

<bundles_post_ra>
// kernel: decoder_forward.1
= control target key start
LH: loop header
LB: loop body
LE: loop exit
PB: predicated region body
PF: predicated region fallthrough
CT: control target
= control target key end

     0   :  { %v5447_v1 = vmov 0.0   ;;  %vm4259_vm0 = vmmov 0   ;;  %s4260_s26 = smov 112   ;;  %vm48_vm1 = vcmask 130048   ;;  %s4261_s27 = smov 96   ;;  %v92_v18 = vlaneseq  ;;  %s5438_s2 = inlined_call_operand.vmem [shape: f32[4,128], index: 2, kind: input, shape index: {}]   ;;  %s5439_s3 = inlined_call_operand.vmem [shape: bf16[384,128], index: 3, kind: input, shape index: {}]   ;;  %s5440_s4 = inlined_call_operand.vmem [shape: f32[16,128], index: 4, kind: input, shape index: {}]   ;;  %s5441_s1 = inlined_call_operand.vmem [shape: bf16[16,32], index: 1, kind: input, shape index: {}]   ;;  %s5442_s0 = inlined_call_operand.vmem [shape: bf16[12,32], index: 0, kind: input, shape index: {}]   ;;  %s5443_s5 = inlined_call_operand.vmem [shape: f32[12,128], index: 5, kind: output, shape index: {}]  }
   0x1   :  { %v24_v0 = vld [vmem:[%s5438_s2 + $0x2] sm:$0x3]  ;;  %3701 = vmatprep.subr.bf16.mxu1 %v5447_v1  ;;  %3703 = vmatprep.mubr.msk.bf16.mxu1 %vm4259_vm0, %v5447_v1  ;;  %v4017_v3 = vld [vmem:[%s5439_s3 + $0xb8] sm:$0xff]   ;;  %v4018_v4 = vld [vmem:[%s5439_s3 + $0xb0] sm:$0xff]   ;;  %s4262_s28 = smov 80   ;;  %s4264_s6 = smov 16  }
   0x2   :  { %v39_v2 = vpack.c.bf16 %v24_v0, %v24_v0  ;;  %3695 = vmatprep.subr.bf16.mxu0 %v5447_v1  ;;  %3697 = vmatprep.mubr.msk.bf16.mxu0 %vm4259_vm0, %v5447_v1  ;;  %v23_v5 = vld [vmem:[%s5438_s2] sm:$0x3]  ;;  %s4263_s2 = smov 64   ;;  %v4333_v19 = vshrl.u32 %v92_v18, 7  ;;  %vm181_vm4 = vcmask 254976   ;;  %v4265_v42 = vmov 0  }
   0x3   :  { %3702 = vmatpush3.bf16.msra.mxu1 %v4017_v3  ;;  %3696 = vmatpush3.bf16.msra.mxu0 %v4018_v4  ;;  %v4344_v22 = vld [vmem:[%s5440_s4] sm:$0xff]  ;;  %v4019_v4 = vld [vmem:[%s5439_s3 + $0x70] sm:$0xff]   ;;  %vm261_vm5 = vcmask 261120   ;;  %vm379_vm6 = vcmask 1041408   ;;  %vm381_vm7 = vcmask 1043456   ;;  %vm383_vm8 = vcmask 1045504  }
   0x4   :  { %103 = vrot.lane.b32.xlu0 %v39_v2, %s4260_s26  ;;  %30 = vrot.lane.b32.xlu1 %v23_v5, %s4261_s27  ;;  %v4336_v20 = vsub.s32 0, %v4333_v19  ;;  %v4339_v21 = vsub.s32 1, %v4333_v19  ;;  %v5445_v35 = vsub.s32 4, %v4333_v19  ;;  %v5446_v43 = vsub.s32 5, %v4333_v19  ;;  %s4267_s30 = smov 32  }
   0x5   :  { %3707 = vmatprep.subr.bf16.mxu1 %v5447_v1  ;;  %3723 = vmatprep.subr.bf16.mxu0 %v5447_v1  ;;  %v178_v51 = vsub.s32 2, %v4333_v19  ;;  %v187_v59 = vsub.s32 3, %v4333_v19  ;;  %vm712_vm9 = vcmask 1041409   ;;  %vm715_vm10 = vcmask 58368  }
   0x6   :  { %3698 = vmatmul.mubr.msk.bf16.vlgmr.msra.gmra.mrb[0].mxu0 %vm48_vm1, %v39_v2  ;;  %v95_v23 = vrot.slane %v4344_v22, %v4336_v20  ;;  %v157_v24 = vrot.slane %v4344_v22, %v4339_v21  ;;  %v199_v36 = vrot.slane %v4344_v22, %v5445_v35  ;;  %4015 = vset.pattern.permute.xlu1 %v4265_v42  ;;  %vm783_vm11 = vcmask 523520  }
   0x7   :  { %3727 = vmatprep.mubr.msk.bf16.mxu0 %vm4259_vm0, %v5447_v1  ;;  %4016 = vset.pattern.permute.xlu0 %v4265_v42  ;;  %v207_v44 = vrot.slane %v4344_v22, %v5446_v43  ;;  %v179_v53 = vrot.slane %v4344_v22, %v178_v51  ;;  %v188_v60 = vrot.slane %v4344_v22, %v187_v59  ;;  %vm485_vm12 = vcmask 523264  }
   0x8   :  { %26 = vrot.lane.b32.xlu0 %v23_v5, %s4260_s26  ;;  %34 = vrot.lane.b32.xlu1 %v23_v5, %s4262_s28  ;;  %vm950_vm13 = vcmask 785408   ;;  %vm1141_vm14 = vcmask 257026   ;;  %vm1597_vm15 = vcmask 259076  }
  0x76   :  { %v104_v6 = vpop.permute.xlu0 %103  ;;  %v31_v8 = vpop.permute.xlu1 %30 }
  0x77   :  { %3704 = vmatmul.mubr.msk.bf16.vlgmr.msra.gmra.mrb[0].mxu1 %vm48_vm1, %v104_v6  ;;  %v4023_v6 = vld [vmem:[%s5439_s3 + $0x10] sm:$0xff]  }
  0x78   :  { %3711 = vmatprep.mubr.msk.bf16.mxu1 %vm4259_vm0, %v5447_v1  ;;  %3708 = vmatpush3.bf16.msra.mxu1 %v4019_v4 }
  0x79   :  { %3709 = vmatprep.subr.bf16.mxu1 %v5447_v1  ;;  %3724 = vmatpush3.bf16.msra.mxu0 %v4023_v6 }
  0x7a   :  { %v27_v7 = vpop.permute.xlu0 %26  ;;  %v35_v11 = vpop.permute.xlu1 %34  ;;  %3725 = vmatprep.subr.bf16.mxu0 %v5447_v1 }
  0x7b   :  { %v29_v9 = vadd.f32 %v27_v7, %v23_v5  ;;  %v4020_v5 = vld [vmem:[%s5439_s3 + $0x78] sm:$0xff]   ;;  %v4021_v7 = vld [vmem:[%s5441_s1] sm:$0xff]  }
  0x7c   :  { %3710 = vmatpush3.bf16.msra.mxu1 %v4020_v5 }
  0x7d   :  { %v33_v10 = vadd.f32 %v31_v8, %v29_v9  ;;  %v4022_v8 = vld [vmem:[%s5439_s3] sm:$0xff]   ;;  %3715 = vmatprep.subr.bf16.mxu1 %v5447_v1  ;;  %v4024_v9 = vld [vmem:[%s5439_s3 + $0x8] sm:$0xff]  }
  0x7f   :  { %v37_v12 = vadd.f32 %v35_v11, %v33_v10  ;;  %3712 = vmatmul.mubr.msk.bf16.vlgmr.msra.gmra.mrb[4].mxu1 %vm261_vm5, %v4021_v7  ;;  %v4025_v10 = vld [vmem:[%s5439_s3 + $0x18] sm:$0xff]   ;;  %v4027_v11 = vld [vmem:[%s5442_s0] sm:$0x3f]  }
  0x80   :  { %3716 = vmatpush3.bf16.msra.mxu1 %v4022_v8  ;;  %3719 = vmatprep.mubr.msk.bf16.mxu1 %vm4259_vm0, %v5447_v1 }
  0x81   :  { %v4328_v13 = vmul.f32 0.25, %v37_v12  ;;  %3717 = vmatprep.subr.bf16.mxu1 %v5447_v1  ;;  %3726 = vmatpush3.bf16.msra.mxu0 %v4025_v10 }
  0x82   :  { %3743 = vmatprep.subr.bf16.mxu0 %v5447_v1 }
  0x83   :  { %168 = vrot.lane.b32.xlu0 %v4328_v13, %s4263_s2 }
  0x84   :  { %3718 = vmatpush3.bf16.msra.mxu1 %v4024_v9  ;;  %3728 = vmatmul.mubr.msk.bf16.vlgmr.msra.gmra.mrb[4].mxu0 %vm261_vm5, %v4027_v11 }
  0x85   :  { %3731 = vmatprep.subr.bf16.mxu1 %v5447_v1  ;;  %3747 = vmatprep.mubr.msk.bf16.mxu0 %vm4259_vm0, %v5447_v1 }
  0xd9   :  { %v86_v14 = vpop.f32.mrb[0].mxu0 }
  0xda   :  { %v3699_v15 = vpop.f32.mrb[1].mxu0  ;;  %v96_v25 = vadd.f32 %v95_v23, %v86_v14 }
  0xdb   :  { %v89_v16 = vpop.f32.mrb[2].mxu0 }
  0xdc   :  { %v3700_v17 = vpop.f32.mrb[3].mxu0  ;;  %v98_v32 = vmul.f32 0.2, %v96_v25  ;;  %vm97_vm3 = vcmp.gt.f32.partialorder %v96_v25, 0.0 }
  0xde   :  { %v4350_v34 = vsel %vm97_vm3, %v96_v25, %v98_v32  ;;  %v4419_v25 = vld [vmem:[%s5439_s3 + $0x20] sm:$0xff]   ;;  %vm3453_vm3 = vcmask 1047559  }
  0xf5   :  { %v169_v37 = vpop.permute.xlu0 %168 }
 0x14a   :  { %v148_v26 = vpop.f32.mrb[0].mxu1 }
 0x14b   :  { %v158_v27 = vadd.f32 %v157_v24, %v148_v26  ;;  %v3705_v28 = vpop.f32.mrb[1].mxu1 }
 0x14c   :  { %v151_v29 = vpop.f32.mrb[2].mxu1  ;;  %v4442_v28 = vld [vmem:[%s5439_s3 + $0x38] sm:$0xff]  }
 0x14d   :  { %v160_v30 = vmul.f32 0.2, %v158_v27  ;;  %v3706_v31 = vpop.f32.mrb[3].mxu1  ;;  %vm159_vm2 = vcmp.gt.f32.partialorder %v158_v27, 0.0  ;;  %v4266_v29 = vmov 0.0|0.0  }
 0x14f   :  { %v161_v33 = vsel %vm159_vm2, %v158_v27, %v160_v30  ;;  %v4426_v27 = vld [vmem:[%s5439_s3 + $0x28] sm:$0xff]   ;;  %vm3431_vm2 = vcmask 1043459  }
 0x150   :  { %172 = vrot.lane.b32.xlu1 %v161_v33, %s4264_s6 }
 0x152   :  { %v4449_v30 = vpop.f32.mrb[4].mxu1 }
 0x153   :  { %v3713_v31 = vpop.f32.mrb[5].mxu1 }
 0x154   :  { %163 = vrot.lane.b32.xlu1 %v4350_v34, %s4264_s6  ;;  %v4451_v32 = vpop.f32.mrb[6].mxu1 }
 0x1c2   :  { %v173_v38 = vpop.permute.xlu1 %172 }
 0x1c3   :  { %v175_v39 = vsel %vm48_vm1, %v169_v37, %v173_v38 }
 0x1c4   :  { %v200_v40 = vmul.f32 %v199_v36, %v175_v39  ;;  %v5444_v39 = vsub.s32 6, %v4333_v19 }
 0x1c6   :  { %v201_v41 = vsel %vm181_vm4, %v200_v40, 0.0  ;;  %v164_v52 = vpop.permute.xlu1 %163 }
 0x1c7   :  { %202 = vadd.xlane.f32.xlu0 %v201_v41  ;;  %v166_v54 = vsel %vm48_vm1, %v4328_v13, %v164_v52 }
 0x1c8   :  { %v180_v55 = vmul.f32 %v179_v53, %v166_v54 }
 0x1ca   :  { %v182_v56 = vsel %vm181_vm4, %v180_v55, 0.0 }
 0x254   :  { %v203_v45 = vpop.xlane.xlu0 %202 }
 0x255   :  { %v208_v46 = vadd.f32 %v207_v44, %v203_v45  ;;  %v449_v45 = vrot.slane %v4344_v22, %v5444_v39 }
 0x257   :  { %v3507_v47 = vmul.f32 -1.442695, %v208_v46 }
 0x259   :  { %4043 = vpow2.f32 %v3507_v47 }
 0x263   :  { %v4044_v48 = vpop.eup %4043 }
 0x264   :  { %v212_v49 = vadd.f32 1.0, %v4044_v48 }
 0x266   :  { %4045 = vrcp.f32 %v212_v49 }
 0x270   :  { %v4046_v50 = vpop.eup %4045 }
 0x271   :  { %224 = vperm.xlu1 %4015, %v4046_v50  }
 0x295   :  { %183 = vadd.xlane.f32.xlu1 %v182_v56 }
 0x2f0   :  { %v225_v57 = vpop.permute.xlu1 %224 }
 0x2f1   :  { %v227_v58 = vmul.f32 %v225_v57, %v161_v33  ;;  %v3714_v33 = vpop.f32.mrb[7].mxu1 }
 0x2f3   :  { %229 = vrot.lane.b32.xlu0 %v227_v58, %s4263_s2 }
 0x322   :  { %v184_v61 = vpop.xlane.xlu1 %183 }
 0x323   :  { %v189_v62 = vadd.f32 %v188_v60, %v184_v61 }
 0x325   :  { %v3506_v63 = vmul.f32 -1.442695, %v189_v62 }
 0x327   :  { %4047 = vpow2.f32 %v3506_v63 }
 0x331   :  { %v4048_v0 = vpop.eup %4047 }
 0x332   :  { %v193_v2 = vadd.f32 1.0, %v4048_v0 }
 0x334   :  { %4049 = vrcp.f32 %v193_v2 }
 0x33e   :  { %v4050_v3 = vpop.eup %4049 }
 0x33f   :  { %217 = vperm.xlu1 %4015, %v4050_v3  }
 0x365   :  { %v230_v12 = vpop.permute.xlu0 %229 }
 0x366   :  { %v232_v14 = vadd.f32 %v230_v12, %v4328_v13 }
 0x368   :  { %234 = vrot.lane.b32.xlu0 %v232_v14, %s4262_s28 }
 0x3be   :  { %v218_v15 = vpop.permute.xlu1 %217 }
 0x3bf   :  { %v220_v16 = vmul.f32 %v218_v15, %v4350_v34  ;;  %v439_v34 = vpop.f32.mrb[4].mxu0 }
 0x3c0   :  { %v3729_v36 = vpop.f32.mrb[5].mxu0 }
 0x3c1   :  { %v221_v17 = vadd.f32 %v220_v16, %v4328_v13  ;;  %v4435_v13 = vld [vmem:[%s5439_s3 + $0x30] sm:$0xff]   ;;  %v442_v37 = vpop.f32.mrb[6].mxu0  ;;  %v578_v16 = vsub.s32 7, %v4333_v19  ;;  %v4493_v36 = vld [vmem:[%s5439_s3 + $0x80] sm:$0xff]  }
 0x3c2   :  { %v3730_v38 = vpop.f32.mrb[7].mxu0  ;;  %3744 = vmatpush3.bf16.msra.mxu0 %v4493_v36 }
 0x3c3   :  { %3745 = vmatprep.subr.bf16.mxu0 %v5447_v1 }
 0x3da   :  { %v235_v23 = vpop.permute.xlu0 %234 }
 0x3db   :  { %v237_v24 = vsel %vm48_vm1, %v221_v17, %v235_v23  ;;  %v579_v17 = vrot.slane %v4344_v22, %v578_v16  ;;  %vm2053_vm1 = vcmask 261126  }
 0x3dc   :  { %v306_v26 = vpack.c.bf16 %v237_v24, %v237_v24 }
 0x3de   :  { %3720 = vmatmul.mubr.msk.bf16.vlgmr.msra.gmra.mrb[8].mxu1 %vm261_vm5, %v306_v26 }
 0x3df   :  { %3732 = vmatpush3.bf16.msra.mxu1 %v4419_v25  ;;  %3739 = vmatprep.mubr.msk.bf16.mxu1 %vm4259_vm0, %v5447_v1 }
 0x3e0   :  { %3733 = vmatprep.subr.bf16.mxu1 %v5447_v1 }
 0x3e3   :  { %3734 = vmatpush3.bf16.msra.mxu1 %v4426_v27 }
 0x3e4   :  { %3735 = vmatprep.subr.bf16.mxu1 %v5447_v1 }
 0x3e7   :  { %3736 = vmatpush3.bf16.msra.mxu1 %v4435_v13 }
 0x3e8   :  { %3737 = vmatprep.subr.bf16.mxu1 %v5447_v1 }
 0x3eb   :  { %3738 = vmatpush3.bf16.msra.mxu1 %v4442_v28 }
 0x3ec   :  { %3759 = vmatprep.subr.bf16.mxu1 %v5447_v1 }
 0x3ee   :  { %3740 = vmatmul.mubr.bf16.vlgmr.msra.gmra.mrb[12].mxu1 %v4266_v29 }
 0x3ef   :  { %3771 = vmatprep.mubr.msk.bf16.mxu1 %vm4259_vm0, %v5447_v1 }
 0x4b1   :  { %v360_v40 = vpop.f32.mrb[8].mxu1 }
 0x4b2   :  { %v373_v41 = vrot.slane %v360_v40, 6  ;;  %v375_v42 = vrot.slane %v360_v40, 4  ;;  %v3721_v44 = vpop.f32.mrb[9].mxu1  ;;  %v377_v47 = vrot.slane %v360_v40, 2 }
 0x4b3   :  { %v363_v46 = vpop.f32.mrb[10].mxu1 }
 0x4b4   :  { %v380_v48 = vsel %vm379_vm6, %v360_v40, %v373_v41  ;;  %v3722_v49 = vpop.f32.mrb[11].mxu1 }
 0x4b5   :  { %v382_v50 = vsel %vm381_vm7, %v380_v48, %v375_v42  ;;  %v443_v52 = vadd.f32 %v442_v37, %v380_v48  ;;  %v4499_v37 = vld [vmem:[%s5439_s3 + $0x88] sm:$0xff]  }
 0x4b6   :  { %v384_v53 = vsel %vm383_vm8, %v382_v50, %v377_v47  ;;  %3746 = vmatpush3.bf16.msra.mxu0 %v4499_v37 }
 0x4b7   :  { %v440_v54 = vadd.f32 %v439_v34, %v384_v53  ;;  %v4460_v55 = vadd.f32 %v449_v45, %v443_v52  ;;  %v4485_v34 = vld [vmem:[%s5440_s4 + $0x8] sm:$0xff]  ;;  %3751 = vmatprep.subr.bf16.mxu0 %v5447_v1  ;;  %v4268_v52 = vmov 1966171168  }
 0x4b8   :  { %v588_v22 = vrot.slane %v4485_v34, %v4336_v20  ;;  %v659_v53 = vunpack.c.l.s4 %v4268_v52 }
 0x4b9   :  { %v4462_v56 = vadd.f32 %v449_v45, %v440_v54 }
 0x4ba   :  { %v660_v54 = vunpack.c.0.s8 %v659_v53 }
 0x4c1   :  { %v523_v57 = vpop.f32.mrb[12].mxu1 }
 0x4c2   :  { %v529_v58 = vadd.f32 %v523_v57, %v4462_v56  ;;  %v3741_v60 = vpop.f32.mrb[13].mxu1  ;;  %v4519_v57 = vsub.s32 %v660_v54, %v4333_v19 }
 0x4c3   :  { %v526_v61 = vpop.f32.mrb[14].mxu1 }
 0x4c4   :  { %4051 = vtanh.f32 %v529_v58  ;;  %v3742_v62 = vpop.f32.mrb[15].mxu1  ;;  %v3523_v0 = vmul.f32 -1.442695, %v529_v58 }
 0x4c6   :  { %4053 = vpow2.f32 %v3523_v0 }
 0x4ce   :  { %v4052_v63 = vpop.eup %4051 }
 0x4cf   :  { %539 = vrot.lane.b32.xlu0 %v4052_v63, %s4267_s30 }
 0x4d0   :  { %v4054_v2 = vpop.eup %4053 }
 0x4d1   :  { %v533_v3 = vadd.f32 1.0, %v4054_v2 }
 0x4d3   :  { %4055 = vrcp.f32 %v533_v3 }
 0x4dd   :  { %v4056_v4 = vpop.eup %4055 }
 0x4de   :  { %v537_v7 = vmul.f32 0.0, %v4056_v4 }
 0x541   :  { %v540_v5 = vpop.permute.xlu0 %539 }
 0x542   :  { %v542_v6 = vmul.f32 %v4056_v4, %v540_v5 }
 0x544   :  { %544 = vrot.lane.b32.xlu0 %v542_v6, %s4267_s30 }
 0x5b6   :  { %v545_v8 = vpop.permute.xlu0 %544 }
 0x5b7   :  { %v4467_v9 = vadd.f32 %v545_v8, %v537_v7 }
 0x5b9   :  { %4057 = vtanh.f32 %v4467_v9 }
 0x5c3   :  { %v4058_v10 = vpop.eup %4057 }
 0x5c4   :  { %550 = vrot.lane.b32.xlu1 %v4058_v10, %s4267_s30 }
 0x636   :  { %v551_v11 = vpop.permute.xlu1 %550 }
 0x637   :  { %v4471_v12 = vmul.f32 %v4056_v4, %v551_v11  ;;  %v703_v11 = vand.u32 127, %v92_v18 }
 0x639   :  { %555 = vrot.lane.b32.xlu0 %v4471_v12, %s4263_s2 }
 0x6ab   :  { %v556_v14 = vpop.permute.xlu0 %555 }
 0x6ac   :  { %v558_v15 = vsel %vm181_vm4, %v556_v14, 0.0 }
 0x6ad   :  { %559 = vadd.xlane.f32.xlu1 %v558_v15  ;;  %v4532_v15 = vsub.s32 %v703_v11, %v4333_v19 }
 0x6be   :  { %581 = vrot.lane.b32.xlu1 %v579_v17, %s4263_s2 }
 0x73a   :  { %v560_v23 = vpop.xlane.xlu1 %559 }
 0x73b   :  { %v562_v24 = vmul.f32 0.03125, %v560_v23 }
 0x73d   :  { %v563_v26 = vsub.f32 %v4471_v12, %v562_v24 }
 0x73e   :  { %v4504_v44 = vpop.permute.xlu1 %581 }
 0x73f   :  { %v564_v29 = vmul.f32 %v563_v26, %v563_v26 }
 0x741   :  { %566 = vrot.lane.b32.xlu0 %v564_v29, %s4263_s2 }
 0x7b3   :  { %v567_v31 = vpop.permute.xlu0 %566 }
 0x7b4   :  { %v569_v33 = vsel %vm181_vm4, %v567_v31, 0.0 }
 0x7b5   :  { %570 = vadd.xlane.f32.xlu0 %v569_v33 }
 0x7cb   :  { %590 = vrot.lane.b32.xlu0 %v588_v22, %s4263_s2 }
 0x842   :  { %v571_v38 = vpop.xlane.xlu0 %570 }
 0x843   :  { %v572_v40 = vmul.f32 0.03125, %v571_v38 }
 0x845   :  { %v573_v41 = vadd.f32 1e-05, %v572_v40 }
 0x846   :  { %v4506_v46 = vpop.permute.xlu0 %590 }
 0x847   :  { %4059 = vrsqrt.f32 %v573_v41 }
 0x851   :  { %v4060_v42 = vpop.eup %4059 }
 0x852   :  { %v575_v45 = vmul.f32 %v4060_v42, %v563_v26 }
 0x854   :  { %v584_v47 = vmul.f32 %v4504_v44, %v575_v45 }
 0x856   :  { %v4510_v48 = vadd.f32 %v4506_v46, %v584_v47 }
 0x858   :  { %v594_v49 = vpack.c.bf16 %v4510_v48, %v4510_v48 }
 0x85a   :  { %600 = vrot.lane.b32.xlu1 %v594_v49, %s4263_s2 }
 0x8cc   :  { %v601_v50 = vpop.permute.xlu1 %600 }
 0x8cd   :  { %3748 = vmatmul.mubr.msk.bf16.vlgmr.msra.gmra.mrb[8].mxu0 %vm261_vm5, %v601_v50 }
 0x8ce   :  { %3755 = vmatprep.mubr.msk.bf16.mxu0 %vm4259_vm0, %v5447_v1 }
 0x9a0   :  { %v651_v58 = vpop.f32.mrb[8].mxu0 }
 0x9a1   :  { %v664_v60 = vrot.slane %v651_v58, %v4519_v57  ;;  %v3749_v61 = vpop.f32.mrb[9].mxu0 }
 0x9a2   :  { %v654_v62 = vpop.f32.mrb[10].mxu0 }
 0x9a3   :  { %v665_v63 = vcombine.high %v664_v60, %v664_v60  ;;  %v672_v0 = vrot.slane %v664_v60, %v4519_v57  ;;  %v3750_v2 = vpop.f32.mrb[11].mxu0 }
 0x9a5   :  { %v679_v3 = vrot.slane %v665_v63, %v4519_v57  ;;  %v683_v4 = vrot.slane %v672_v0, %v4336_v20 }
 0x9a7   :  { %v690_v5 = vmul.f32 %v683_v4, %v4449_v30  ;;  %v687_v6 = vrot.slane %v679_v3, %v4336_v20  ;;  %v4549_v3 = vld [vmem:[%s5439_s3 + $0x90] sm:$0xff]   ;;  %v4555_v4 = vld [vmem:[%s5439_s3 + $0x98] sm:$0xff]  }
 0x9a8   :  { %3752 = vmatpush3.bf16.msra.mxu0 %v4549_v3 }
 0x9a9   :  { %v692_v7 = vsel %vm261_vm5, %v690_v5, 0.0  ;;  %v691_v8 = vmul.f32 %v687_v6, %v4451_v32  ;;  %3753 = vmatprep.subr.bf16.mxu0 %v5447_v1 }
 0x9aa   :  { %693 = vadd.xlane.f32.xlu1 %v692_v7 }
 0x9ab   :  { %v695_v10 = vsel %vm261_vm5, %v691_v8, 0.0 }
 0x9ac   :  { %696 = vadd.xlane.f32.xlu0 %v695_v10  ;;  %3754 = vmatpush3.bf16.msra.mxu0 %v4555_v4 }
 0x9ad   :  { %3775 = vmatprep.subr.bf16.mxu0 %v5447_v1 }
 0xa37   :  { %v694_v14 = vpop.xlane.xlu1 %693 }
 0xa38   :  { %v698_v16 = vmul.f32 0.17677669, %v694_v14 }
 0xa39   :  { %v697_v17 = vpop.xlane.xlu0 %696 }
 0xa3a   :  { %v699_v23 = vmul.f32 0.17677669, %v697_v17  ;;  %v707_v24 = vrot.slane %v698_v16, %v4532_v15 }
 0xa3c   :  { %v711_v26 = vrot.slane %v699_v23, %v4532_v15 }
 0xa3e   :  { %v713_v29 = vsel %vm712_vm9, %v711_v26, %v707_v24 }
 0xa3f   :  { %v716_v31 = vsel %vm715_vm10, %v713_v29, -inf }
 0xa40   :  { %717 = vmax.xlane.f32.xlu0 %v716_v31 }
 0xacd   :  { %v718_v33 = vpop.xlane.xlu0 %717 }
 0xace   :  { %v723_v18 = vrot.slane %v718_v33, %v4336_v20  ;;  %v727_v22 = vrot.slane %v718_v33, %v4339_v21 }
 0xad0   :  { %v730_v38 = vsub.f32 %v698_v16, %v723_v18  ;;  %v731_v40 = vsub.f32 %v699_v23, %v727_v22 }
 0xad2   :  { %v732_v41 = vmul.f32 1.442695, %v730_v38  ;;  %v734_v42 = vmul.f32 1.442695, %v731_v40 }
 0xad4   :  { %4061 = vpow2.f32 %v732_v41 }
 0xad5   :  { %4063 = vpow2.f32 %v734_v42 }
 0xade   :  { %v4062_v45 = vpop.eup %4061 }
 0xadf   :  { %v4064_v47 = vpop.eup %4063  ;;  %739 = vperm.xlu1 %4015, %v4062_v45  }
 0xae0   :  { %742 = vperm.xlu0 %4016, %v4064_v47  }
 0xb5e   :  { %v740_v49 = vpop.permute.xlu1 %739 }
 0xb5f   :  { %v743_v50 = vpop.permute.xlu0 %742  ;;  %v747_v52 = vrot.slane %v740_v49, %v4532_v15 }
 0xb60   :  { %v751_v53 = vrot.slane %v743_v50, %v4532_v15 }
 0xb62   :  { %v752_v54 = vsel %vm712_vm9, %v751_v53, %v747_v52 }
 0xb63   :  { %v754_v58 = vsel %vm715_vm10, %v752_v54, 0.0 }
 0xb64   :  { %755 = vadd.xlane.f32.xlu1 %v754_v58 }
 0xbf1   :  { %v756_v60 = vpop.xlane.xlu1 %755 }
 0xbf2   :  { %4065 = vrcp.f32 %v756_v60 }
 0xbfc   :  { %v4066_v61 = vpop.eup %4065 }
 0xbfd   :  { %v762_v62 = vrot.slane %v4066_v61, %v4336_v20  ;;  %v766_v0 = vrot.slane %v4066_v61, %v4339_v21 }
 0xbff   :  { %v769_v63 = vmul.f32 %v4062_v45, %v762_v62  ;;  %v770_v2 = vmul.f32 %v4064_v47, %v766_v0 }
 0xc01   :  { %773 = vperm.xlu0 %4016, %v769_v63  }
 0xc05   :  { %778 = vperm.xlu0 %4016, %v770_v2  }
 0xc80   :  { %v4560_v5 = vpop.permute.xlu0 %773 }
 0xc81   :  { %5456 = vst [vmem:[#allocation2_spill] sm:$0xff] %v4560_v5  ;;  %v781_v6 = vmul.f32 %v4560_v5, %v4449_v30 }
 0xc83   :  { %v784_v7 = vsel %vm783_vm11, %v781_v6, 0.0 }
 0xc84   :  { %v785_v8 = vrot.slane %v784_v7, 4  ;;  %v4565_v10 = vpop.permute.xlu0 %778 }
 0xc85   :  { %5457 = vst [vmem:[#allocation3_spill] sm:$0xff] %v4565_v10  ;;  %v782_v11 = vmul.f32 %v4565_v10, %v4451_v32 }
 0xc86   :  { %v786_v14 = vadd.f32 %v785_v8, %v784_v7  ;;  %v4590_v7 = vld [vmem:[%s5439_s3 + $0x40] sm:$0xff]   ;;  %v4604_v8 = vld [vmem:[%s5439_s3 + $0x50] sm:$0xff]  }
 0xc87   :  { %v791_v16 = vsel %vm783_vm11, %v782_v11, 0.0  ;;  %3760 = vmatpush3.bf16.msra.mxu1 %v4590_v7  ;;  %v4611_v11 = vld [vmem:[%s5439_s3 + $0x58] sm:$0xff]  }
 0xc88   :  { %v787_v17 = vrot.slane %v786_v14, 2  ;;  %v792_v23 = vrot.slane %v791_v16, 4  ;;  %3761 = vmatprep.subr.bf16.mxu1 %v5447_v1 }
 0xc8a   :  { %v788_v24 = vadd.f32 %v787_v17, %v786_v14  ;;  %v793_v26 = vadd.f32 %v792_v23, %v791_v16  ;;  %v4618_v14 = vld [vmem:[%s5439_s3 + $0x60] sm:$0xff]   ;;  %v4624_v16 = vld [vmem:[%s5439_s3 + $0x68] sm:$0xff]  }
 0xc8c   :  { %v789_v29 = vrot.slane %v788_v24, 1  ;;  %v794_v31 = vrot.slane %v793_v26, 2 }
 0xc8e   :  { %v795_v33 = vadd.f32 %v794_v31, %v793_v26  ;;  %v790_v18 = vadd.f32 %v789_v29, %v788_v24  ;;  %v4631_v26 = vrot.slane %v4485_v34, %v4339_v21  ;;  %v4636_v31 = vrot.slane %v4485_v34, %v178_v51 }
 0xc8f   :  { %v4652_v51 = vrot.slane %v4485_v34, %v187_v59 }
 0xc90   :  { %v796_v22 = vrot.slane %v795_v33, 1  ;;  %v798_v40 = vpack.c.bf16 %v790_v18, %v790_v18 }
 0xc92   :  { %v797_v38 = vadd.f32 %v796_v22, %v795_v33  ;;  %v806_v42 = vunpack.c.l.b16 %v798_v40 }
 0xc94   :  { %v799_v41 = vpack.c.bf16 %v797_v38, %v797_v38 }
 0xc96   :  { %v807_v45 = vunpack.c.l.b16 %v799_v41 }
 0xc98   :  { %v808_v47 = vsel %vm712_vm9, %v807_v45, %v806_v42 }
 0xc99   :  { %v809_v49 = vpack.c.b16 %v808_v47, %v808_v47 }
 0xc9b   :  { %810 = vrot.lane.b32.xlu1 %v809_v49, %s4261_s27 }
 0xd0d   :  { %v811_v50 = vpop.permute.xlu1 %810 }
 0xd0e   :  { %3756 = vmatmul.mubr.msk.bf16.vlgmr.msra.gmra.mrb[12].mxu0 %vm261_vm5, %v811_v50 }
 0xd0f   :  { %3776 = vmatpush3.bf16.msra.mxu0 %v4419_v25  ;;  %3783 = vmatprep.mubr.msk.bf16.mxu0 %vm4259_vm0, %v5447_v1 }
 0xd10   :  { %3777 = vmatprep.subr.bf16.mxu0 %v5447_v1 }
 0xd13   :  { %3778 = vmatpush3.bf16.msra.mxu0 %v4426_v27 }
 0xd14   :  { %3779 = vmatprep.subr.bf16.mxu0 %v5447_v1 }
 0xd17   :  { %3780 = vmatpush3.bf16.msra.mxu0 %v4435_v13 }
 0xd18   :  { %3781 = vmatprep.subr.bf16.mxu0 %v5447_v1 }
 0xd1b   :  { %3782 = vmatpush3.bf16.msra.mxu0 %v4442_v28 }
 0xd1c   :  { %3787 = vmatprep.subr.bf16.mxu0 %v5447_v1 }
 0xde1   :  { %v861_v52 = vpop.f32.mrb[12].mxu0 }
 0xde2   :  { %4067 = vtanh.f32 %v861_v52  ;;  %v3757_v53 = vpop.f32.mrb[13].mxu0 }
 0xde3   :  { %v864_v54 = vpop.f32.mrb[14].mxu0 }
 0xde4   :  { %v3758_v58 = vpop.f32.mrb[15].mxu0 }
 0xdec   :  { %v4068_v60 = vpop.eup %4067 }
 0xded   :  { %v868_v61 = vsel %vm181_vm4, %v4068_v60, 0.0 }
 0xdee   :  { %869 = vadd.xlane.f32.xlu0 %v868_v61 }
 0xe04   :  { %892 = vrot.lane.b32.xlu0 %v4510_v48, %s4261_s27  ;;  %v4597_v48 = vld [vmem:[%s5439_s3 + $0x48] sm:$0xff]  }
 0xe05   :  { %3762 = vmatpush3.bf16.msra.mxu1 %v4597_v48 }
 0xe06   :  { %3763 = vmatprep.subr.bf16.mxu1 %v5447_v1 }
 0xe09   :  { %3764 = vmatpush3.bf16.msra.mxu1 %v4604_v8 }
 0xe0a   :  { %3765 = vmatprep.subr.bf16.mxu1 %v5447_v1 }
 0xe0d   :  { %3766 = vmatpush3.bf16.msra.mxu1 %v4611_v11 }
 0xe0e   :  { %3767 = vmatprep.subr.bf16.mxu1 %v5447_v1 }
 0xe11   :  { %3768 = vmatpush3.bf16.msra.mxu1 %v4618_v14 }
 0xe12   :  { %3769 = vmatprep.subr.bf16.mxu1 %v5447_v1 }
 0xe15   :  { %3770 = vmatpush3.bf16.msra.mxu1 %v4624_v16 }
 0xe16   :  { %3795 = vmatprep.subr.bf16.mxu1 %v5447_v1 }
 0xe7b   :  { %v870_v62 = vpop.xlane.xlu0 %869 }
 0xe7c   :  { %v871_v63 = vmul.f32 0.03125, %v870_v62 }
 0xe7e   :  { %v872_v0 = vsub.f32 %v4068_v60, %v871_v63 }
 0xe7f   :  { %v893_v38 = vpop.permute.xlu0 %892 }
 0xe80   :  { %v873_v2 = vmul.f32 %v872_v0, %v872_v0 }
 0xe82   :  { %v874_v6 = vsel %vm181_vm4, %v873_v2, 0.0 }
 0xe83   :  { %875 = vadd.xlane.f32.xlu1 %v874_v6 }
 0xf10   :  { %v876_v17 = vpop.xlane.xlu1 %875 }
 0xf11   :  { %v877_v23 = vmul.f32 0.03125, %v876_v17 }
 0xf13   :  { %v878_v24 = vadd.f32 1e-05, %v877_v23 }
 0xf15   :  { %4069 = vrsqrt.f32 %v878_v24 }
 0xf1f   :  { %v4070_v29 = vpop.eup %4069 }
 0xf20   :  { %v880_v33 = vmul.f32 %v4070_v29, %v872_v0 }
 0xf22   :  { %v885_v18 = vmul.f32 %v4631_v26, %v880_v33 }
 0xf24   :  { %v890_v22 = vadd.f32 %v4636_v31, %v885_v18 }
 0xf26   :  { %v895_v40 = vsel %vm261_vm5, %v890_v22, %v893_v38 }
 0xf27   :  { %v896_v41 = vsel %vm485_vm12, %v895_v40, 0.0 }
 0xf28   :  { %v897_v42 = vpack.c.bf16 %v896_v41, %v896_v41 }
 0xf2a   :  { %3772 = vmatmul.mubr.msk.bf16.vlgmr.msra.gmra.mrb[16].mxu1 %vm950_vm13, %v897_v42 }
 0xf2b   :  { %3796 = vmatpush3.bf16.msra.mxu1 %v4549_v3  ;;  %3799 = vmatprep.mubr.msk.bf16.mxu1 %vm4259_vm0, %v5447_v1 }
 0xf2c   :  { %3797 = vmatprep.subr.bf16.mxu1 %v5447_v1 }
 0xf2f   :  { %3798 = vmatpush3.bf16.msra.mxu1 %v4555_v4 }
 0xf30   :  { %3819 = vmatprep.subr.bf16.mxu1 %v5447_v1 }
 0xffd   :  { %v988_v45 = vpop.f32.mrb[16].mxu1 }
 0xffe   :  { %v989_v47 = vadd.f32 %v988_v45, %v4652_v51  ;;  %v3773_v49 = vpop.f32.mrb[17].mxu1 }
 0xfff   :  { %v991_v50 = vpop.f32.mrb[18].mxu1 }
0x1000   :  { %4071 = vtanh.f32 %v989_v47  ;;  %v3774_v52 = vpop.f32.mrb[19].mxu1  ;;  %v3537_v54 = vmul.f32 -1.442695, %v989_v47 }
0x1002   :  { %4073 = vpow2.f32 %v3537_v54  ;;  %v1118_v54 = vrot.slane %v4467_v9, 6 }
0x100a   :  { %v4072_v53 = vpop.eup %4071 }
0x100b   :  { %1003 = vrot.lane.b32.xlu1 %v4072_v53, %s4267_s30 }
0x100c   :  { %v4074_v58 = vpop.eup %4073 }
0x100d   :  { %v997_v60 = vadd.f32 1.0, %v4074_v58 }
0x100f   :  { %4075 = vrcp.f32 %v997_v60 }
0x1019   :  { %v4076_v61 = vpop.eup %4075 }
0x101a   :  { %v1001_v59 = vmul.f32 0.0, %v4076_v61 }
0x107d   :  { %v1004_v62 = vpop.permute.xlu1 %1003 }
0x107e   :  { %v1006_v63 = vmul.f32 %v4076_v61, %v1004_v62 }
0x1080   :  { %1008 = vrot.lane.b32.xlu0 %v1006_v63, %s4267_s30 }
0x10f2   :  { %v1009_v34 = vpop.permute.xlu0 %1008 }
0x10f3   :  { %v4657_v0 = vadd.f32 %v1009_v34, %v1001_v59 }
0x10f5   :  { %4077 = vtanh.f32 %v4657_v0 }
0x10ff   :  { %v4078_v2 = vpop.eup %4077 }
0x1100   :  { %1014 = vrot.lane.b32.xlu0 %v4078_v2, %s4267_s30 }
0x1172   :  { %v1015_v6 = vpop.permute.xlu0 %1014 }
0x1173   :  { %v4661_v17 = vmul.f32 %v4076_v61, %v1015_v6 }
0x1175   :  { %1019 = vrot.lane.b32.xlu0 %v4661_v17, %s4263_s2 }
0x1179   :  { %1058 = vrot.lane.b32.xlu0 %v4471_v12, %s4261_s27 }
0x11e7   :  { %v4667_v23 = vpop.permute.xlu0 %1019 }
0x11eb   :  { %v1059_v24 = vpop.permute.xlu0 %1058 }
0x11ec   :  { %v1061_v29 = vsel %vm261_vm5, %v4667_v23, %v1059_v24 }
0x11ed   :  { %v1062_v33 = vpack.c.bf16 %v1061_v29, %v1061_v29 }
0x11ef   :  { %3784 = vmatmul.mubr.msk.bf16.vlgmr.msra.gmra.mrb[16].mxu0 %vm485_vm12, %v1062_v33 }
0x11f0   :  { %3788 = vmatpush3.bf16.msra.mxu0 %v4493_v36  ;;  %3791 = vmatprep.mubr.msk.bf16.mxu0 %vm4259_vm0, %v5447_v1 }
0x11f1   :  { %3789 = vmatprep.subr.bf16.mxu0 %v5447_v1 }
0x11f4   :  { %3790 = vmatpush3.bf16.msra.mxu0 %v4499_v37 }
0x11f5   :  { %3803 = vmatprep.subr.bf16.mxu0 %v5447_v1 }
0x12c2   :  { %v1100_v12 = vpop.f32.mrb[16].mxu0 }
0x12c3   :  { %v1107_v18 = vrot.slane %v1100_v12, 6  ;;  %v3785_v22 = vpop.f32.mrb[17].mxu0 }
0x12c4   :  { %v1103_v38 = vpop.f32.mrb[18].mxu0 }
0x12c5   :  { %v1109_v40 = vadd.f32 %v1107_v18, %v4462_v56  ;;  %v3786_v41 = vpop.f32.mrb[19].mxu0 }
0x12c7   :  { %4079 = vtanh.f32 %v1109_v40  ;;  %v3539_v45 = vmul.f32 -1.442695, %v1109_v40 }
0x12c9   :  { %4081 = vpow2.f32 %v3539_v45 }
0x12d1   :  { %v4080_v42 = vpop.eup %4079 }
0x12d2   :  { %1122 = vrot.lane.b32.xlu1 %v4080_v42, %s4267_s30 }
0x12d3   :  { %v4082_v47 = vpop.eup %4081 }
0x12d4   :  { %v1113_v49 = vadd.f32 1.0, %v4082_v47 }
0x12d6   :  { %4083 = vrcp.f32 %v1113_v49 }
0x12e0   :  { %v4084_v50 = vpop.eup %4083 }
0x12e1   :  { %v1120_v58 = vmul.f32 %v4084_v50, %v1118_v54 }
0x1344   :  { %v1123_v52 = vpop.permute.xlu1 %1122 }
0x1345   :  { %v1125_v53 = vmul.f32 %v4084_v50, %v1123_v52 }
0x1347   :  { %1127 = vrot.lane.b32.xlu0 %v1125_v53, %s4267_s30 }
0x13b9   :  { %v1128_v60 = vpop.permute.xlu0 %1127 }
0x13ba   :  { %v4682_v61 = vadd.f32 %v1128_v60, %v1120_v58 }
0x13bc   :  { %4085 = vtanh.f32 %v4682_v61 }
0x13c6   :  { %v4086_v62 = vpop.eup %4085 }
0x13c7   :  { %1133 = vrot.lane.b32.xlu1 %v4086_v62, %s4267_s30 }
0x1439   :  { %v1134_v63 = vpop.permute.xlu1 %1133 }
0x143a   :  { %v4686_v59 = vmul.f32 %v4084_v50, %v1134_v63 }
0x143c   :  { %1138 = vrot.lane.b32.xlu0 %v4686_v59, %s4263_s2 }
0x14ae   :  { %v1139_v34 = vpop.permute.xlu0 %1138 }
0x14af   :  { %v1142_v2 = vsel %vm1141_vm14, %v1139_v34, 0.0 }
0x14b0   :  { %1143 = vadd.xlane.f32.xlu1 %v1142_v2 }
0x153d   :  { %v1144_v9 = vpop.xlane.xlu1 %1143 }
0x153e   :  { %v1145_v6 = vmul.f32 0.03125, %v1144_v9 }
0x1540   :  { %v1146_v24 = vsub.f32 %v4686_v59, %v1145_v6 }
0x1542   :  { %v1147_v29 = vmul.f32 %v1146_v24, %v1146_v24 }
0x1544   :  { %1149 = vrot.lane.b32.xlu0 %v1147_v29, %s4263_s2 }
0x15b6   :  { %v1150_v33 = vpop.permute.xlu0 %1149 }
0x15b7   :  { %v1152_v12 = vsel %vm1141_vm14, %v1150_v33, 0.0 }
0x15b8   :  { %1153 = vadd.xlane.f32.xlu0 %v1152_v12 }
0x1645   :  { %v1154_v18 = vpop.xlane.xlu0 %1153 }
0x1646   :  { %v1155_v22 = vmul.f32 0.03125, %v1154_v18 }
0x1648   :  { %v1156_v38 = vadd.f32 1e-05, %v1155_v22 }
0x164a   :  { %4087 = vrsqrt.f32 %v1156_v38 }
0x1654   :  { %v4088_v40 = vpop.eup %4087 }
0x1655   :  { %v1158_v41 = vmul.f32 %v4088_v40, %v1146_v24 }
0x1657   :  { %v1159_v42 = vmul.f32 %v1158_v41, %v4504_v44 }
0x1659   :  { %v4696_v45 = vadd.f32 %v1159_v42, %v4506_v46 }
0x165b   :  { %v1161_v47 = vpack.c.bf16 %v4696_v45, %v4696_v45 }
0x165d   :  { %v1163_v49 = vrot.slane %v1161_v47, 1 }
0x165f   :  { %1164 = vrot.lane.b32.xlu0 %v1163_v49, %s4263_s2 }
0x16d1   :  { %v1165_v50 = vpop.permute.xlu0 %1164 }
0x16d2   :  { %3792 = vmatmul.mubr.msk.bf16.vlgmr.msra.gmra.mrb[20].mxu0 %vm261_vm5, %v1165_v50 }
0x16d3   :  { %3804 = vmatpush3.bf16.msra.mxu0 %v4590_v7  ;;  %3815 = vmatprep.mubr.msk.bf16.mxu0 %vm4259_vm0, %v5447_v1 }
0x16d4   :  { %3805 = vmatprep.subr.bf16.mxu0 %v5447_v1 }
0x16d7   :  { %3806 = vmatpush3.bf16.msra.mxu0 %v4597_v48 }
0x16d8   :  { %3807 = vmatprep.subr.bf16.mxu0 %v5447_v1 }
0x16db   :  { %3808 = vmatpush3.bf16.msra.mxu0 %v4604_v8 }
0x16dc   :  { %3809 = vmatprep.subr.bf16.mxu0 %v5447_v1 }
0x16df   :  { %3810 = vmatpush3.bf16.msra.mxu0 %v4611_v11 }
0x16e0   :  { %3811 = vmatprep.subr.bf16.mxu0 %v5447_v1 }
0x16e3   :  { %3812 = vmatpush3.bf16.msra.mxu0 %v4618_v14 }
0x16e4   :  { %3813 = vmatprep.subr.bf16.mxu0 %v5447_v1 }
0x16e7   :  { %3814 = vmatpush3.bf16.msra.mxu0 %v4624_v16 }
0x16e8   :  { %3839 = vmatprep.subr.bf16.mxu0 %v5447_v1 }
0x17a5   :  { %v1203_v52 = vpop.f32.mrb[20].mxu0 }
0x17a6   :  { %v1216_v53 = vrot.slane %v1203_v52, %v4519_v57  ;;  %v3793_v54 = vpop.f32.mrb[21].mxu0 }
0x17a7   :  { %v1206_v58 = vpop.f32.mrb[22].mxu0 }
0x17a8   :  { %v1217_v60 = vcombine.high %v1216_v53, %v1216_v53  ;;  %v1224_v62 = vrot.slane %v1216_v53, %v4519_v57  ;;  %v3794_v63 = vpop.f32.mrb[23].mxu0 }
0x17aa   :  { %v1231_v34 = vrot.slane %v1217_v60, %v4519_v57  ;;  %v1235_v2 = vrot.slane %v1224_v62, %v4336_v20 }
0x17ac   :  { %v1242_v9 = vmul.f32 %v1235_v2, %v4449_v30  ;;  %v1239_v6 = vrot.slane %v1231_v34, %v4336_v20 }
0x17ae   :  { %v1244_v24 = vsel %vm261_vm5, %v1242_v9, 0.0  ;;  %v1243_v29 = vmul.f32 %v1239_v6, %v4451_v32 }
0x17af   :  { %1245 = vadd.xlane.f32.xlu1 %v1244_v24 }
0x17b0   :  { %v1247_v33 = vsel %vm261_vm5, %v1243_v29, 0.0 }
0x17b3   :  { %1248 = vadd.xlane.f32.xlu1 %v1247_v33 }
0x183c   :  { %v1246_v12 = vpop.xlane.xlu1 %1245 }
0x183d   :  { %v1250_v18 = vmul.f32 0.17677669, %v1246_v12 }
0x183f   :  { %v1257_v40 = vrot.slane %v1250_v18, %v4532_v15 }
0x1840   :  { %v1249_v22 = vpop.xlane.xlu1 %1248 }
0x1841   :  { %v1251_v38 = vmul.f32 0.17677669, %v1249_v22 }
0x1843   :  { %v1261_v41 = vrot.slane %v1251_v38, %v4532_v15 }
0x1845   :  { %v1262_v42 = vsel %vm712_vm9, %v1261_v41, %v1257_v40 }
0x1846   :  { %v1264_v47 = vsel %vm715_vm10, %v1262_v42, -inf }
0x1847   :  { %1265 = vmax.xlane.f32.xlu1 %v1264_v47 }
0x18d4   :  { %v1266_v49 = vpop.xlane.xlu1 %1265 }
0x18d5   :  { %v1271_v50 = vrot.slane %v1266_v49, %v4336_v20  ;;  %v1275_v52 = vrot.slane %v1266_v49, %v4339_v21 }
0x18d7   :  { %v1278_v53 = vsub.f32 %v1250_v18, %v1271_v50  ;;  %v1279_v54 = vsub.f32 %v1251_v38, %v1275_v52 }
0x18d9   :  { %v1280_v58 = vmul.f32 1.442695, %v1278_v53  ;;  %v1282_v60 = vmul.f32 1.442695, %v1279_v54 }
0x18db   :  { %4089 = vpow2.f32 %v1280_v58 }
0x18dc   :  { %4091 = vpow2.f32 %v1282_v60 }
0x18e5   :  { %v4090_v62 = vpop.eup %4089 }
0x18e6   :  { %v4092_v63 = vpop.eup %4091  ;;  %1287 = vperm.xlu1 %4015, %v4090_v62  }
0x18e7   :  { %1290 = vperm.xlu0 %4016, %v4092_v63  }
0x1965   :  { %v1288_v34 = vpop.permute.xlu1 %1287 }
0x1966   :  { %v1291_v2 = vpop.permute.xlu0 %1290  ;;  %v1295_v9 = vrot.slane %v1288_v34, %v4532_v15 }
0x1967   :  { %v1299_v6 = vrot.slane %v1291_v2, %v4532_v15 }
0x1969   :  { %v1300_v24 = vsel %vm712_vm9, %v1299_v6, %v1295_v9 }
0x196a   :  { %v1302_v29 = vsel %vm715_vm10, %v1300_v24, 0.0 }
0x196b   :  { %1303 = vadd.xlane.f32.xlu0 %v1302_v29 }
0x19f8   :  { %v1304_v33 = vpop.xlane.xlu0 %1303 }
0x19f9   :  { %4093 = vrcp.f32 %v1304_v33 }
0x1a03   :  { %v4094_v12 = vpop.eup %4093 }
0x1a04   :  { %v1310_v18 = vrot.slane %v4094_v12, %v4336_v20  ;;  %v1314_v38 = vrot.slane %v4094_v12, %v4339_v21 }
0x1a06   :  { %v1317_v22 = vmul.f32 %v4090_v62, %v1310_v18  ;;  %v1318_v40 = vmul.f32 %v4092_v63, %v1314_v38 }
0x1a08   :  { %1321 = vperm.xlu1 %4015, %v1317_v22  }
0x1a0c   :  { %1326 = vperm.xlu1 %4015, %v1318_v40  }
0x1a87   :  { %v4737_v41 = vpop.permute.xlu1 %1321 }
0x1a88   :  { %5458 = vst [vmem:[#allocation4_spill] sm:$0xff] %v4737_v41  ;;  %v1329_v42 = vmul.f32 %v4737_v41, %v4449_v30 }
0x1a8a   :  { %v1331_v47 = vsel %vm783_vm11, %v1329_v42, 0.0 }
0x1a8b   :  { %v1332_v49 = vrot.slane %v1331_v47, 4  ;;  %v4742_v50 = vpop.permute.xlu1 %1326 }
0x1a8c   :  { %v1330_v52 = vmul.f32 %v4742_v50, %v4451_v32 }
0x1a8d   :  { %v1333_v53 = vadd.f32 %v1332_v49, %v1331_v47 }
0x1a8e   :  { %v1338_v54 = vsel %vm783_vm11, %v1330_v52, 0.0 }
0x1a8f   :  { %v1334_v58 = vrot.slane %v1333_v53, 2  ;;  %v1339_v60 = vrot.slane %v1338_v54, 4 }
0x1a91   :  { %v1335_v62 = vadd.f32 %v1334_v58, %v1333_v53  ;;  %v1340_v63 = vadd.f32 %v1339_v60, %v1338_v54 }
0x1a93   :  { %v1336_v34 = vrot.slane %v1335_v62, 1  ;;  %v1341_v2 = vrot.slane %v1340_v63, 2 }
0x1a95   :  { %v1342_v9 = vadd.f32 %v1341_v2, %v1340_v63  ;;  %v1337_v6 = vadd.f32 %v1336_v34, %v1335_v62 }
0x1a97   :  { %v1343_v24 = vrot.slane %v1342_v9, 1  ;;  %v1345_v33 = vpack.c.bf16 %v1337_v6, %v1337_v6 }
0x1a99   :  { %v1344_v29 = vadd.f32 %v1343_v24, %v1342_v9  ;;  %v1349_v18 = vunpack.c.l.b16 %v1345_v33 }
0x1a9b   :  { %v1346_v12 = vpack.c.bf16 %v1344_v29, %v1344_v29 }
0x1a9d   :  { %v1350_v22 = vunpack.c.l.b16 %v1346_v12 }
0x1a9f   :  { %v1351_v38 = vsel %vm712_vm9, %v1350_v22, %v1349_v18 }
0x1aa0   :  { %v1352_v40 = vpack.c.b16 %v1351_v38, %v1351_v38 }
0x1aa2   :  { %1353 = vrot.lane.b32.xlu1 %v1352_v40, %s4261_s27 }
0x1b14   :  { %v1354_v42 = vpop.permute.xlu1 %1353 }
0x1b15   :  { %3800 = vmatmul.mubr.msk.bf16.vlgmr.msra.gmra.mrb[20].mxu1 %vm261_vm5, %v1354_v42 }
0x1b16   :  { %3820 = vmatpush3.bf16.msra.mxu1 %v4419_v25  ;;  %3827 = vmatprep.mubr.msk.bf16.mxu1 %vm4259_vm0, %v5447_v1 }
0x1b17   :  { %3821 = vmatprep.subr.bf16.mxu1 %v5447_v1 }
0x1b1a   :  { %3822 = vmatpush3.bf16.msra.mxu1 %v4426_v27 }
0x1b1b   :  { %3823 = vmatprep.subr.bf16.mxu1 %v5447_v1 }
0x1b1e   :  { %3824 = vmatpush3.bf16.msra.mxu1 %v4435_v13 }
0x1b1f   :  { %3825 = vmatprep.subr.bf16.mxu1 %v5447_v1 }
0x1b22   :  { %3826 = vmatpush3.bf16.msra.mxu1 %v4442_v28  ;;  %v1415_v28 = vrot.slane %v4696_v45, 2 }
0x1b23   :  { %3831 = vmatprep.subr.bf16.mxu1 %v5447_v1 }
0x1be8   :  { %v1392_v47 = vpop.f32.mrb[20].mxu1 }
0x1be9   :  { %4095 = vtanh.f32 %v1392_v47  ;;  %v3801_v25 = vpop.f32.mrb[21].mxu1 }
0x1bea   :  { %v1395_v49 = vpop.f32.mrb[22].mxu1 }
0x1beb   :  { %v3802_v52 = vpop.f32.mrb[23].mxu1 }
0x1bf3   :  { %v4096_v53 = vpop.eup %4095 }
0x1bf4   :  { %v1399_v54 = vsel %vm181_vm4, %v4096_v53, 0.0 }
0x1bf5   :  { %1400 = vadd.xlane.f32.xlu1 %v1399_v54 }
0x1c82   :  { %v1401_v27 = vpop.xlane.xlu1 %1400 }
0x1c83   :  { %v1402_v58 = vmul.f32 0.03125, %v1401_v27 }
0x1c85   :  { %v1403_v60 = vsub.f32 %v4096_v53, %v1402_v58 }
0x1c87   :  { %v1404_v62 = vmul.f32 %v1403_v60, %v1403_v60 }
0x1c89   :  { %v1405_v13 = vsel %vm181_vm4, %v1404_v62, 0.0 }
0x1c8a   :  { %1406 = vadd.xlane.f32.xlu0 %v1405_v13 }
0x1ca0   :  { %1416 = vrot.lane.b32.xlu0 %v1415_v28, %s4261_s27 }
0x1d17   :  { %v1407_v63 = vpop.xlane.xlu0 %1406 }
0x1d18   :  { %v1408_v34 = vmul.f32 0.03125, %v1407_v63 }
0x1d1a   :  { %v1409_v2 = vadd.f32 1e-05, %v1408_v34 }
0x1d1b   :  { %v1417_v33 = vpop.permute.xlu0 %1416 }
0x1d1c   :  { %4097 = vrsqrt.f32 %v1409_v2 }
0x1d26   :  { %v4098_v9 = vpop.eup %4097 }
0x1d27   :  { %v1411_v6 = vmul.f32 %v4098_v9, %v1403_v60 }
0x1d29   :  { %v1412_v24 = vmul.f32 %v1411_v6, %v4631_v26 }
0x1d2b   :  { %v1413_v29 = vadd.f32 %v1412_v24, %v4636_v31 }
0x1d2d   :  { %v1419_v12 = vsel %vm261_vm5, %v1413_v29, %v1417_v33 }
0x1d2e   :  { %v1420_v18 = vsel %vm485_vm12, %v1419_v12, %v4661_v17 }
0x1d2f   :  { %v1421_v22 = vpack.c.bf16 %v1420_v18, %v1420_v18 }
0x1d31   :  { %3816 = vmatmul.mubr.msk.bf16.vlgmr.msra.gmra.mrb[24].mxu0 %vm950_vm13, %v1421_v22 }
0x1d32   :  { %3840 = vmatpush3.bf16.msra.mxu0 %v4549_v3  ;;  %3843 = vmatprep.mubr.msk.bf16.mxu0 %vm4259_vm0, %v5447_v1  ;;  %v1513_v3 = vrot.slane %v4686_v59, 2 }
0x1d33   :  { %3841 = vmatprep.subr.bf16.mxu0 %v5447_v1 }
0x1d36   :  { %3842 = vmatpush3.bf16.msra.mxu0 %v4555_v4 }
0x1d37   :  { %3863 = vmatprep.subr.bf16.mxu0 %v5447_v1 }
0x1e04   :  { %v1459_v45 = vpop.f32.mrb[24].mxu0 }
0x1e05   :  { %v1460_v38 = vadd.f32 %v1459_v45, %v4652_v51  ;;  %v3817_v40 = vpop.f32.mrb[25].mxu0 }
0x1e06   :  { %v1462_v42 = vpop.f32.mrb[26].mxu0 }
0x1e07   :  { %4099 = vtanh.f32 %v1460_v38  ;;  %v3818_v47 = vpop.f32.mrb[27].mxu0  ;;  %v3543_v49 = vmul.f32 -1.442695, %v1460_v38  ;;  %v1574_v42 = vrot.slane %v4682_v61, 6 }
0x1e09   :  { %4101 = vpow2.f32 %v3543_v49 }
0x1e11   :  { %v4100_v25 = vpop.eup %4099 }
0x1e12   :  { %1474 = vrot.lane.b32.xlu1 %v4100_v25, %s4267_s30 }
0x1e13   :  { %v4102_v52 = vpop.eup %4101 }
0x1e14   :  { %v1468_v4 = vadd.f32 1.0, %v4102_v52 }
0x1e16   :  { %1514 = vrot.lane.b32.xlu1 %v1513_v3, %s4261_s27  ;;  %4103 = vrcp.f32 %v1468_v4 }
0x1e20   :  { %v4104_v53 = vpop.eup %4103 }
0x1e21   :  { %v1472_v58 = vmul.f32 %v4104_v53, %v4657_v0 }
0x1e84   :  { %v1475_v54 = vpop.permute.xlu1 %1474 }
0x1e85   :  { %v1477_v27 = vmul.f32 %v4104_v53, %v1475_v54 }
0x1e87   :  { %1479 = vrot.lane.b32.xlu0 %v1477_v27, %s4267_s30 }
0x1e88   :  { %v1515_v63 = vpop.permute.xlu1 %1514 }
0x1ef9   :  { %v1480_v60 = vpop.permute.xlu0 %1479 }
0x1efa   :  { %v4782_v62 = vadd.f32 %v1480_v60, %v1472_v58 }
0x1efc   :  { %4105 = vtanh.f32 %v4782_v62 }
0x1f06   :  { %v4106_v59 = vpop.eup %4105 }
0x1f07   :  { %1485 = vrot.lane.b32.xlu0 %v4106_v59, %s4267_s30 }
0x1f79   :  { %v1486_v13 = vpop.permute.xlu0 %1485 }
0x1f7a   :  { %v4786_v28 = vmul.f32 %v4104_v53, %v1486_v13 }
0x1f7c   :  { %1490 = vrot.lane.b32.xlu0 %v4786_v28, %s4263_s2 }
0x1fee   :  { %v4790_v34 = vpop.permute.xlu0 %1490 }
0x1fef   :  { %v1517_v0 = vsel %vm261_vm5, %v4790_v34, %v1515_v63 }
0x1ff0   :  { %v1518_v2 = vpack.c.bf16 %v1517_v0, %v1517_v0 }
0x1ff2   :  { %3828 = vmatmul.mubr.msk.bf16.vlgmr.msra.gmra.mrb[24].mxu1 %vm485_vm12, %v1518_v2 }
0x1ff3   :  { %3832 = vmatpush3.bf16.msra.mxu1 %v4493_v36  ;;  %3835 = vmatprep.mubr.msk.bf16.mxu1 %vm4259_vm0, %v5447_v1 }
0x1ff4   :  { %3833 = vmatprep.subr.bf16.mxu1 %v5447_v1 }
0x1ff7   :  { %3834 = vmatpush3.bf16.msra.mxu1 %v4499_v37 }
0x1ff8   :  { %3847 = vmatprep.subr.bf16.mxu1 %v5447_v1 }
0x20c5   :  { %v1556_v9 = vpop.f32.mrb[24].mxu1 }
0x20c6   :  { %v1563_v6 = vrot.slane %v1556_v9, 4  ;;  %v3829_v24 = vpop.f32.mrb[25].mxu1 }
0x20c7   :  { %v1559_v29 = vpop.f32.mrb[26].mxu1 }
0x20c8   :  { %v1565_v33 = vadd.f32 %v1563_v6, %v4462_v56  ;;  %v3830_v12 = vpop.f32.mrb[27].mxu1 }
0x20ca   :  { %4107 = vtanh.f32 %v1565_v33  ;;  %v3545_v36 = vmul.f32 -1.442695, %v1565_v33 }
0x20cc   :  { %4109 = vpow2.f32 %v3545_v36 }
0x20d4   :  { %v4108_v18 = vpop.eup %4107 }
0x20d5   :  { %1578 = vrot.lane.b32.xlu0 %v4108_v18, %s4267_s30 }
0x20d6   :  { %v4110_v22 = vpop.eup %4109 }
0x20d7   :  { %v1569_v45 = vadd.f32 1.0, %v4110_v22 }
0x20d9   :  { %4111 = vrcp.f32 %v1569_v45 }
0x20e3   :  { %v4112_v38 = vpop.eup %4111 }
0x20e4   :  { %v1576_v47 = vmul.f32 %v4112_v38, %v1574_v42 }
0x2147   :  { %v1579_v37 = vpop.permute.xlu0 %1578 }
0x2148   :  { %v1581_v40 = vmul.f32 %v4112_v38, %v1579_v37 }
0x214a   :  { %1583 = vrot.lane.b32.xlu1 %v1581_v40, %s4267_s30 }
0x21bc   :  { %v1584_v25 = vpop.permute.xlu1 %1583 }
0x21bd   :  { %v4805_v3 = vadd.f32 %v1584_v25, %v1576_v47 }
0x21bf   :  { %4113 = vtanh.f32 %v4805_v3 }
0x21c9   :  { %v4114_v49 = vpop.eup %4113 }
0x21ca   :  { %1589 = vrot.lane.b32.xlu0 %v4114_v49, %s4267_s30 }
0x223c   :  { %v1590_v52 = vpop.permute.xlu0 %1589 }
0x223d   :  { %v4809_v4 = vmul.f32 %v4112_v38, %v1590_v52 }
0x223f   :  { %1594 = vrot.lane.b32.xlu1 %v4809_v4, %s4263_s2 }
0x22b1   :  { %v1595_v53 = vpop.permute.xlu1 %1594 }
0x22b2   :  { %v1598_v54 = vsel %vm1597_vm15, %v1595_v53, 0.0 }
0x22b3   :  { %1599 = vadd.xlane.f32.xlu0 %v1598_v54 }
0x2340   :  { %v1600_v61 = vpop.xlane.xlu0 %1599 }
0x2341   :  { %v1601_v27 = vmul.f32 0.03125, %v1600_v61 }
0x2343   :  { %v1602_v58 = vsub.f32 %v4809_v4, %v1601_v27 }
0x2345   :  { %v1603_v60 = vmul.f32 %v1602_v58, %v1602_v58 }
0x2347   :  { %1605 = vrot.lane.b32.xlu1 %v1603_v60, %s4263_s2 }
0x23b9   :  { %v1606_v59 = vpop.permute.xlu1 %1605 }
0x23ba   :  { %v1608_v13 = vsel %vm1597_vm15, %v1606_v59, 0.0 }
0x23bb   :  { %1609 = vadd.xlane.f32.xlu1 %v1608_v13 }
0x2448   :  { %v1610_v63 = vpop.xlane.xlu1 %1609 }
0x2449   :  { %v1611_v0 = vmul.f32 0.03125, %v1610_v63 }
0x244b   :  { %v1612_v2 = vadd.f32 1e-05, %v1611_v0 }
0x244d   :  { %4115 = vrsqrt.f32 %v1612_v2 }
0x2457   :  { %v4116_v9 = vpop.eup %4115 }
0x2458   :  { %v1614_v6 = vmul.f32 %v4116_v9, %v1602_v58 }
0x245a   :  { %v1615_v24 = vmul.f32 %v1614_v6, %v4504_v44 }
0x245c   :  { %v4817_v29 = vadd.f32 %v1615_v24, %v4506_v46 }
0x245e   :  { %v1617_v33 = vpack.c.bf16 %v4817_v29, %v4817_v29 }
0x2460   :  { %v1619_v12 = vrot.slane %v1617_v33, 2 }
0x2462   :  { %1620 = vrot.lane.b32.xlu0 %v1619_v12, %s4263_s2 }
0x24d4   :  { %v1621_v18 = vpop.permute.xlu0 %1620 }
0x24d5   :  { %3836 = vmatmul.mubr.msk.bf16.vlgmr.msra.gmra.mrb[28].mxu1 %vm261_vm5, %v1621_v18 }
0x24d6   :  { %3848 = vmatpush3.bf16.msra.mxu1 %v4590_v7  ;;  %3859 = vmatprep.mubr.msk.bf16.mxu1 %vm4259_vm0, %v5447_v1 }
0x24d7   :  { %3849 = vmatprep.subr.bf16.mxu1 %v5447_v1 }
0x24da   :  { %3850 = vmatpush3.bf16.msra.mxu1 %v4597_v48 }
0x24db   :  { %3851 = vmatprep.subr.bf16.mxu1 %v5447_v1 }
0x24de   :  { %3852 = vmatpush3.bf16.msra.mxu1 %v4604_v8 }
0x24df   :  { %3853 = vmatprep.subr.bf16.mxu1 %v5447_v1 }
0x24e2   :  { %3854 = vmatpush3.bf16.msra.mxu1 %v4611_v11 }
0x24e3   :  { %3855 = vmatprep.subr.bf16.mxu1 %v5447_v1 }
0x24e6   :  { %3856 = vmatpush3.bf16.msra.mxu1 %v4618_v14 }
0x24e7   :  { %3857 = vmatprep.subr.bf16.mxu1 %v5447_v1 }
0x24ea   :  { %3858 = vmatpush3.bf16.msra.mxu1 %v4624_v16 }
0x24eb   :  { %3883 = vmatprep.subr.bf16.mxu1 %v5447_v1 }
0x25a8   :  { %v1659_v7 = vpop.f32.mrb[28].mxu1 }
0x25a9   :  { %v1672_v48 = vrot.slane %v1659_v7, %v4519_v57  ;;  %v3837_v36 = vpop.f32.mrb[29].mxu1 }
0x25aa   :  { %v1662_v22 = vpop.f32.mrb[30].mxu1 }
0x25ab   :  { %v1673_v8 = vcombine.high %v1672_v48, %v1672_v48  ;;  %v1680_v45 = vrot.slane %v1672_v48, %v4519_v57  ;;  %v3838_v38 = vpop.f32.mrb[31].mxu1 }
0x25ad   :  { %v1687_v11 = vrot.slane %v1673_v8, %v4519_v57  ;;  %v1691_v37 = vrot.slane %v1680_v45, %v4336_v20 }
0x25af   :  { %v1698_v14 = vmul.f32 %v1691_v37, %v4449_v30  ;;  %v1695_v40 = vrot.slane %v1687_v11, %v4336_v20 }
0x25b1   :  { %v1700_v16 = vsel %vm261_vm5, %v1698_v14, 0.0  ;;  %v1699_v42 = vmul.f32 %v1695_v40, %v4451_v32 }
0x25b2   :  { %1701 = vadd.xlane.f32.xlu1 %v1700_v16 }
0x25b3   :  { %v1703_v47 = vsel %vm261_vm5, %v1699_v42, 0.0 }
0x25b6   :  { %1704 = vadd.xlane.f32.xlu1 %v1703_v47 }
0x263f   :  { %v1702_v25 = vpop.xlane.xlu1 %1701 }
0x2640   :  { %v1706_v49 = vmul.f32 0.17677669, %v1702_v25 }
0x2642   :  { %v1713_v54 = vrot.slane %v1706_v49, %v4532_v15 }
0x2643   :  { %v1705_v52 = vpop.xlane.xlu1 %1704 }
0x2644   :  { %v1707_v53 = vmul.f32 0.17677669, %v1705_v52 }
0x2646   :  { %v1717_v61 = vrot.slane %v1707_v53, %v4532_v15 }
0x2648   :  { %v1718_v27 = vsel %vm712_vm9, %v1717_v61, %v1713_v54 }
0x2649   :  { %v1720_v58 = vsel %vm715_vm10, %v1718_v27, -inf }
0x264a   :  { %1721 = vmax.xlane.f32.xlu1 %v1720_v58 }
0x26d7   :  { %v1722_v60 = vpop.xlane.xlu1 %1721 }
0x26d8   :  { %v1727_v59 = vrot.slane %v1722_v60, %v4336_v20  ;;  %v1731_v13 = vrot.slane %v1722_v60, %v4339_v21 }
0x26da   :  { %v1734_v63 = vsub.f32 %v1706_v49, %v1727_v59  ;;  %v1735_v0 = vsub.f32 %v1707_v53, %v1731_v13 }
0x26dc   :  { %v1736_v2 = vmul.f32 1.442695, %v1734_v63  ;;  %v1738_v9 = vmul.f32 1.442695, %v1735_v0 }
0x26de   :  { %4117 = vpow2.f32 %v1736_v2 }
0x26df   :  { %4119 = vpow2.f32 %v1738_v9 }
0x26e8   :  { %v4118_v6 = vpop.eup %4117 }
0x26e9   :  { %v4120_v24 = vpop.eup %4119  ;;  %1743 = vperm.xlu0 %4016, %v4118_v6  }
0x26ea   :  { %1746 = vperm.xlu1 %4015, %v4120_v24  }
0x2768   :  { %v1744_v33 = vpop.permute.xlu0 %1743 }
0x2769   :  { %v1747_v12 = vpop.permute.xlu1 %1746  ;;  %v1751_v18 = vrot.slane %v1744_v33, %v4532_v15 }
0x276a   :  { %v1755_v7 = vrot.slane %v1747_v12, %v4532_v15 }
0x276c   :  { %v1756_v48 = vsel %vm712_vm9, %v1755_v7, %v1751_v18  ;;  %v4874_v7 = vld [vmem:[%s5439_s3 + $0x20] sm:$0xff]  }
0x276d   :  { %v1758_v36 = vsel %vm715_vm10, %v1756_v48, 0.0  ;;  %v4883_v48 = vld [vmem:[%s5439_s3 + $0x28] sm:$0xff]  }
0x276e   :  { %1759 = vadd.xlane.f32.xlu0 %v1758_v36  ;;  %v4890_v36 = vld [vmem:[%s5439_s3 + $0x30] sm:$0xff]  }
0x27fb   :  { %v1760_v22 = vpop.xlane.xlu0 %1759 }
0x27fc   :  { %4121 = vrcp.f32 %v1760_v22  ;;  %v4897_v22 = vld [vmem:[%s5439_s3 + $0x38] sm:$0xff]  }
0x2806   :  { %v4122_v8 = vpop.eup %4121 }
0x2807   :  { %v1766_v45 = vrot.slane %v4122_v8, %v4336_v20  ;;  %v1770_v11 = vrot.slane %v4122_v8, %v4339_v21 }
0x2809   :  { %v1773_v38 = vmul.f32 %v4118_v6, %v1766_v45  ;;  %v1774_v37 = vmul.f32 %v4120_v24, %v1770_v11 }
0x280b   :  { %1777 = vperm.xlu1 %4015, %v1773_v38  }
0x280f   :  { %1782 = vperm.xlu1 %4015, %v1774_v37  }
0x288a   :  { %v4858_v14 = vpop.permute.xlu1 %1777 }
0x288b   :  { %5459 = vst [vmem:[#allocation5_spill] sm:$0xff] %v4858_v14  ;;  %v1785_v40 = vmul.f32 %v4858_v14, %v4449_v30 }
0x288d   :  { %v1787_v16 = vsel %vm783_vm11, %v1785_v40, 0.0 }
0x288e   :  { %v1788_v42 = vrot.slane %v1787_v16, 4  ;;  %v4863_v47 = vpop.permute.xlu1 %1782 }
0x288f   :  { %5460 = vst [vmem:[#allocation6_spill] sm:$0xff] %v4863_v47  ;;  %v1786_v25 = vmul.f32 %v4863_v47, %v4451_v32 }
0x2890   :  { %v1789_v49 = vadd.f32 %v1788_v42, %v1787_v16 }
0x2891   :  { %v1794_v52 = vsel %vm783_vm11, %v1786_v25, 0.0 }
0x2892   :  { %v1790_v53 = vrot.slane %v1789_v49, 2  ;;  %v1795_v54 = vrot.slane %v1794_v52, 4 }
0x2894   :  { %v1791_v61 = vadd.f32 %v1790_v53, %v1789_v49  ;;  %v1796_v27 = vadd.f32 %v1795_v54, %v1794_v52  ;;  %v1871_v53 = vrot.slane %v4817_v29, 4  ;;  %v4914_v29 = vld [vmem:[%s5439_s3 + $0x90] sm:$0xff]  }
0x2896   :  { %v1792_v58 = vrot.slane %v1791_v61, 1  ;;  %v1797_v60 = vrot.slane %v1796_v27, 2 }
0x2898   :  { %v1798_v59 = vadd.f32 %v1797_v60, %v1796_v27  ;;  %v1793_v13 = vadd.f32 %v1792_v58, %v1791_v61 }
0x289a   :  { %v1799_v63 = vrot.slane %v1798_v59, 1  ;;  %v1801_v2 = vpack.c.bf16 %v1793_v13, %v1793_v13 }
0x289c   :  { %v1800_v0 = vadd.f32 %v1799_v63, %v1798_v59  ;;  %v1805_v6 = vunpack.c.l.b16 %v1801_v2 }
0x289e   :  { %v1802_v9 = vpack.c.bf16 %v1800_v0, %v1800_v0 }
0x28a0   :  { %v1806_v24 = vunpack.c.l.b16 %v1802_v9 }
0x28a2   :  { %v1807_v33 = vsel %vm712_vm9, %v1806_v24, %v1805_v6  ;;  %v4923_v6 = vld [vmem:[%s5439_s3 + $0x98] sm:$0xff]  }
0x28a3   :  { %v1808_v12 = vpack.c.b16 %v1807_v33, %v1807_v33 }
0x28a5   :  { %1809 = vrot.lane.b32.xlu1 %v1808_v12, %s4261_s27 }
0x2917   :  { %v1810_v18 = vpop.permute.xlu1 %1809 }
0x2918   :  { %3844 = vmatmul.mubr.msk.bf16.vlgmr.msra.gmra.mrb[28].mxu0 %vm261_vm5, %v1810_v18 }
0x2919   :  { %3864 = vmatpush3.bf16.msra.mxu0 %v4874_v7  ;;  %3871 = vmatprep.mubr.msk.bf16.mxu0 %vm4259_vm0, %v5447_v1 }
0x291a   :  { %3865 = vmatprep.subr.bf16.mxu0 %v5447_v1 }
0x291d   :  { %3866 = vmatpush3.bf16.msra.mxu0 %v4883_v48 }
0x291e   :  { %3867 = vmatprep.subr.bf16.mxu0 %v5447_v1 }
0x2921   :  { %3868 = vmatpush3.bf16.msra.mxu0 %v4890_v36 }
0x2922   :  { %3869 = vmatprep.subr.bf16.mxu0 %v5447_v1 }
0x2925   :  { %3870 = vmatpush3.bf16.msra.mxu0 %v4897_v22 }
0x2926   :  { %3875 = vmatprep.subr.bf16.mxu0 %v5447_v1 }
0x29eb   :  { %v1848_v8 = vpop.f32.mrb[28].mxu0 }
0x29ec   :  { %4123 = vtanh.f32 %v1848_v8  ;;  %v3845_v45 = vpop.f32.mrb[29].mxu0 }
0x29ed   :  { %v1851_v38 = vpop.f32.mrb[30].mxu0 }
0x29ee   :  { %v3846_v11 = vpop.f32.mrb[31].mxu0 }
0x29f6   :  { %v4124_v37 = vpop.eup %4123 }
0x29f7   :  { %v1855_v40 = vsel %vm181_vm4, %v4124_v37, 0.0 }
0x29f8   :  { %1856 = vadd.xlane.f32.xlu1 %v1855_v40 }
0x2a85   :  { %v1857_v16 = vpop.xlane.xlu1 %1856 }
0x2a86   :  { %v1858_v42 = vmul.f32 0.03125, %v1857_v16 }
0x2a88   :  { %v1859_v25 = vsub.f32 %v4124_v37, %v1858_v42 }
0x2a8a   :  { %v1860_v49 = vmul.f32 %v1859_v25, %v1859_v25 }
0x2a8c   :  { %v1861_v52 = vsel %vm181_vm4, %v1860_v49, 0.0 }
0x2a8d   :  { %1862 = vadd.xlane.f32.xlu0 %v1861_v52 }
0x2aa3   :  { %1872 = vrot.lane.b32.xlu0 %v1871_v53, %s4261_s27 }
0x2b1a   :  { %v1863_v54 = vpop.xlane.xlu0 %1862 }
0x2b1b   :  { %v1864_v61 = vmul.f32 0.03125, %v1863_v54 }
0x2b1d   :  { %v1865_v27 = vadd.f32 1e-05, %v1864_v61 }
0x2b1e   :  { %v1873_v63 = vpop.permute.xlu0 %1872 }
0x2b1f   :  { %4125 = vrsqrt.f32 %v1865_v27  ;;  %v1969_v27 = vrot.slane %v4809_v4, 4  ;;  %v4958_v4 = vld [vmem:[%s5439_s3 + $0x88] sm:$0xff]  }
0x2b29   :  { %v4126_v58 = vpop.eup %4125 }
0x2b2a   :  { %v1867_v60 = vmul.f32 %v4126_v58, %v1859_v25 }
0x2b2c   :  { %v1868_v59 = vmul.f32 %v1867_v60, %v4631_v26 }
0x2b2e   :  { %v1869_v13 = vadd.f32 %v1868_v59, %v4636_v31 }
0x2b30   :  { %v1875_v0 = vsel %vm261_vm5, %v1869_v13, %v1873_v63  ;;  %v4949_v13 = vld [vmem:[%s5439_s3 + $0x80] sm:$0xff]  }
0x2b31   :  { %v1876_v2 = vsel %vm485_vm12, %v1875_v0, %v4786_v28 }
0x2b32   :  { %v1877_v9 = vpack.c.bf16 %v1876_v2, %v1876_v2 }
0x2b34   :  { %3860 = vmatmul.mubr.msk.bf16.vlgmr.msra.gmra.mrb[32].mxu1 %vm950_vm13, %v1877_v9 }
0x2b35   :  { %3884 = vmatpush3.bf16.msra.mxu1 %v4914_v29  ;;  %3887 = vmatprep.mubr.msk.bf16.mxu1 %vm4259_vm0, %v5447_v1 }
0x2b36   :  { %3885 = vmatprep.subr.bf16.mxu1 %v5447_v1 }
0x2b39   :  { %3886 = vmatpush3.bf16.msra.mxu1 %v4923_v6 }
0x2b3a   :  { %3907 = vmatprep.subr.bf16.mxu1 %v5447_v1 }
0x2c07   :  { %v1915_v24 = vpop.f32.mrb[32].mxu1 }
0x2c08   :  { %v1916_v33 = vadd.f32 %v1915_v24, %v4652_v51  ;;  %v3861_v12 = vpop.f32.mrb[33].mxu1 }
0x2c09   :  { %v1918_v18 = vpop.f32.mrb[34].mxu1 }
0x2c0a   :  { %4127 = vtanh.f32 %v1916_v33  ;;  %v3862_v8 = vpop.f32.mrb[35].mxu1  ;;  %v3549_v38 = vmul.f32 -1.442695, %v1916_v33 }
0x2c0c   :  { %4129 = vpow2.f32 %v3549_v38 }
0x2c14   :  { %v4128_v45 = vpop.eup %4127 }
0x2c15   :  { %1930 = vrot.lane.b32.xlu0 %v4128_v45, %s4267_s30 }
0x2c16   :  { %v4130_v11 = vpop.eup %4129 }
0x2c17   :  { %v1924_v37 = vadd.f32 1.0, %v4130_v11 }
0x2c19   :  { %4131 = vrcp.f32 %v1924_v37 }
0x2c23   :  { %v4132_v40 = vpop.eup %4131 }
0x2c24   :  { %v1928_v25 = vmul.f32 %v4132_v40, %v4782_v62 }
0x2c87   :  { %v1931_v16 = vpop.permute.xlu0 %1930 }
0x2c88   :  { %v1933_v42 = vmul.f32 %v4132_v40, %v1931_v16 }
0x2c8a   :  { %1935 = vrot.lane.b32.xlu0 %v1933_v42, %s4267_s30 }
0x2cfc   :  { %v1936_v49 = vpop.permute.xlu0 %1935 }
0x2cfd   :  { %v4931_v52 = vadd.f32 %v1936_v49, %v1928_v25 }
0x2cff   :  { %4133 = vtanh.f32 %v4931_v52 }
0x2d09   :  { %v4134_v53 = vpop.eup %4133 }
0x2d0a   :  { %1941 = vrot.lane.b32.xlu1 %v4134_v53, %s4267_s30 }
0x2d7c   :  { %v1942_v54 = vpop.permute.xlu1 %1941 }
0x2d7d   :  { %v4935_v61 = vmul.f32 %v4132_v40, %v1942_v54  ;;  %v2030_v40 = vrot.slane %v4805_v3, 6 }
0x2d7f   :  { %1946 = vrot.lane.b32.xlu0 %v4935_v61, %s4263_s2 }
0x2d83   :  { %1970 = vrot.lane.b32.xlu0 %v1969_v27, %s4261_s27 }
0x2df1   :  { %v4941_v58 = vpop.permute.xlu0 %1946 }
0x2df5   :  { %v1971_v62 = vpop.permute.xlu0 %1970 }
0x2df6   :  { %v1973_v60 = vsel %vm261_vm5, %v4941_v58, %v1971_v62 }
0x2df7   :  { %v1974_v59 = vpack.c.bf16 %v1973_v60, %v1973_v60 }
0x2df9   :  { %3872 = vmatmul.mubr.msk.bf16.vlgmr.msra.gmra.mrb[32].mxu0 %vm485_vm12, %v1974_v59 }
0x2dfa   :  { %3876 = vmatpush3.bf16.msra.mxu0 %v4949_v13  ;;  %3879 = vmatprep.mubr.msk.bf16.mxu0 %vm4259_vm0, %v5447_v1 }
0x2dfb   :  { %3877 = vmatprep.subr.bf16.mxu0 %v5447_v1 }
0x2dfe   :  { %3878 = vmatpush3.bf16.msra.mxu0 %v4958_v4 }
0x2dff   :  { %3891 = vmatprep.subr.bf16.mxu0 %v5447_v1 }
0x2ecc   :  { %v2012_v63 = vpop.f32.mrb[32].mxu0 }
0x2ecd   :  { %v2019_v0 = vrot.slane %v2012_v63, 2  ;;  %v3873_v2 = vpop.f32.mrb[33].mxu0 }
0x2ece   :  { %v2015_v9 = vpop.f32.mrb[34].mxu0 }
0x2ecf   :  { %v2021_v24 = vadd.f32 %v2019_v0, %v4462_v56  ;;  %v3874_v33 = vpop.f32.mrb[35].mxu0 }
0x2ed1   :  { %4135 = vtanh.f32 %v2021_v24  ;;  %v3551_v18 = vmul.f32 -1.442695, %v2021_v24 }
0x2ed3   :  { %4137 = vpow2.f32 %v3551_v18 }
0x2edb   :  { %v4136_v12 = vpop.eup %4135 }
0x2edc   :  { %2034 = vrot.lane.b32.xlu0 %v4136_v12, %s4267_s30 }
0x2edd   :  { %v4138_v8 = vpop.eup %4137 }
0x2ede   :  { %v2025_v45 = vadd.f32 1.0, %v4138_v8 }
0x2ee0   :  { %4139 = vrcp.f32 %v2025_v45 }
0x2eea   :  { %v4140_v38 = vpop.eup %4139 }
0x2eeb   :  { %v2032_v16 = vmul.f32 %v4140_v38, %v2030_v40  ;;  %v4996_v40 = vld [vmem:[%s5439_s3 + $0x48] sm:$0xff]  }
0x2f4e   :  { %v2035_v11 = vpop.permute.xlu0 %2034 }
0x2f4f   :  { %v2037_v37 = vmul.f32 %v4140_v38, %v2035_v11 }
0x2f51   :  { %2039 = vrot.lane.b32.xlu0 %v2037_v37, %s4267_s30  ;;  %v4987_v37 = vld [vmem:[%s5439_s3 + $0x40] sm:$0xff]  }
0x2fc3   :  { %v2040_v42 = vpop.permute.xlu0 %2039 }
0x2fc4   :  { %v4966_v56 = vadd.f32 %v2040_v42, %v2032_v16  ;;  %v5003_v16 = vld [vmem:[%s5439_s3 + $0x50] sm:$0xff]   ;;  %v5010_v42 = vld [vmem:[%s5439_s3 + $0x58] sm:$0xff]  }
0x2fc6   :  { %4141 = vtanh.f32 %v4966_v56 }
0x2fd0   :  { %v4142_v25 = vpop.eup %4141 }
0x2fd1   :  { %2045 = vrot.lane.b32.xlu1 %v4142_v25, %s4267_s30  ;;  %v5017_v25 = vld [vmem:[%s5439_s3 + $0x60] sm:$0xff]  }
0x3043   :  { %v2046_v49 = vpop.permute.xlu1 %2045 }
0x3044   :  { %v4970_v53 = vmul.f32 %v4140_v38, %v2046_v49  ;;  %v5024_v49 = vld [vmem:[%s5439_s3 + $0x68] sm:$0xff]  }
0x3046   :  { %2050 = vrot.lane.b32.xlu0 %v4970_v53, %s4263_s2 }
0x30b8   :  { %v2051_v54 = vpop.permute.xlu0 %2050 }
0x30b9   :  { %v2054_v27 = vsel %vm2053_vm1, %v2051_v54, 0.0 }
0x30ba   :  { %2055 = vadd.xlane.f32.xlu1 %v2054_v27 }
0x3147   :  { %v2056_v3 = vpop.xlane.xlu1 %2055 }
0x3148   :  { %v2057_v62 = vmul.f32 0.03125, %v2056_v3 }
0x314a   :  { %v2058_v60 = vsub.f32 %v4970_v53, %v2057_v62 }
0x314c   :  { %v2059_v59 = vmul.f32 %v2058_v60, %v2058_v60 }
0x314e   :  { %2061 = vrot.lane.b32.xlu0 %v2059_v59, %s4263_s2 }
0x31c0   :  { %v2062_v63 = vpop.permute.xlu0 %2061 }
0x31c1   :  { %v2064_v0 = vsel %vm2053_vm1, %v2062_v63, 0.0 }
0x31c2   :  { %2065 = vadd.xlane.f32.xlu0 %v2064_v0 }
0x324f   :  { %v2066_v2 = vpop.xlane.xlu0 %2065 }
0x3250   :  { %v2067_v9 = vmul.f32 0.03125, %v2066_v2 }
0x3252   :  { %v2068_v24 = vadd.f32 1e-05, %v2067_v9 }
0x3254   :  { %4143 = vrsqrt.f32 %v2068_v24 }
0x325e   :  { %v4144_v33 = vpop.eup %4143 }
0x325f   :  { %v2070_v12 = vmul.f32 %v4144_v33, %v2058_v60 }
0x3261   :  { %v2071_v18 = vmul.f32 %v2070_v12, %v4504_v44 }
0x3263   :  { %v4978_v8 = vadd.f32 %v2071_v18, %v4506_v46 }
0x3265   :  { %v2073_v45 = vpack.c.bf16 %v4978_v8, %v4978_v8 }
0x3267   :  { %v2075_v38 = vrot.slane %v2073_v45, 3 }
0x3269   :  { %2076 = vrot.lane.b32.xlu0 %v2075_v38, %s4263_s2 }
0x32db   :  { %v2077_v11 = vpop.permute.xlu0 %2076 }
0x32dc   :  { %3880 = vmatmul.mubr.msk.bf16.vlgmr.msra.gmra.mrb[36].mxu0 %vm261_vm5, %v2077_v11 }
0x32dd   :  { %3892 = vmatpush3.bf16.msra.mxu0 %v4987_v37  ;;  %3903 = vmatprep.mubr.msk.bf16.mxu0 %vm4259_vm0, %v5447_v1 }
0x32de   :  { %3893 = vmatprep.subr.bf16.mxu0 %v5447_v1 }
0x32e1   :  { %3894 = vmatpush3.bf16.msra.mxu0 %v4996_v40 }
0x32e2   :  { %3895 = vmatprep.subr.bf16.mxu0 %v5447_v1 }
0x32e5   :  { %3896 = vmatpush3.bf16.msra.mxu0 %v5003_v16 }
0x32e6   :  { %3897 = vmatprep.subr.bf16.mxu0 %v5447_v1 }
0x32e9   :  { %3898 = vmatpush3.bf16.msra.mxu0 %v5010_v42 }
0x32ea   :  { %3899 = vmatprep.subr.bf16.mxu0 %v5447_v1 }
0x32ed   :  { %3900 = vmatpush3.bf16.msra.mxu0 %v5017_v25 }
0x32ee   :  { %3901 = vmatprep.subr.bf16.mxu0 %v5447_v1 }
0x32f1   :  { %3902 = vmatpush3.bf16.msra.mxu0 %v5024_v49 }
0x32f2   :  { %3927 = vmatprep.subr.bf16.mxu0 %v5447_v1 }
0x33af   :  { %v2115_v54 = vpop.f32.mrb[36].mxu0 }
0x33b0   :  { %v2128_v27 = vrot.slane %v2115_v54, %v4519_v57  ;;  %v3881_v3 = vpop.f32.mrb[37].mxu0 }
0x33b1   :  { %v2118_v62 = vpop.f32.mrb[38].mxu0 }
0x33b2   :  { %v2129_v60 = vcombine.high %v2128_v27, %v2128_v27  ;;  %v2136_v59 = vrot.slane %v2128_v27, %v4519_v57  ;;  %v3882_v63 = vpop.f32.mrb[39].mxu0 }
0x33b4   :  { %v2143_v0 = vrot.slane %v2129_v60, %v4519_v57  ;;  %v2147_v2 = vrot.slane %v2136_v59, %v4336_v20 }
0x33b6   :  { %v2154_v9 = vmul.f32 %v2147_v2, %v4449_v30  ;;  %v2151_v24 = vrot.slane %v2143_v0, %v4336_v20 }
0x33b8   :  { %v2156_v33 = vsel %vm261_vm5, %v2154_v9, 0.0  ;;  %v2155_v12 = vmul.f32 %v2151_v24, %v4451_v32 }
0x33b9   :  { %2157 = vadd.xlane.f32.xlu1 %v2156_v33 }
0x33ba   :  { %v2159_v18 = vsel %vm261_vm5, %v2155_v12, 0.0 }
0x33bd   :  { %2160 = vadd.xlane.f32.xlu1 %v2159_v18 }
0x3446   :  { %v2158_v45 = vpop.xlane.xlu1 %2157 }
0x3447   :  { %v2162_v38 = vmul.f32 0.17677669, %v2158_v45 }
0x3449   :  { %v2169_v27 = vrot.slane %v2162_v38, %v4532_v15 }
0x344a   :  { %v2161_v11 = vpop.xlane.xlu1 %2160 }
0x344b   :  { %v2163_v54 = vmul.f32 0.17677669, %v2161_v11 }
0x344d   :  { %v2173_v3 = vrot.slane %v2163_v54, %v4532_v15 }
0x344f   :  { %v2174_v62 = vsel %vm712_vm9, %v2173_v3, %v2169_v27 }
0x3450   :  { %v2176_v60 = vsel %vm715_vm10, %v2174_v62, -inf }
0x3451   :  { %2177 = vmax.xlane.f32.xlu1 %v2176_v60 }
0x34de   :  { %v2178_v59 = vpop.xlane.xlu1 %2177 }
0x34df   :  { %v2183_v63 = vrot.slane %v2178_v59, %v4336_v20  ;;  %v2187_v0 = vrot.slane %v2178_v59, %v4339_v21 }
0x34e1   :  { %v2190_v2 = vsub.f32 %v2162_v38, %v2183_v63  ;;  %v2191_v9 = vsub.f32 %v2163_v54, %v2187_v0 }
0x34e3   :  { %v2192_v24 = vmul.f32 1.442695, %v2190_v2  ;;  %v2194_v33 = vmul.f32 1.442695, %v2191_v9 }
0x34e5   :  { %4145 = vpow2.f32 %v2192_v24 }
0x34e6   :  { %4147 = vpow2.f32 %v2194_v33 }
0x34ef   :  { %v4146_v12 = vpop.eup %4145 }
0x34f0   :  { %v4148_v18 = vpop.eup %4147  ;;  %2199 = vperm.xlu1 %4015, %v4146_v12  }
0x34f1   :  { %2202 = vperm.xlu0 %4016, %v4148_v18  }
0x356f   :  { %v2200_v45 = vpop.permute.xlu1 %2199 }
0x3570   :  { %v2203_v11 = vpop.permute.xlu0 %2202  ;;  %v2207_v27 = vrot.slane %v2200_v45, %v4532_v15 }
0x3571   :  { %v2211_v3 = vrot.slane %v2203_v11, %v4532_v15 }
0x3573   :  { %v2212_v62 = vsel %vm712_vm9, %v2211_v3, %v2207_v27 }
0x3574   :  { %v2214_v60 = vsel %vm715_vm10, %v2212_v62, 0.0 }
0x3575   :  { %2215 = vadd.xlane.f32.xlu0 %v2214_v60 }
0x3602   :  { %v2216_v38 = vpop.xlane.xlu0 %2215 }
0x3603   :  { %4149 = vrcp.f32 %v2216_v38 }
0x360d   :  { %v4150_v54 = vpop.eup %4149 }
0x360e   :  { %v2222_v59 = vrot.slane %v4150_v54, %v4336_v20  ;;  %v2226_v0 = vrot.slane %v4150_v54, %v4339_v21 }
0x3610   :  { %v2229_v63 = vmul.f32 %v4146_v12, %v2222_v59  ;;  %v2230_v2 = vmul.f32 %v4148_v18, %v2226_v0 }
0x3612   :  { %2233 = vperm.xlu1 %4015, %v2229_v63  }
0x3616   :  { %2238 = vperm.xlu1 %4015, %v2230_v2  }
0x3691   :  { %v5049_v9 = vpop.permute.xlu1 %2233 }
0x3692   :  { %5461 = vst [vmem:[#allocation7_spill] sm:$0xff] %v5049_v9  ;;  %v2241_v24 = vmul.f32 %v5049_v9, %v4449_v30 }
0x3694   :  { %v2243_v33 = vsel %vm783_vm11, %v2241_v24, 0.0 }
0x3695   :  { %v2244_v45 = vrot.slane %v2243_v33, 4  ;;  %v5054_v11 = vpop.permute.xlu1 %2238 }
0x3696   :  { %5462 = vst [vmem:[#allocation8_spill] sm:$0xff] %v5054_v11  ;;  %v2242_v27 = vmul.f32 %v5054_v11, %v4451_v32 }
0x3697   :  { %v2245_v3 = vadd.f32 %v2244_v45, %v2243_v33  ;;  %v5463_v45 = vmov 0.0  }
0x3698   :  { %v2250_v12 = vsel %vm783_vm11, %v2242_v27, 0.0 }
0x3699   :  { %v2246_v62 = vrot.slane %v2245_v3, 2  ;;  %v2251_v60 = vrot.slane %v2250_v12, 4 }
0x369b   :  { %v2247_v18 = vadd.f32 %v2246_v62, %v2245_v3  ;;  %v2252_v38 = vadd.f32 %v2251_v60, %v2250_v12 }
0x369d   :  { %v2248_v54 = vrot.slane %v2247_v18, 1  ;;  %v2253_v59 = vrot.slane %v2252_v38, 2 }
0x369f   :  { %v2249_v63 = vadd.f32 %v2248_v54, %v2247_v18  ;;  %v2254_v0 = vadd.f32 %v2253_v59, %v2252_v38  ;;  %v2327_v18 = vrot.slane %v4978_v8, 6 }
0x36a1   :  { %v2255_v2 = vrot.slane %v2254_v0, 1  ;;  %v2257_v39 = vpack.c.bf16 %v2249_v63, %v2249_v63 }
0x36a3   :  { %v2256_v24 = vadd.f32 %v2255_v2, %v2254_v0  ;;  %v2261_v43 = vunpack.c.l.b16 %v2257_v39 }
0x36a5   :  { %v2258_v35 = vpack.c.bf16 %v2256_v24, %v2256_v24 }
0x36a7   :  { %v2262_v1 = vunpack.c.l.b16 %v2258_v35 }
0x36a9   :  { %v2263_v9 = vsel %vm712_vm9, %v2262_v1, %v2261_v43 }
0x36aa   :  { %v2264_v5 = vpack.c.b16 %v2263_v9, %v2263_v9 }
0x36ac   :  { %2265 = vrot.lane.b32.xlu1 %v2264_v5, %s4261_s27 }
0x371e   :  { %v2266_v33 = vpop.permute.xlu1 %2265 }
0x371f   :  { %3888 = vmatmul.mubr.msk.bf16.vlgmr.msra.gmra.mrb[36].mxu1 %vm261_vm5, %v2266_v33 }
0x3720   :  { %3908 = vmatpush3.bf16.msra.mxu1 %v4874_v7  ;;  %3915 = vmatprep.mubr.msk.bf16.mxu1 %vm4259_vm0, %v5463_v45 }
0x3721   :  { %3909 = vmatprep.subr.bf16.mxu1 %v5463_v45 }
0x3724   :  { %3910 = vmatpush3.bf16.msra.mxu1 %v4883_v48 }
0x3725   :  { %3911 = vmatprep.subr.bf16.mxu1 %v5463_v45 }
0x3728   :  { %3912 = vmatpush3.bf16.msra.mxu1 %v4890_v36 }
0x3729   :  { %3913 = vmatprep.subr.bf16.mxu1 %v5463_v45 }
0x372c   :  { %3914 = vmatpush3.bf16.msra.mxu1 %v4897_v22 }
0x372d   :  { %3919 = vmatprep.subr.bf16.mxu1 %v5463_v45 }
0x37f2   :  { %v2304_v1 = vpop.f32.mrb[36].mxu1 }
0x37f3   :  { %4151 = vtanh.f32 %v2304_v1  ;;  %v3889_v35 = vpop.f32.mrb[37].mxu1 }
0x37f4   :  { %v2307_v43 = vpop.f32.mrb[38].mxu1 }
0x37f5   :  { %v3890_v39 = vpop.f32.mrb[39].mxu1 }
0x37fd   :  { %v4152_v5 = vpop.eup %4151 }
0x37fe   :  { %v2311_v9 = vsel %vm181_vm4, %v4152_v5, 0.0 }
0x37ff   :  { %2312 = vadd.xlane.f32.xlu1 %v2311_v9 }
0x388c   :  { %v2313_v27 = vpop.xlane.xlu1 %2312 }
0x388d   :  { %v2314_v3 = vmul.f32 0.03125, %v2313_v27 }
0x388f   :  { %v2315_v12 = vsub.f32 %v4152_v5, %v2314_v3 }
0x3891   :  { %v2316_v62 = vmul.f32 %v2315_v12, %v2315_v12 }
0x3893   :  { %v2317_v60 = vsel %vm181_vm4, %v2316_v62, 0.0 }
0x3894   :  { %2318 = vadd.xlane.f32.xlu0 %v2317_v60 }
0x38aa   :  { %2328 = vrot.lane.b32.xlu0 %v2327_v18, %s4261_s27 }
0x3921   :  { %v2319_v38 = vpop.xlane.xlu0 %2318 }
0x3922   :  { %v2320_v54 = vmul.f32 0.03125, %v2319_v38 }
0x3924   :  { %v2321_v59 = vadd.f32 1e-05, %v2320_v54 }
0x3925   :  { %v2329_v33 = vpop.permute.xlu0 %2328 }
0x3926   :  { %4153 = vrsqrt.f32 %v2321_v59 }
0x3930   :  { %v4154_v63 = vpop.eup %4153 }
0x3931   :  { %v2323_v0 = vmul.f32 %v4154_v63, %v2315_v12  ;;  %v2425_v12 = vrot.slane %v4970_v53, 6 }
0x3933   :  { %v2324_v2 = vmul.f32 %v2323_v0, %v4631_v26 }
0x3935   :  { %v2325_v24 = vadd.f32 %v2324_v2, %v4636_v31 }
0x3937   :  { %v2331_v1 = vsel %vm261_vm5, %v2325_v24, %v2329_v33 }
0x3938   :  { %v2332_v35 = vsel %vm485_vm12, %v2331_v1, %v4935_v61 }
0x3939   :  { %v2333_v43 = vpack.c.bf16 %v2332_v35, %v2332_v35 }
0x393b   :  { %3904 = vmatmul.mubr.msk.bf16.vlgmr.msra.gmra.mrb[40].mxu0 %vm950_vm13, %v2333_v43 }
0x393c   :  { %3928 = vmatpush3.bf16.msra.mxu0 %v4914_v29  ;;  %3931 = vmatprep.mubr.msk.bf16.mxu0 %vm4259_vm0, %v5463_v45 }
0x393d   :  { %3929 = vmatprep.subr.bf16.mxu0 %v5463_v45 }
0x3940   :  { %3930 = vmatpush3.bf16.msra.mxu0 %v4923_v6 }
0x3941   :  { %3951 = vmatprep.subr.bf16.mxu0 %v5463_v45 }
0x3a0e   :  { %v2371_v8 = vpop.f32.mrb[40].mxu0 }
0x3a0f   :  { %v2372_v39 = vadd.f32 %v2371_v8, %v4652_v51  ;;  %v3905_v5 = vpop.f32.mrb[41].mxu0 }
0x3a10   :  { %v2374_v9 = vpop.f32.mrb[42].mxu0 }
0x3a11   :  { %4155 = vtanh.f32 %v2372_v39  ;;  %v3906_v27 = vpop.f32.mrb[43].mxu0  ;;  %v3555_v62 = vmul.f32 -1.442695, %v2372_v39 }
0x3a13   :  { %4157 = vpow2.f32 %v3555_v62 }
0x3a1b   :  { %v4156_v3 = vpop.eup %4155 }
0x3a1c   :  { %2386 = vrot.lane.b32.xlu1 %v4156_v3, %s4267_s30 }
0x3a1d   :  { %v4158_v60 = vpop.eup %4157 }
0x3a1e   :  { %v2380_v18 = vadd.f32 1.0, %v4158_v60 }
0x3a20   :  { %2426 = vrot.lane.b32.xlu1 %v2425_v12, %s4261_s27  ;;  %4159 = vrcp.f32 %v2380_v18 }
0x3a2a   :  { %v4160_v38 = vpop.eup %4159 }
0x3a2b   :  { %v2384_v63 = vmul.f32 %v4160_v38, %v4931_v52 }
0x3a8e   :  { %v2387_v54 = vpop.permute.xlu1 %2386 }
0x3a8f   :  { %v2389_v59 = vmul.f32 %v4160_v38, %v2387_v54 }
0x3a91   :  { %2391 = vrot.lane.b32.xlu0 %v2389_v59, %s4267_s30  ;;  %v2483_v59 = vrot.slane %v4966_v56, 6 }
0x3a92   :  { %v2427_v1 = vpop.permute.xlu1 %2426 }
0x3b03   :  { %v2392_v0 = vpop.permute.xlu0 %2391 }
0x3b04   :  { %v5094_v2 = vadd.f32 %v2392_v0, %v2384_v63 }
0x3b06   :  { %4161 = vtanh.f32 %v5094_v2 }
0x3b10   :  { %v4162_v53 = vpop.eup %4161 }
0x3b11   :  { %2397 = vrot.lane.b32.xlu0 %v4162_v53, %s4267_s30 }
0x3b83   :  { %v2398_v24 = vpop.permute.xlu0 %2397 }
0x3b84   :  { %v5098_v33 = vmul.f32 %v4160_v38, %v2398_v24 }
0x3b86   :  { %2402 = vrot.lane.b32.xlu0 %v5098_v33, %s4263_s2 }
0x3bf8   :  { %v5102_v35 = vpop.permute.xlu0 %2402 }
0x3bf9   :  { %v2429_v52 = vsel %vm261_vm5, %v5102_v35, %v2427_v1 }
0x3bfa   :  { %v2430_v43 = vpack.c.bf16 %v2429_v52, %v2429_v52 }
0x3bfc   :  { %3916 = vmatmul.mubr.msk.bf16.vlgmr.msra.gmra.mrb[40].mxu1 %vm485_vm12, %v2430_v43 }
0x3bfd   :  { %3920 = vmatpush3.bf16.msra.mxu1 %v4949_v13  ;;  %3923 = vmatprep.mubr.msk.bf16.mxu1 %vm4259_vm0, %v5463_v45 }
0x3bfe   :  { %3921 = vmatprep.subr.bf16.mxu1 %v5463_v45 }
0x3c01   :  { %3922 = vmatpush3.bf16.msra.mxu1 %v4958_v4 }
0x3c02   :  { %3935 = vmatprep.subr.bf16.mxu1 %v5463_v45 }
0x3ccf   :  { %v2468_v8 = vpop.f32.mrb[40].mxu1 }
0x3cd0   :  { %v2474_v39 = vadd.f32 %v2468_v8, %v4460_v55  ;;  %v3917_v5 = vpop.f32.mrb[41].mxu1 }
0x3cd1   :  { %v2471_v9 = vpop.f32.mrb[42].mxu1 }
0x3cd2   :  { %4163 = vtanh.f32 %v2474_v39  ;;  %v3918_v27 = vpop.f32.mrb[43].mxu1  ;;  %v3557_v12 = vmul.f32 -1.442695, %v2474_v39 }
0x3cd4   :  { %4165 = vpow2.f32 %v3557_v12 }
0x3cdc   :  { %v4164_v3 = vpop.eup %4163 }
0x3cdd   :  { %2487 = vrot.lane.b32.xlu0 %v4164_v3, %s4267_s30 }
0x3cde   :  { %v4166_v62 = vpop.eup %4165 }
0x3cdf   :  { %v2478_v60 = vadd.f32 1.0, %v4166_v62 }
0x3ce1   :  { %4167 = vrcp.f32 %v2478_v60 }
0x3ceb   :  { %v4168_v18 = vpop.eup %4167 }
0x3cec   :  { %v2485_v63 = vmul.f32 %v4168_v18, %v2483_v59 }
0x3d4f   :  { %v2488_v38 = vpop.permute.xlu0 %2487 }
0x3d50   :  { %v2490_v54 = vmul.f32 %v4168_v18, %v2488_v38 }
0x3d52   :  { %2492 = vrot.lane.b32.xlu1 %v2490_v54, %s4267_s30 }
0x3dc4   :  { %v2493_v0 = vpop.permute.xlu1 %2492 }
0x3dc5   :  { %v5117_v53 = vadd.f32 %v2493_v0, %v2485_v63 }
0x3dc7   :  { %4169 = vtanh.f32 %v5117_v53 }
0x3dd1   :  { %v4170_v24 = vpop.eup %4169 }
0x3dd2   :  { %2498 = vrot.lane.b32.xlu0 %v4170_v24, %s4267_s30 }
0x3e44   :  { %v2499_v1 = vpop.permute.xlu0 %2498 }
0x3e45   :  { %v5121_v52 = vmul.f32 %v4168_v18, %v2499_v1 }
0x3e47   :  { %2503 = vrot.lane.b32.xlu1 %v5121_v52, %s4263_s2 }
0x3eb9   :  { %v2504_v43 = vpop.permute.xlu1 %2503 }
0x3eba   :  { %v2506_v8 = vsel %vm181_vm4, %v2504_v43, 0.0 }
0x3ebb   :  { %2507 = vadd.xlane.f32.xlu0 %v2506_v8 }
0x3f48   :  { %v2508_v56 = vpop.xlane.xlu0 %2507 }
0x3f49   :  { %v2509_v39 = vmul.f32 0.03125, %v2508_v56 }
0x3f4b   :  { %v2510_v5 = vsub.f32 %v5121_v52, %v2509_v39 }
0x3f4d   :  { %v2511_v9 = vmul.f32 %v2510_v5, %v2510_v5 }
0x3f4f   :  { %2513 = vrot.lane.b32.xlu1 %v2511_v9, %s4263_s2 }
0x3fc1   :  { %v2514_v27 = vpop.permute.xlu1 %2513 }
0x3fc2   :  { %v2516_v3 = vsel %vm181_vm4, %v2514_v27, 0.0 }
0x3fc3   :  { %2517 = vadd.xlane.f32.xlu1 %v2516_v3 }
0x4050   :  { %v2518_v12 = vpop.xlane.xlu1 %2517 }
0x4051   :  { %v2519_v62 = vmul.f32 0.03125, %v2518_v12 }
0x4053   :  { %v2520_v60 = vadd.f32 1e-05, %v2519_v62 }
0x4055   :  { %4171 = vrsqrt.f32 %v2520_v60 }
0x405f   :  { %v4172_v18 = vpop.eup %4171 }
0x4060   :  { %v2522_v38 = vmul.f32 %v4172_v18, %v2510_v5 }
0x4062   :  { %v2523_v54 = vmul.f32 %v2522_v38, %v4504_v44 }
0x4064   :  { %v5131_v59 = vadd.f32 %v2523_v54, %v4506_v46 }
0x4066   :  { %v2525_v63 = vpack.c.bf16 %v5131_v59, %v5131_v59 }
0x4068   :  { %2527 = vrot.lane.b32.xlu0 %v2525_v63, %s4263_s2 }
0x40da   :  { %v2528_v0 = vpop.permute.xlu0 %2527 }
0x40db   :  { %3924 = vmatmul.mubr.msk.bf16.vlgmr.msra.gmra.mrb[44].mxu1 %vm261_vm5, %v2528_v0 }
0x40dc   :  { %3936 = vmatpush3.bf16.msra.mxu1 %v4987_v37  ;;  %3947 = vmatprep.mubr.msk.bf16.mxu1 %vm4259_vm0, %v5463_v45 }
0x40dd   :  { %3937 = vmatprep.subr.bf16.mxu1 %v5463_v45 }
0x40e0   :  { %3938 = vmatpush3.bf16.msra.mxu1 %v4996_v40 }
0x40e1   :  { %3939 = vmatprep.subr.bf16.mxu1 %v5463_v45 }
0x40e4   :  { %3940 = vmatpush3.bf16.msra.mxu1 %v5003_v16 }
0x40e5   :  { %3941 = vmatprep.subr.bf16.mxu1 %v5463_v45 }
0x40e8   :  { %3942 = vmatpush3.bf16.msra.mxu1 %v5010_v42 }
0x40e9   :  { %3943 = vmatprep.subr.bf16.mxu1 %v5463_v45 }
0x40ec   :  { %3944 = vmatpush3.bf16.msra.mxu1 %v5017_v25 }
0x40ed   :  { %3945 = vmatprep.subr.bf16.mxu1 %v5463_v45 }
0x40f0   :  { %3946 = vmatpush3.bf16.msra.mxu1 %v5024_v49 }
0x40f1   :  { %3971 = vmatprep.subr.bf16.mxu1 %v5463_v45 }
0x41ae   :  { %v2566_v24 = vpop.f32.mrb[44].mxu1 }
0x41af   :  { %v2579_v1 = vrot.slane %v2566_v24, %v4519_v57  ;;  %v3925_v43 = vpop.f32.mrb[45].mxu1 }
0x41b0   :  { %v2569_v8 = vpop.f32.mrb[46].mxu1 }
0x41b1   :  { %v2580_v56 = vcombine.high %v2579_v1, %v2579_v1  ;;  %v2587_v39 = vrot.slane %v2579_v1, %v4519_v57  ;;  %v3926_v5 = vpop.f32.mrb[47].mxu1 }
0x41b3   :  { %v2594_v9 = vrot.slane %v2580_v56, %v4519_v57  ;;  %v2598_v27 = vrot.slane %v2587_v39, %v4336_v20 }
0x41b5   :  { %v2605_v3 = vmul.f32 %v2598_v27, %v4449_v30  ;;  %v2602_v12 = vrot.slane %v2594_v9, %v4336_v20 }
0x41b7   :  { %v2607_v62 = vsel %vm261_vm5, %v2605_v3, 0.0  ;;  %v2606_v60 = vmul.f32 %v2602_v12, %v4451_v32 }
0x41b8   :  { %2608 = vadd.xlane.f32.xlu1 %v2607_v62 }
0x41b9   :  { %v2610_v18 = vsel %vm261_vm5, %v2606_v60, 0.0 }
0x41bc   :  { %2611 = vadd.xlane.f32.xlu1 %v2610_v18 }
0x4245   :  { %v2609_v38 = vpop.xlane.xlu1 %2608 }
0x4246   :  { %v2613_v54 = vmul.f32 0.17677669, %v2609_v38 }
0x4248   :  { %v2620_v24 = vrot.slane %v2613_v54, %v4532_v15 }
0x4249   :  { %v2612_v63 = vpop.xlane.xlu1 %2611 }
0x424a   :  { %v2614_v0 = vmul.f32 0.17677669, %v2612_v63 }
0x424c   :  { %v2624_v1 = vrot.slane %v2614_v0, %v4532_v15 }
0x424e   :  { %v2625_v43 = vsel %vm712_vm9, %v2624_v1, %v2620_v24 }
0x424f   :  { %v2627_v8 = vsel %vm715_vm10, %v2625_v43, -inf }
0x4250   :  { %2628 = vmax.xlane.f32.xlu1 %v2627_v8 }
0x42dd   :  { %v2629_v56 = vpop.xlane.xlu1 %2628 }
0x42de   :  { %v2634_v39 = vrot.slane %v2629_v56, %v4336_v20  ;;  %v2638_v5 = vrot.slane %v2629_v56, %v4339_v21 }
0x42e0   :  { %v2641_v9 = vsub.f32 %v2613_v54, %v2634_v39  ;;  %v2642_v27 = vsub.f32 %v2614_v0, %v2638_v5 }
0x42e2   :  { %v2643_v3 = vmul.f32 1.442695, %v2641_v9  ;;  %v2645_v12 = vmul.f32 1.442695, %v2642_v27 }
0x42e4   :  { %4173 = vpow2.f32 %v2643_v3 }
0x42e5   :  { %4175 = vpow2.f32 %v2645_v12 }
0x42ee   :  { %v4174_v62 = vpop.eup %4173 }
0x42ef   :  { %v4176_v60 = vpop.eup %4175  ;;  %2650 = vperm.xlu0 %4016, %v4174_v62  }
0x42f0   :  { %2653 = vperm.xlu1 %4015, %v4176_v60  }
0x436e   :  { %v2651_v18 = vpop.permute.xlu0 %2650 }
0x436f   :  { %v2654_v38 = vpop.permute.xlu1 %2653  ;;  %v2658_v63 = vrot.slane %v2651_v18, %v4532_v15 }
0x4370   :  { %v2662_v24 = vrot.slane %v2654_v38, %v4532_v15 }
0x4372   :  { %v2663_v1 = vsel %vm712_vm9, %v2662_v24, %v2658_v63 }
0x4373   :  { %v2665_v43 = vsel %vm715_vm10, %v2663_v1, 0.0 }
0x4374   :  { %2666 = vadd.xlane.f32.xlu0 %v2665_v43 }
0x4401   :  { %v2667_v54 = vpop.xlane.xlu0 %2666 }
0x4402   :  { %4177 = vrcp.f32 %v2667_v54 }
0x440c   :  { %v4178_v0 = vpop.eup %4177 }
0x440d   :  { %v2673_v8 = vrot.slane %v4178_v0, %v4336_v20  ;;  %v2677_v39 = vrot.slane %v4178_v0, %v4339_v21 }
0x440f   :  { %v2680_v56 = vmul.f32 %v4174_v62, %v2673_v8  ;;  %v2681_v5 = vmul.f32 %v4176_v60, %v2677_v39 }
0x4411   :  { %2684 = vperm.xlu1 %4015, %v2680_v56  }
0x4415   :  { %2689 = vperm.xlu1 %4015, %v2681_v5  }
0x4490   :  { %v5172_v9 = vpop.permute.xlu1 %2684 }
0x4491   :  { %v2692_v27 = vmul.f32 %v5172_v9, %v4449_v30 }
0x4493   :  { %v2694_v3 = vsel %vm783_vm11, %v2692_v27, 0.0 }
0x4494   :  { %v2695_v12 = vrot.slane %v2694_v3, 4  ;;  %v5177_v18 = vpop.permute.xlu1 %2689 }
0x4495   :  { %v2693_v38 = vmul.f32 %v5177_v18, %v4451_v32 }
0x4496   :  { %v2696_v63 = vadd.f32 %v2695_v12, %v2694_v3 }
0x4497   :  { %v2701_v62 = vsel %vm783_vm11, %v2693_v38, 0.0 }
0x4498   :  { %v2697_v24 = vrot.slane %v2696_v63, 2  ;;  %v2702_v1 = vrot.slane %v2701_v62, 4 }
0x449a   :  { %v2698_v60 = vadd.f32 %v2697_v24, %v2696_v63  ;;  %v2703_v43 = vadd.f32 %v2702_v1, %v2701_v62 }
0x449c   :  { %v2699_v54 = vrot.slane %v2698_v60, 1  ;;  %v2704_v0 = vrot.slane %v2703_v43, 2 }
0x449e   :  { %v2700_v8 = vadd.f32 %v2699_v54, %v2698_v60  ;;  %v2705_v56 = vadd.f32 %v2704_v0, %v2703_v43 }
0x44a0   :  { %v2706_v39 = vrot.slane %v2705_v56, 1  ;;  %v2708_v5 = vpack.c.bf16 %v2700_v8, %v2700_v8 }
0x44a2   :  { %v2707_v27 = vadd.f32 %v2706_v39, %v2705_v56  ;;  %v2712_v11 = vunpack.c.l.b16 %v2708_v5 }
0x44a4   :  { %v2709_v14 = vpack.c.bf16 %v2707_v27, %v2707_v27 }
0x44a6   :  { %v2713_v41 = vunpack.c.l.b16 %v2709_v14 }
0x44a8   :  { %v2714_v10 = vsel %vm712_vm9, %v2713_v41, %v2712_v11 }
0x44a9   :  { %v2715_v47 = vpack.c.b16 %v2714_v10, %v2714_v10 }
0x44ab   :  { %2716 = vrot.lane.b32.xlu1 %v2715_v47, %s4261_s27 }
0x451d   :  { %v2717_v3 = vpop.permute.xlu1 %2716 }
0x451e   :  { %3932 = vmatmul.mubr.msk.bf16.vlgmr.msra.gmra.mrb[44].mxu0 %vm261_vm5, %v2717_v3 }
0x451f   :  { %3952 = vmatpush3.bf16.msra.mxu0 %v4874_v7  ;;  %3959 = vmatprep.mubr.msk.bf16.mxu0 %vm4259_vm0, %v5463_v45 }
0x4520   :  { %3953 = vmatprep.subr.bf16.mxu0 %v5463_v45 }
0x4523   :  { %3954 = vmatpush3.bf16.msra.mxu0 %v4883_v48 }
0x4524   :  { %3955 = vmatprep.subr.bf16.mxu0 %v5463_v45 }
0x4527   :  { %3956 = vmatpush3.bf16.msra.mxu0 %v4890_v36 }
0x4528   :  { %3957 = vmatprep.subr.bf16.mxu0 %v5463_v45 }
0x452b   :  { %3958 = vmatpush3.bf16.msra.mxu0 %v4897_v22 }
0x452c   :  { %3963 = vmatprep.subr.bf16.mxu0 %v5463_v45 }
0x45f1   :  { %v2755_v10 = vpop.f32.mrb[44].mxu0 }
0x45f2   :  { %4179 = vtanh.f32 %v2755_v10  ;;  %v3933_v41 = vpop.f32.mrb[45].mxu0 }
0x45f3   :  { %v2758_v14 = vpop.f32.mrb[46].mxu0 }
0x45f4   :  { %v3934_v47 = vpop.f32.mrb[47].mxu0 }
0x45fc   :  { %v4180_v7 = vpop.eup %4179 }
0x45fd   :  { %v2762_v11 = vsel %vm181_vm4, %v4180_v7, 0.0 }
0x45fe   :  { %2763 = vadd.xlane.f32.xlu1 %v2762_v11 }
0x468b   :  { %v2764_v48 = vpop.xlane.xlu1 %2763 }
0x468c   :  { %v2765_v12 = vmul.f32 0.03125, %v2764_v48 }
0x468e   :  { %v2766_v38 = vsub.f32 %v4180_v7, %v2765_v12 }
0x4690   :  { %v2767_v63 = vmul.f32 %v2766_v38, %v2766_v38 }
0x4692   :  { %v2768_v36 = vsel %vm181_vm4, %v2767_v63, 0.0 }
0x4693   :  { %2769 = vadd.xlane.f32.xlu0 %v2768_v36 }
0x46a9   :  { %2778 = vrot.lane.b32.xlu0 %v5131_v59, %s4261_s27 }
0x4720   :  { %v2770_v22 = vpop.xlane.xlu0 %2769 }
0x4721   :  { %v2771_v62 = vmul.f32 0.03125, %v2770_v22 }
0x4723   :  { %v2772_v24 = vadd.f32 1e-05, %v2771_v62 }
0x4724   :  { %v2779_v0 = vpop.permute.xlu0 %2778 }
0x4725   :  { %4181 = vrsqrt.f32 %v2772_v24 }
0x472f   :  { %v4182_v1 = vpop.eup %4181 }
0x4730   :  { %v2774_v60 = vmul.f32 %v4182_v1, %v2766_v38 }
0x4732   :  { %v2775_v43 = vmul.f32 %v2774_v60, %v4631_v26 }
0x4734   :  { %v2776_v54 = vadd.f32 %v2775_v43, %v4636_v31 }
0x4736   :  { %v2781_v8 = vsel %vm261_vm5, %v2776_v54, %v2779_v0 }
0x4737   :  { %v2782_v56 = vsel %vm485_vm12, %v2781_v8, %v5098_v33 }
0x4738   :  { %v2783_v39 = vpack.c.bf16 %v2782_v56, %v2782_v56 }
0x473a   :  { %3948 = vmatmul.mubr.msk.bf16.vlgmr.msra.gmra.mrb[48].mxu1 %vm950_vm13, %v2783_v39 }
0x473b   :  { %3972 = vmatpush3.bf16.msra.mxu1 %v4914_v29  ;;  %3975 = vmatprep.mubr.msk.bf16.mxu1 %vm4259_vm0, %v5463_v45 }
0x473c   :  { %3973 = vmatprep.subr.bf16.mxu1 %v5463_v45 }
0x473f   :  { %3974 = vmatpush3.bf16.msra.mxu1 %v4923_v6 }
0x4740   :  { %3995 = vmatprep.subr.bf16.mxu1 %v5463_v45 }
0x480d   :  { %v2821_v59 = vpop.f32.mrb[48].mxu1 }
0x480e   :  { %v2822_v5 = vadd.f32 %v2821_v59, %v4652_v51  ;;  %v3949_v27 = vpop.f32.mrb[49].mxu1 }
0x480f   :  { %v2824_v3 = vpop.f32.mrb[50].mxu1 }
0x4810   :  { %4183 = vtanh.f32 %v2822_v5  ;;  %v3950_v10 = vpop.f32.mrb[51].mxu1  ;;  %v3561_v29 = vmul.f32 -1.442695, %v2822_v5  ;;  %v2935_v3 = vrot.slane %v5117_v53, 6 }
0x4812   :  { %4185 = vpow2.f32 %v3561_v29 }
0x481a   :  { %v4184_v41 = vpop.eup %4183 }
0x481b   :  { %2836 = vrot.lane.b32.xlu0 %v4184_v41, %s4267_s30 }
0x481c   :  { %v4186_v14 = vpop.eup %4185 }
0x481d   :  { %v2830_v47 = vadd.f32 1.0, %v4186_v14 }
0x481f   :  { %4187 = vrcp.f32 %v2830_v47 }
0x4829   :  { %v4188_v7 = vpop.eup %4187 }
0x482a   :  { %v2834_v48 = vmul.f32 %v4188_v7, %v5094_v2 }
0x488d   :  { %v2837_v11 = vpop.permute.xlu0 %2836 }
0x488e   :  { %v2839_v6 = vmul.f32 %v4188_v7, %v2837_v11 }
0x4890   :  { %2841 = vrot.lane.b32.xlu0 %v2839_v6, %s4267_s30 }
0x4902   :  { %v2842_v12 = vpop.permute.xlu0 %2841 }
0x4903   :  { %v5215_v38 = vadd.f32 %v2842_v12, %v2834_v48 }
0x4905   :  { %4189 = vtanh.f32 %v5215_v38 }
0x490f   :  { %v4190_v63 = vpop.eup %4189 }
0x4910   :  { %2847 = vrot.lane.b32.xlu1 %v4190_v63, %s4267_s30 }
0x4982   :  { %v2848_v36 = vpop.permute.xlu1 %2847 }
0x4983   :  { %v5219_v22 = vmul.f32 %v4188_v7, %v2848_v36 }
0x4985   :  { %2852 = vrot.lane.b32.xlu0 %v5219_v22, %s4263_s2 }
0x4989   :  { %2875 = vrot.lane.b32.xlu0 %v5121_v52, %s4261_s27 }
0x49f7   :  { %v5225_v62 = vpop.permute.xlu0 %2852 }
0x49fb   :  { %v2876_v2 = vpop.permute.xlu0 %2875 }
0x49fc   :  { %v2878_v24 = vsel %vm261_vm5, %v5225_v62, %v2876_v2 }
0x49fd   :  { %v2879_v1 = vpack.c.bf16 %v2878_v24, %v2878_v24 }
0x49ff   :  { %3960 = vmatmul.mubr.msk.bf16.vlgmr.msra.gmra.mrb[48].mxu0 %vm485_vm12, %v2879_v1 }
0x4a00   :  { %3964 = vmatpush3.bf16.msra.mxu0 %v4949_v13  ;;  %3967 = vmatprep.mubr.msk.bf16.mxu0 %vm4259_vm0, %v5463_v45 }
0x4a01   :  { %3965 = vmatprep.subr.bf16.mxu0 %v5463_v45 }
0x4a04   :  { %3966 = vmatpush3.bf16.msra.mxu0 %v4958_v4 }
0x4a05   :  { %3979 = vmatprep.subr.bf16.mxu0 %v5463_v45 }
0x4ad2   :  { %v2917_v52 = vpop.f32.mrb[48].mxu0 }
0x4ad3   :  { %v2924_v60 = vrot.slane %v2917_v52, 6  ;;  %v3961_v43 = vpop.f32.mrb[49].mxu0 }
0x4ad4   :  { %v2920_v54 = vpop.f32.mrb[50].mxu0 }
0x4ad5   :  { %v2926_v0 = vadd.f32 %v2924_v60, %v4460_v55  ;;  %v3962_v8 = vpop.f32.mrb[51].mxu0 }
0x4ad7   :  { %4191 = vtanh.f32 %v2926_v0  ;;  %v3563_v13 = vmul.f32 -1.442695, %v2926_v0 }
0x4ad9   :  { %4193 = vpow2.f32 %v3563_v13 }
0x4ae1   :  { %v4192_v56 = vpop.eup %4191 }
0x4ae2   :  { %2939 = vrot.lane.b32.xlu0 %v4192_v56, %s4267_s30 }
0x4ae3   :  { %v4194_v39 = vpop.eup %4193 }
0x4ae4   :  { %v2930_v59 = vadd.f32 1.0, %v4194_v39 }
0x4ae6   :  { %4195 = vrcp.f32 %v2930_v59 }
0x4af0   :  { %v4196_v5 = vpop.eup %4195 }
0x4af1   :  { %v2937_v10 = vmul.f32 %v4196_v5, %v2935_v3 }
0x4b54   :  { %v2940_v4 = vpop.permute.xlu0 %2939 }
0x4b55   :  { %v2942_v27 = vmul.f32 %v4196_v5, %v2940_v4 }
0x4b57   :  { %2944 = vrot.lane.b32.xlu0 %v2942_v27, %s4267_s30 }
0x4bc9   :  { %v2945_v41 = vpop.permute.xlu0 %2944 }
0x4bca   :  { %v2947_v55 = vadd.f32 %v2945_v41, %v2937_v10 }
0x4bcc   :  { %4197 = vtanh.f32 %v2947_v55 }
0x4bd6   :  { %v4198_v29 = vpop.eup %4197 }
0x4bd7   :  { %2950 = vrot.lane.b32.xlu1 %v4198_v29, %s4267_s30 }
0x4c49   :  { %v2951_v14 = vpop.permute.xlu1 %2950 }
0x4c4a   :  { %v2953_v47 = vmul.f32 %v4196_v5, %v2951_v14 }
0x4c4c   :  { %2955 = vrot.lane.b32.xlu0 %v2953_v47, %s4263_s2 }
0x4cbe   :  { %v2956_v7 = vpop.permute.xlu0 %2955 }
0x4cbf   :  { %v2958_v11 = vsel %vm1141_vm14, %v2956_v7, 0.0 }
0x4cc0   :  { %2959 = vadd.xlane.f32.xlu1 %v2958_v11 }
0x4d4d   :  { %v2960_v6 = vpop.xlane.xlu1 %2959 }
0x4d4e   :  { %v2961_v48 = vmul.f32 0.03125, %v2960_v6 }
0x4d50   :  { %v2962_v12 = vsub.f32 %v2953_v47, %v2961_v48 }
0x4d52   :  { %v2963_v63 = vmul.f32 %v2962_v12, %v2962_v12 }
0x4d54   :  { %2965 = vrot.lane.b32.xlu0 %v2963_v63, %s4263_s2 }
0x4dc6   :  { %v2966_v53 = vpop.permute.xlu0 %2965 }
0x4dc7   :  { %v2968_v36 = vsel %vm1141_vm14, %v2966_v53, 0.0 }
0x4dc8   :  { %2969 = vadd.xlane.f32.xlu0 %v2968_v36 }
0x4e55   :  { %v2970_v2 = vpop.xlane.xlu0 %2969 }
0x4e56   :  { %v2971_v24 = vmul.f32 0.03125, %v2970_v2 }
0x4e58   :  { %v2972_v1 = vadd.f32 1e-05, %v2971_v24 }
0x4e5a   :  { %4199 = vrsqrt.f32 %v2972_v1 }
0x4e64   :  { %v4200_v52 = vpop.eup %4199 }
0x4e65   :  { %v2974_v60 = vmul.f32 %v4200_v52, %v2962_v12 }
0x4e67   :  { %v2975_v43 = vmul.f32 %v2974_v60, %v4504_v44 }
0x4e69   :  { %v5247_v54 = vadd.f32 %v2975_v43, %v4506_v46 }
0x4e6b   :  { %v2977_v0 = vpack.c.bf16 %v5247_v54, %v5247_v54 }
0x4e6d   :  { %v2979_v8 = vrot.slane %v2977_v0, 1 }
0x4e6f   :  { %2980 = vrot.lane.b32.xlu0 %v2979_v8, %s4263_s2 }
0x4ee1   :  { %v2981_v56 = vpop.permute.xlu0 %2980 }
0x4ee2   :  { %3968 = vmatmul.mubr.msk.bf16.vlgmr.msra.gmra.mrb[52].mxu0 %vm261_vm5, %v2981_v56 }
0x4ee3   :  { %3980 = vmatpush3.bf16.msra.mxu0 %v4987_v37  ;;  %3991 = vmatprep.mubr.msk.bf16.mxu0 %vm4259_vm0, %v5463_v45 }
0x4ee4   :  { %3981 = vmatprep.subr.bf16.mxu0 %v5463_v45 }
0x4ee7   :  { %3982 = vmatpush3.bf16.msra.mxu0 %v4996_v40 }
0x4ee8   :  { %3983 = vmatprep.subr.bf16.mxu0 %v5463_v45 }
0x4eeb   :  { %3984 = vmatpush3.bf16.msra.mxu0 %v5003_v16 }
0x4eec   :  { %3985 = vmatprep.subr.bf16.mxu0 %v5463_v45 }
0x4eef   :  { %3986 = vmatpush3.bf16.msra.mxu0 %v5010_v42 }
0x4ef0   :  { %3987 = vmatprep.subr.bf16.mxu0 %v5463_v45 }
0x4ef3   :  { %3988 = vmatpush3.bf16.msra.mxu0 %v5017_v25 }
0x4ef4   :  { %3989 = vmatprep.subr.bf16.mxu0 %v5463_v45 }
0x4ef7   :  { %3990 = vmatpush3.bf16.msra.mxu0 %v5024_v49 }
0x4fb5   :  { %v3019_v44 = vpop.f32.mrb[52].mxu0 }
0x4fb6   :  { %v3032_v46 = vrot.slane %v3019_v44, %v4519_v57  ;;  %v3969_v37 = vpop.f32.mrb[53].mxu0 }
0x4fb7   :  { %v3022_v40 = vpop.f32.mrb[54].mxu0 }
0x4fb8   :  { %v3033_v13 = vcombine.high %v3032_v46, %v3032_v46  ;;  %v3040_v16 = vrot.slane %v3032_v46, %v4519_v57  ;;  %v3970_v39 = vpop.f32.mrb[55].mxu0 }
0x4fb9   :  { %v3463_v39 = vrot.slane %v5177_v18, %v4532_v15 }
0x4fba   :  { %v3047_v59 = vrot.slane %v3033_v13, %v4519_v57  ;;  %v3051_v42 = vrot.slane %v3040_v16, %v4336_v20 }
0x4fbc   :  { %v3058_v5 = vmul.f32 %v3051_v42, %v4449_v30  ;;  %v3055_v25 = vrot.slane %v3047_v59, %v4336_v20 }
0x4fbe   :  { %v3060_v4 = vsel %vm261_vm5, %v3058_v5, 0.0  ;;  %v3059_v49 = vmul.f32 %v3055_v25, %v4451_v32  ;;  %v3459_v25 = vrot.slane %v5172_v9, %v4532_v15 }
0x4fbf   :  { %3061 = vadd.xlane.f32.xlu1 %v3060_v4 }
0x4fc0   :  { %v3063_v27 = vsel %vm261_vm5, %v3059_v49, 0.0 }
0x4fc3   :  { %3064 = vadd.xlane.f32.xlu1 %v3063_v27  ;;  %v3464_v27 = vsel %vm712_vm9, %v3463_v39, %v3459_v25 }
0x504c   :  { %v3062_v3 = vpop.xlane.xlu1 %3061 }
0x504d   :  { %v3066_v10 = vmul.f32 0.17677669, %v3062_v3 }
0x504f   :  { %v3073_v57 = vrot.slane %v3066_v10, %v4532_v15 }
0x5050   :  { %v3065_v41 = vpop.xlane.xlu1 %3064 }
0x5051   :  { %v3067_v55 = vmul.f32 0.17677669, %v3065_v41 }
0x5053   :  { %v3077_v29 = vrot.slane %v3067_v55, %v4532_v15 }
0x5055   :  { %v3078_v14 = vsel %vm712_vm9, %v3077_v29, %v3073_v57 }
0x5056   :  { %v3080_v47 = vsel %vm715_vm10, %v3078_v14, -inf }
0x5057   :  { %3081 = vmax.xlane.f32.xlu1 %v3080_v47 }
0x50e4   :  { %v3082_v7 = vpop.xlane.xlu1 %3081 }
0x50e5   :  { %v3087_v11 = vrot.slane %v3082_v7, %v4336_v20  ;;  %v3091_v6 = vrot.slane %v3082_v7, %v4339_v21 }
0x50e7   :  { %v3094_v48 = vsub.f32 %v3066_v10, %v3087_v11  ;;  %v3095_v12 = vsub.f32 %v3067_v55, %v3091_v6 }
0x50e9   :  { %v3096_v63 = vmul.f32 1.442695, %v3094_v48  ;;  %v3098_v53 = vmul.f32 1.442695, %v3095_v12 }
0x50eb   :  { %4201 = vpow2.f32 %v3096_v63 }
0x50ec   :  { %4203 = vpow2.f32 %v3098_v53 }
0x50f5   :  { %v4202_v36 = vpop.eup %4201 }
0x50f6   :  { %v4204_v2 = vpop.eup %4203  ;;  %3103 = vperm.xlu1 %4015, %v4202_v36  }
0x50f7   :  { %3106 = vperm.xlu0 %4016, %v4204_v2  }
0x5175   :  { %v3104_v24 = vpop.permute.xlu1 %3103 }
0x5176   :  { %v3107_v1 = vpop.permute.xlu0 %3106  ;;  %v3111_v52 = vrot.slane %v3104_v24, %v4532_v15 }
0x5177   :  { %v3115_v60 = vrot.slane %v3107_v1, %v4532_v15 }
0x5179   :  { %v3116_v43 = vsel %vm712_vm9, %v3115_v60, %v3111_v52 }
0x517a   :  { %v3118_v0 = vsel %vm715_vm10, %v3116_v43, 0.0 }
0x517b   :  { %3119 = vadd.xlane.f32.xlu0 %v3118_v0 }
0x5208   :  { %v3120_v8 = vpop.xlane.xlu0 %3119 }
0x5209   :  { %4205 = vrcp.f32 %v3120_v8 }
0x5213   :  { %v4206_v56 = vpop.eup %4205 }
0x5214   :  { %v3126_v44 = vrot.slane %v4206_v56, %v4336_v20  ;;  %v3130_v37 = vrot.slane %v4206_v56, %v4339_v21 }
0x5216   :  { %v3133_v46 = vmul.f32 %v4202_v36, %v3126_v44  ;;  %v3134_v40 = vmul.f32 %v4204_v2, %v3130_v37  ;;  %v3231_v37 = vrot.slane %v5247_v54, 2 }
0x5218   :  { %3137 = vperm.xlu1 %4015, %v3133_v46  }
0x521c   :  { %3142 = vperm.xlu1 %4015, %v3134_v40  }
0x5297   :  { %v3138_v13 = vpop.permute.xlu1 %3137 }
0x5298   :  { %v3145_v16 = vmul.f32 %v3138_v13, %v4449_v30  ;;  %v3469_v20 = vrot.slane %v3138_v13, %v4532_v15 }
0x529a   :  { %v3147_v59 = vsel %vm783_vm11, %v3145_v16, 0.0 }
0x529b   :  { %v3148_v42 = vrot.slane %v3147_v59, 4  ;;  %v3143_v5 = vpop.permute.xlu1 %3142 }
0x529c   :  { %v3146_v21 = vmul.f32 %v3143_v5, %v4451_v32  ;;  %v3473_v4 = vrot.slane %v3143_v5, %v4532_v15 }
0x529d   :  { %v3149_v49 = vadd.f32 %v3148_v42, %v3147_v59 }
0x529e   :  { %v3154_v30 = vsel %vm783_vm11, %v3146_v21, 0.0  ;;  %v3474_v18 = vsel %vm3431_vm2, %v3473_v4, %v3469_v20 }
0x529f   :  { %v3150_v3 = vrot.slane %v3149_v49, 2  ;;  %v3155_v10 = vrot.slane %v3154_v30, 4  ;;  %v5300_v41 = vsel %vm379_vm6, %v3464_v27, %v3474_v18 }
0x52a1   :  { %v3151_v9 = vadd.f32 %v3150_v3, %v3149_v49  ;;  %v3156_v55 = vadd.f32 %v3155_v10, %v3154_v30 }
0x52a3   :  { %v3152_v57 = vrot.slane %v3151_v9, 1  ;;  %v3157_v29 = vrot.slane %v3156_v55, 2 }
0x52a5   :  { %v3153_v32 = vadd.f32 %v3152_v57, %v3151_v9  ;;  %v3158_v14 = vadd.f32 %v3157_v29, %v3156_v55 }
0x52a7   :  { %v3159_v47 = vrot.slane %v3158_v14, 1  ;;  %v3161_v7 = vpack.c.bf16 %v3153_v32, %v3153_v32 }
0x52a9   :  { %v3160_v11 = vadd.f32 %v3159_v47, %v3158_v14  ;;  %v3165_v48 = vunpack.c.l.b16 %v3161_v7 }
0x52ab   :  { %v3162_v6 = vpack.c.bf16 %v3160_v11, %v3160_v11  ;;  %v1949_v11 = vsel %vm181_vm4, %v4941_v58, 0.0 }
0x52ad   :  { %v3166_v12 = vunpack.c.l.b16 %v3162_v6  ;;  %v1022_v6 = vsel %vm181_vm4, %v4667_v23, 0.0 }
0x52af   :  { %v3167_v63 = vsel %vm712_vm9, %v3166_v12, %v3165_v48  ;;  %v2855_v48 = vsel %vm181_vm4, %v5225_v62, 0.0 }
0x52b0   :  { %v3168_v53 = vpack.c.b16 %v3167_v63, %v3167_v63 }
0x52b2   :  { %3169 = vrot.lane.b32.xlu1 %v3168_v53, %s4261_s27 }
0x5324   :  { %v3170_v36 = vpop.permute.xlu1 %3169 }
0x5325   :  { %3976 = vmatmul.mubr.msk.bf16.vlgmr.msra.gmra.mrb[52].mxu1 %vm261_vm5, %v3170_v36 }
0x5326   :  { %3999 = vmatprep.mubr.msk.bf16.mxu1 %vm4259_vm0, %v5463_v45  ;;  %vm3442_vm0 = vcmask 1045509  }
0x53f8   :  { %v3208_v2 = vpop.f32.mrb[52].mxu1 }
0x53f9   :  { %4207 = vtanh.f32 %v3208_v2  ;;  %v3977_v24 = vpop.f32.mrb[53].mxu1 }
0x53fa   :  { %v3211_v1 = vpop.f32.mrb[54].mxu1 }
0x53fb   :  { %v3978_v52 = vpop.f32.mrb[55].mxu1 }
0x5403   :  { %v4208_v60 = vpop.eup %4207 }
0x5404   :  { %v3215_v43 = vsel %vm181_vm4, %v4208_v60, 0.0 }
0x5405   :  { %3216 = vadd.xlane.f32.xlu1 %v3215_v43 }
0x5492   :  { %v3217_v0 = vpop.xlane.xlu1 %3216 }
0x5493   :  { %v3218_v8 = vmul.f32 0.03125, %v3217_v0 }
0x5495   :  { %v3219_v56 = vsub.f32 %v4208_v60, %v3218_v8 }
0x5497   :  { %v3220_v44 = vmul.f32 %v3219_v56, %v3219_v56 }
0x5499   :  { %v3221_v46 = vsel %vm181_vm4, %v3220_v44, 0.0 }
0x549a   :  { %3222 = vadd.xlane.f32.xlu0 %v3221_v46 }
0x54b0   :  { %3232 = vrot.lane.b32.xlu0 %v3231_v37, %s4261_s27 }
0x5527   :  { %v3223_v40 = vpop.xlane.xlu0 %3222 }
0x5528   :  { %v3224_v13 = vmul.f32 0.03125, %v3223_v40 }
0x552a   :  { %v3225_v16 = vadd.f32 1e-05, %v3224_v13 }
0x552b   :  { %v3233_v25 = vpop.permute.xlu0 %3232 }
0x552c   :  { %4209 = vrsqrt.f32 %v3225_v16 }
0x5536   :  { %v4210_v39 = vpop.eup %4209 }
0x5537   :  { %v3227_v59 = vmul.f32 %v4210_v39, %v3219_v56 }
0x5539   :  { %v3228_v42 = vmul.f32 %v3227_v59, %v4631_v26  ;;  %v1493_v26 = vsel %vm181_vm4, %v4790_v34, 0.0 }
0x553b   :  { %v3229_v5 = vadd.f32 %v3228_v42, %v4636_v31 }
0x553d   :  { %v3235_v20 = vsel %vm261_vm5, %v3229_v5, %v3233_v25 }
0x553e   :  { %v3236_v21 = vsel %vm485_vm12, %v3235_v20, %v5219_v22 }
0x553f   :  { %v3237_v4 = vpack.c.bf16 %v3236_v21, %v3236_v21 }
0x5541   :  { %3992 = vmatmul.mubr.msk.bf16.vlgmr.msra.gmra.mrb[56].mxu0 %vm950_vm13, %v3237_v4 }
0x5614   :  { %v3275_v54 = vpop.f32.mrb[56].mxu0 }
0x5615   :  { %v3276_v49 = vadd.f32 %v3275_v54, %v4652_v51  ;;  %v3993_v30 = vpop.f32.mrb[57].mxu0  ;;  %v5377_v54 = vld [vmem:[%s5440_s4 + $0x8] sm:$0xff] }
0x5616   :  { %v3278_v27 = vpop.f32.mrb[58].mxu0 }
0x5617   :  { %4211 = vtanh.f32 %v3276_v49  ;;  %v3994_v18 = vpop.f32.mrb[59].mxu0  ;;  %v3567_v31 = vmul.f32 -1.442695, %v3276_v49  ;;  %v5464_v49 = vsub.s32 5, %v4333_v19 }
0x5619   :  { %4213 = vpow2.f32 %v3567_v31  ;;  %v1051_v30 = vrot.slane %v5377_v54, %v5464_v49  ;;  %v4041_v31 = vld [vmem:[%s5439_s3 + $0xa0] sm:$0xff]  }
0x561a   :  { %3996 = vmatpush3.bf16.msra.mxu1 %v4041_v31 }
0x561b   :  { %3997 = vmatprep.subr.bf16.mxu1 %v5463_v45 }
0x5621   :  { %v4212_v3 = vpop.eup %4211 }
0x5622   :  { %3290 = vrot.lane.b32.xlu1 %v4212_v3, %s4267_s30  ;;  %v5465_v3 = vsub.s32 4, %v4333_v19 }
0x5623   :  { %v4214_v10 = vpop.eup %4213 }
0x5624   :  { %v3284_v9 = vadd.f32 1.0, %v4214_v10  ;;  %v4042_v10 = vld [vmem:[%s5439_s3 + $0xa8] sm:$0xff]   ;;  %s4269_s3 = smov 48  }
0x5625   :  { %3998 = vmatpush3.bf16.msra.mxu1 %v4042_v10 }
0x5626   :  { %4215 = vrcp.f32 %v3284_v9 }
0x5630   :  { %v4216_v55 = vpop.eup %4215 }
0x5631   :  { %v3288_v51 = vmul.f32 %v4216_v55, %v5215_v38  ;;  %v2405_v38 = vsel %vm181_vm4, %v5102_v35, 0.0 }
0x5646   :  { %1494 = vadd.xlane.f32.xlu1 %v1493_v26  ;;  %v1042_v26 = vrot.slane %v5377_v54, %v5465_v3 }
0x5694   :  { %v3291_v57 = vpop.permute.xlu1 %3290 }
0x5695   :  { %v3293_v29 = vmul.f32 %v4216_v55, %v3291_v57 }
0x5697   :  { %3295 = vrot.lane.b32.xlu0 %v3293_v29, %s4267_s30 }
0x56d3   :  { %v1495_v53 = vpop.xlane.xlu1 %1494 }
0x56d4   :  { %v1496_v36 = vmul.f32 0.03125, %v1495_v53 }
0x56d6   :  { %v5335_v58 = vsub.f32 %v4786_v28, %v1496_v36 }
0x56d8   :  { %v1498_v23 = vmul.f32 %v5335_v58, %v5335_v58 }
0x5709   :  { %v3296_v32 = vpop.permute.xlu0 %3295 }
0x570a   :  { %v3298_v14 = vadd.f32 %v3296_v32, %v3288_v51 }
0x570c   :  { %4217 = vtanh.f32 %v3298_v14 }
0x5716   :  { %v4218_v47 = vpop.eup %4217 }
0x5717   :  { %3301 = vrot.lane.b32.xlu0 %v4218_v47, %s4267_s30 }
0x5789   :  { %v3302_v34 = vpop.permute.xlu0 %3301 }
0x578a   :  { %v3304_v7 = vmul.f32 %v4216_v55, %v3302_v34 }
0x578c   :  { %3306 = vrot.lane.b32.xlu0 %v3304_v7, %s4263_s2 }
0x57ab   :  { %1950 = vadd.xlane.f32.xlu0 %v1949_v11 }
0x57af   :  { %1023 = vadd.xlane.f32.xlu0 %v1022_v6 }
0x57b3   :  { %2406 = vadd.xlane.f32.xlu0 %v2405_v38 }
0x57b7   :  { %2856 = vadd.xlane.f32.xlu0 %v2855_v48 }
0x57fe   :  { %v3307_v12 = vpop.permute.xlu0 %3306 }
0x57ff   :  { %v3309_v63 = vsel %vm181_vm4, %v3307_v12, 0.0 }
0x5800   :  { %3310 = vadd.xlane.f32.xlu1 %v3309_v63 }
0x5811   :  { %1500 = vrot.lane.b32.xlu1 %v1498_v23, %s4263_s2 }
0x5838   :  { %v1951_v35 = vpop.xlane.xlu0 %1950 }
0x5839   :  { %v1952_v2 = vmul.f32 0.03125, %v1951_v35 }
0x583b   :  { %v5341_v24 = vsub.f32 %v4935_v61, %v1952_v2 }
0x583c   :  { %v1024_v62 = vpop.xlane.xlu0 %1023 }
0x583d   :  { %v1954_v1 = vmul.f32 %v5341_v24, %v5341_v24  ;;  %v1025_v52 = vmul.f32 0.03125, %v1024_v62 }
0x583f   :  { %v5346_v60 = vsub.f32 %v4661_v17, %v1025_v52  ;;  %1956 = vrot.lane.b32.xlu0 %v1954_v1, %s4263_s2 }
0x5840   :  { %v2407_v28 = vpop.xlane.xlu0 %2406 }
0x5841   :  { %v1027_v43 = vmul.f32 %v5346_v60, %v5346_v60  ;;  %v2408_v0 = vmul.f32 0.03125, %v2407_v28 }
0x5843   :  { %v5352_v8 = vsub.f32 %v5098_v33, %v2408_v0  ;;  %1029 = vrot.lane.b32.xlu1 %v1027_v43, %s4263_s2 }
0x5844   :  { %v2857_v61 = vpop.xlane.xlu0 %2856 }
0x5845   :  { %v2410_v56 = vmul.f32 %v5352_v8, %v5352_v8  ;;  %v2858_v44 = vmul.f32 0.03125, %v2857_v61 }
0x5847   :  { %v5358_v17 = vsub.f32 %v5219_v22, %v2858_v44  ;;  %2412 = vrot.lane.b32.xlu1 %v2410_v56, %s4263_s2 }
0x5849   :  { %v2860_v46 = vmul.f32 %v5358_v17, %v5358_v17 }
0x584b   :  { %2862 = vrot.lane.b32.xlu0 %v2860_v46, %s4263_s2 }
0x588d   :  { %v3311_v37 = vpop.xlane.xlu1 %3310 }
0x588e   :  { %v3312_v33 = vmul.f32 0.03125, %v3311_v37 }
0x5890   :  { %v5364_v40 = vsub.f32 %v3304_v7, %v3312_v33 }
0x5891   :  { %v1501_v16 = vpop.permute.xlu1 %1500 }
0x5892   :  { %v3314_v13 = vmul.f32 %v5364_v40, %v5364_v40  ;;  %v1503_v5 = vsel %vm181_vm4, %v1501_v16, 0.0 }
0x5894   :  { %3316 = vrot.lane.b32.xlu1 %v3314_v13, %s4263_s2 }
0x58b1   :  { %v1957_v39 = vpop.permute.xlu0 %1956 }
0x58b2   :  { %v1959_v22 = vsel %vm181_vm4, %v1957_v39, 0.0 }
0x58b3   :  { %1960 = vadd.xlane.f32.xlu0 %v1959_v22 }
0x58b5   :  { %v1030_v59 = vpop.permute.xlu1 %1029 }
0x58b6   :  { %v1032_v42 = vsel %vm181_vm4, %v1030_v59, 0.0 }
0x58b7   :  { %1033 = vadd.xlane.f32.xlu0 %v1032_v42 }
0x58b8   :  { %1504 = vadd.xlane.f32.xlu1 %v1503_v5 }
0x58b9   :  { %v2413_v25 = vpop.permute.xlu1 %2412 }
0x58ba   :  { %v2415_v20 = vsel %vm181_vm4, %v2413_v25, 0.0 }
0x58bb   :  { %2416 = vadd.xlane.f32.xlu0 %v2415_v20 }
0x58bd   :  { %v2863_v21 = vpop.permute.xlu0 %2862 }
0x58be   :  { %v2865_v4 = vsel %vm181_vm4, %v2863_v21, 0.0 }
0x58bf   :  { %2866 = vadd.xlane.f32.xlu0 %v2865_v4 }
0x58d5   :  { %1053 = vrot.lane.b32.xlu0 %v1051_v30, %s4263_s2 }
0x5906   :  { %v3317_v27 = vpop.permute.xlu1 %3316 }
0x5907   :  { %v3319_v18 = vsel %vm181_vm4, %v3317_v27, 0.0  ;;  %vm3488_vm4 = vcmask 392192  }
0x5908   :  { %3320 = vadd.xlane.f32.xlu1 %v3319_v18  ;;  %v5466_v18 = vld [vmem:[#allocation6_spill] sm:$0xff] }
0x5909   :  { %v3441_v3 = vrot.slane %v5466_v18, %v4532_v15 }
0x5919   :  { %1044 = vrot.lane.b32.xlu1 %v1042_v26, %s4263_s2 }
0x5940   :  { %v1961_v9 = vpop.xlane.xlu0 %1960 }
0x5941   :  { %v1962_v51 = vmul.f32 0.03125, %v1961_v9  ;;  %v5467_v9 = vld [vmem:[#allocation3_spill] sm:$0xff] }
0x5943   :  { %v1963_v34 = vadd.f32 1e-05, %v1962_v51  ;;  %v5469_v51 = vld [vmem:[#allocation8_spill] sm:$0xff] }
0x5944   :  { %v1034_v55 = vpop.xlane.xlu0 %1033 }
0x5945   :  { %v1505_v57 = vpop.xlane.xlu1 %1504  ;;  %v1035_v47 = vmul.f32 0.03125, %v1034_v55  ;;  %v3420_v55 = vrot.slane %v5467_v9, %v4532_v15 }
0x5946   :  { %v1506_v29 = vmul.f32 0.03125, %v1505_v57  ;;  %v5468_v57 = vld [vmem:[#allocation4_spill] sm:$0xff] }
0x5947   :  { %v1036_v6 = vadd.f32 1e-05, %v1035_v47 }
0x5948   :  { %v2417_v32 = vpop.xlane.xlu0 %2416  ;;  %v1507_v14 = vadd.f32 1e-05, %v1506_v29  ;;  %v3426_v29 = vrot.slane %v5468_v57, %v4532_v15 }
0x5949   :  { %v2418_v7 = vmul.f32 0.03125, %v2417_v32  ;;  %v3452_v32 = vrot.slane %v5469_v51, %v4532_v15 }
0x594a   :  { %4219 = vrsqrt.f32 %v1507_v14 }
0x594b   :  { %4221 = vrsqrt.f32 %v1963_v34  ;;  %v2419_v38 = vadd.f32 1e-05, %v2418_v7  ;;  %v5471_v7 = vld [vmem:[#allocation2_spill] sm:$0xff] }
0x594c   :  { %v2867_v11 = vpop.xlane.xlu0 %2866  ;;  %4223 = vrsqrt.f32 %v1036_v6 }
0x594d   :  { %v2868_v48 = vmul.f32 0.03125, %v2867_v11  ;;  %4225 = vrsqrt.f32 %v2419_v38  ;;  %v3416_v11 = vrot.slane %v5471_v7, %v4532_v15  ;;  %v5472_v38 = vld [vmem:[#allocation7_spill] sm:$0xff] }
0x594f   :  { %v2869_v45 = vadd.f32 1e-05, %v2868_v48  ;;  %v3448_v48 = vrot.slane %v5472_v38, %v4532_v15 }
0x5950   :  { %v1054_v28 = vpop.permute.xlu0 %1053 }
0x5951   :  { %4227 = vrsqrt.f32 %v2869_v45 }
0x5954   :  { %v4220_v12 = vpop.eup %4219 }
0x5955   :  { %v4222_v36 = vpop.eup %4221  ;;  %v1509_v35 = vmul.f32 %v4220_v12, %v5335_v58 }
0x5956   :  { %v4224_v62 = vpop.eup %4223  ;;  %v1965_v52 = vmul.f32 %v4222_v36, %v5341_v24 }
0x5957   :  { %v4226_v43 = vpop.eup %4225  ;;  %v1038_v61 = vmul.f32 %v4224_v62, %v5346_v60  ;;  %v5473_v62 = vsub.s32 6, %v4333_v19 }
0x5958   :  { %v2421_v46 = vmul.f32 %v4226_v43, %v5352_v8 }
0x595b   :  { %v4228_v37 = vpop.eup %4227 }
0x595c   :  { %v2871_v58 = vmul.f32 %v4228_v37, %v5358_v17 }
0x5995   :  { %v3321_v63 = vpop.xlane.xlu1 %3320 }
0x5996   :  { %v3322_v53 = vmul.f32 0.03125, %v3321_v63  ;;  %v3421_v63 = vsel %vm712_vm9, %v3420_v55, %v3416_v11  ;;  %vm3491_vm9 = vcmask 457728  }
0x5998   :  { %v3323_v23 = vadd.f32 1e-05, %v3322_v53  ;;  %v3454_v53 = vsel %vm3453_vm3, %v3452_v32, %v3448_v48 }
0x5999   :  { %v1045_v2 = vpop.permute.xlu1 %1044 }
0x599a   :  { %4229 = vrsqrt.f32 %v3323_v23  ;;  %v1510_v1 = vmul.f32 %v1509_v35, %v1045_v2  ;;  %v1966_v0 = vmul.f32 %v1965_v52, %v1045_v2  ;;  %v1047_v44 = vmul.f32 %v1045_v2, %v1038_v61 }
0x599b   :  { %v2422_v13 = vmul.f32 %v2421_v46, %v1045_v2  ;;  %v2872_v22 = vmul.f32 %v2871_v58, %v1045_v2 }
0x599c   :  { %v1511_v56 = vadd.f32 %v1510_v1, %v1054_v28  ;;  %v1967_v33 = vadd.f32 %v1966_v0, %v1054_v28  ;;  %v1056_v16 = vadd.f32 %v1054_v28, %v1047_v44  ;;  %v3353_v1 = vrot.slane %v5377_v54, %v5473_v62 }
0x599d   :  { %v2423_v59 = vadd.f32 %v2422_v13, %v1054_v28  ;;  %v2873_v60 = vadd.f32 %v2872_v22, %v1054_v28 }
0x599e   :  { %4231 = vtanh.f32 %v1511_v56 }
0x599f   :  { %4233 = vtanh.f32 %v1967_v33 }
0x59a0   :  { %4235 = vtanh.f32 %v1056_v16 }
0x59a1   :  { %4237 = vtanh.f32 %v2423_v59 }
0x59a4   :  { %v4230_v39 = vpop.eup %4229 }
0x59a5   :  { %v3325_v24 = vmul.f32 %v4230_v39, %v5364_v40  ;;  %v3430_v40 = vrot.slane %v4742_v50, %v4532_v15  ;;  %v5470_v50 = vld [vmem:[#allocation5_spill] sm:$0xff] }
0x59a6   :  { %v3437_v14 = vrot.slane %v5470_v50, %v4532_v15 }
0x59a7   :  { %v3326_v42 = vmul.f32 %v3325_v24, %v1045_v2  ;;  %v3432_v6 = vsel %vm3431_vm2, %v3430_v40, %v3426_v29 }
0x59a8   :  { %v4232_v25 = vpop.eup %4231  ;;  %v3443_v12 = vsel %vm3442_vm0, %v3441_v3, %v3437_v14  ;;  %v3476_v36 = vsel %vm379_vm6, %v3421_v63, %v3432_v6 }
0x59a9   :  { %v3327_v5 = vadd.f32 %v3326_v42, %v1054_v28  ;;  %v4234_v8 = vpop.eup %4233  ;;  %v3330_v20 = vrot.slane %v4232_v25, 6  ;;  %v3477_v23 = vsel %vm381_vm7, %v3476_v36, %v3443_v12 }
0x59aa   :  { %v4236_v21 = vpop.eup %4235  ;;  %v3333_v4 = vrot.slane %v4234_v8, 4  ;;  %v3478_v35 = vsel %vm383_vm8, %v3477_v23, %v3454_v53 }
0x59ab   :  { %4239 = vtanh.f32 %v3327_v5  ;;  %v3341_v17 = vsel %vm379_vm6, %v4236_v21, %v3330_v20  ;;  %v4238_v49 = vpop.eup %4237 }
0x59ac   :  { %4241 = vtanh.f32 %v2873_v60  ;;  %v3342_v27 = vsel %vm381_vm7, %v3341_v17, %v3333_v4  ;;  %v3336_v26 = vrot.slane %v4238_v49, 2 }
0x59ae   :  { %v3343_v47 = vsel %vm383_vm8, %v3342_v27, %v3336_v26 }
0x59b5   :  { %v4240_v30 = vpop.eup %4239 }
0x59b6   :  { %v3339_v31 = vrot.slane %v4240_v30, 6  ;;  %v4242_v10 = vpop.eup %4241 }
0x59b8   :  { %v3344_v34 = vsel %vm379_vm6, %v4242_v10, %v3339_v31 }
0x59b9   :  { %v3345_v45 = vpack.c.bf16 %v3344_v34, %v3343_v47 }
0x59bb   :  { %3355 = vrot.lane.b32.xlu1 %v3345_v45, %s4263_s2 }
0x59bf   :  { %3482 = vrot.lane.b32.xlu1 %v3478_v35, %s4269_s3 }
0x59c3   :  { %3484 = vrot.lane.b32.xlu1 %v5300_v41, %s4269_s3 }
0x5a2d   :  { %v3356_v2 = vpop.permute.xlu1 %3355 }
0x5a2e   :  { %4000 = vmatmul.mubr.msk.bf16.vlgmr.msra.gmra.mrb[56].mxu1 %vm261_vm5, %v3356_v2 }
0x5a31   :  { %v3483_v15 = vpop.permute.xlu1 %3482 }
0x5a32   :  { %v3489_v28 = vsel %vm3488_vm4, 0.0, %v3483_v15 }
0x5a33   :  { %v3492_v44 = vsel %vm3491_vm9, %v3489_v28, 0.0 }
0x5a35   :  { %v3485_v52 = vpop.permute.xlu1 %3484 }
0x5a36   :  { %v3490_v0 = vsel %vm3488_vm4, 0.0, %v3485_v52 }
0x5a37   :  { %v3493_v13 = vsel %vm3491_vm9, %v3490_v0, 0.0 }
0x5b01   :  { %v3406_v43 = vpop.f32.mrb[56].mxu1 }
0x5b02   :  { %v3407_v61 = vadd.f32 %v3406_v43, %v3353_v1  ;;  %v4001_v56 = vpop.f32.mrb[57].mxu1 }
0x5b03   :  { %v3409_v46 = vpop.f32.mrb[58].mxu1 }
0x5b04   :  { %v3494_v37 = vadd.f32 %v3492_v44, %v3407_v61  ;;  %v3410_v41 = vadd.f32 %v3409_v46, %v3353_v1  ;;  %v4002_v33 = vpop.f32.mrb[59].mxu1 }
0x5b06   :  { %3496 = vst [vmem:[%s5443_s5] sm:$0xff] %v3494_v37  ;;  %v3495_v19 = vadd.f32 %v3493_v13, %v3410_v41 }
0x5b08   :  { %3497 = vst [vmem:[%s5443_s5 + $0x8] sm:$0xf] %v3495_v19 }

</bundles_post_ra>
